<compile_context>
chip_gen: v5e
topology: v5e:2x2
jax: 0.10.0
libtpu: 0.0.40
codegen_flags: <defaults>
</compile_context>

<pallas_src>
import functools
import math

import jax
import jax.numpy as jnp
from jax.experimental import pallas as pl
from jax.experimental.pallas import tpu as pltpu

_BF16 = jnp.bfloat16
_F32 = jnp.float32


# ----------------------------------------------------------------------------
# In-kernel helpers
# ----------------------------------------------------------------------------
def _layernorm(x, g, b):
    # PyTorch nn.LayerNorm: biased variance, eps=1e-5, elementwise affine.
    mu = jnp.mean(x, axis=-1, keepdims=True)
    var = jnp.mean(jnp.square(x - mu), axis=-1, keepdims=True)
    return (x - mu) * jax.lax.rsqrt(var + 1e-5) * g + b


def _gelu_tanh(x):
    # tanh-approx GELU (EUP transcendental); ~1e-3 max abs deviation from exact erf.
    # TODO(synk): switch to exact-erf GELU if downstream tolerance is tighter than 1e-3.
    c = math.sqrt(2.0 / math.pi)
    return 0.5 * x * (1.0 + jnp.tanh(c * (x + 0.044715 * (x * x * x))))


def _mm(x, w):
    # bf16 MXU matmul, f32 accumulate.
    return jnp.dot(x.astype(_BF16), w.astype(_BF16), preferred_element_type=_F32)


# ----------------------------------------------------------------------------
# The single fused forward kernel
# ----------------------------------------------------------------------------
def _binformer_fwd_kernel(*refs, B, N,
                          enc_depth, enc_heads, enc_dim_head, enc_proj,
                          dec_depth, dec_heads, dec_dim_head, dec_proj,
                          has_e2d):
    o_ref = refs[-1]
    it = iter(refs[:-1])

    def nxt():
        return next(it)[...]

    # ---- patch embedding + positional embedding ------------------------------
    patches = nxt()                               # (B, N, Pd) f32
    pw = nxt()                                    # (Pd, D) bf16
    pb = nxt()                                    # (1, D) f32
    pos = nxt()                                   # (N, D) f32
    Pd = patches.shape[-1]
    x = _mm(patches.reshape(B * N, Pd), pw) + pb  # (B*N, D) f32
    pos_rep = jnp.concatenate([pos] * B, axis=0)  # sublane-aligned repeat over batch
    x = x + pos_rep

    # ---- fused transformer blocks (activations never leave VMEM) -------------
    def attn_block(x, heads, dim_head, has_proj):
        ln_g = nxt(); ln_b = nxt(); w_qkv = nxt()
        if has_proj:
            w_out = nxt(); b_out = nxt()
        d = x.shape[-1]
        inner = heads * dim_head
        scale = dim_head ** -0.5
        h = _layernorm(x, ln_g, ln_b)
        qkv = _mm(h, w_qkv)                       # (B*N, 3*inner) f32
        d_out = d if has_proj else inner
        per_batch = []
        for b in range(B):                        # static unroll over batch
            qkv_b = qkv[b * N:(b + 1) * N]
            acc = jnp.zeros((N, d_out), _F32)
            for hd in range(heads):               # static unroll over heads
                lo = hd * dim_head
                q = qkv_b[:, lo:lo + dim_head]
                k = qkv_b[:, inner + lo:inner + lo + dim_head]
                v = qkv_b[:, 2 * inner + lo:2 * inner + lo + dim_head]
                s = jax.lax.dot_general(
                    q.astype(_BF16), k.astype(_BF16),
                    (((1,), (1,)), ((), ())),
                    preferred_element_type=_F32) * scale
                s = s - jnp.max(s, axis=-1, keepdims=True)
                p = jnp.exp(s)
                p = p * pl.reciprocal(jnp.sum(p, axis=-1, keepdims=True), approx=True)
                pv = _mm(p, v)                    # (N, dim_head)
                if has_proj:
                    # per-head accumulation into the output projection:
                    # sublane-aligned row slice of W_out, no lane concat.
                    acc = acc + _mm(pv, w_out[lo:lo + dim_head, :])
                else:
                    acc = acc + pv
            per_batch.append(acc)
        o = jnp.concatenate(per_batch, axis=0)    # (B*N, d_out), sublane concat
        if has_proj:
            o = o + b_out
        return o + x                              # residual

    def ffn_block(x):
        ln_g = nxt(); ln_b = nxt()
        w1 = nxt(); b1 = nxt(); w2 = nxt(); b2 = nxt()
        h = _layernorm(x, ln_g, ln_b)
        a = _gelu_tanh(_mm(h, w1) + b1)
        return _mm(a, w2) + b2 + x                # residual

    # encoder
    for _ in range(enc_depth):
        x = attn_block(x, enc_heads, enc_dim_head, enc_proj)
        x = ffn_block(x)

    # enc_to_dec (nn.Identity when encoder_dim == decoder_dim)
    if has_e2d:
        e2d_w = nxt(); e2d_b = nxt()
        x = _mm(x, e2d_w) + e2d_b

    # decoder
    for _ in range(dec_depth):
        x = attn_block(x, dec_heads, dec_dim_head, dec_proj)
        x = ffn_block(x)

    # to_pixels: lane-dense (256-wide) final store, the only HBM write.
    pix_w = nxt(); pix_b = nxt()
    y = _mm(x, pix_w) + pix_b                     # (B*N, 256)
    o_ref[...] = y.reshape(B, N, y.shape[-1])


# ----------------------------------------------------------------------------
# Cost estimate (advisory, for XLA scheduling around the custom call)
# ----------------------------------------------------------------------------
def _cost_estimate(cfg, B, N, args):
    def mm(m, k, n):
        return 2 * m * k * n

    T = B * N
    De, Dd = cfg["encoder_dim"], cfg["decoder_dim"]
    Pd = cfg["patch_size"] * cfg["patch_size"] * cfg["channels"]
    fl = mm(T, Pd, De)
    tr = 0

    def layer(d, heads, dh, mlp, proj):
        nonlocal fl, tr
        inner = heads * dh
        fl += mm(T, d, 3 * inner)
        fl += 2 * B * heads * mm(N, dh, N)        # QK^T and PV
        if proj:
            fl += mm(T, inner, d)
        fl += mm(T, d, mlp) + mm(T, mlp, d)
        tr += B * heads * N * N + T * mlp         # exp + tanh

    for _ in range(cfg["enc_depth"]):
        layer(De, cfg["enc_heads"], cfg["enc_dim_head"], cfg["enc_mlp_dim"],
              not (cfg["enc_heads"] == 1 and cfg["enc_dim_head"] == De))
    if De != Dd:
        fl += mm(T, De, Dd)
    for _ in range(cfg["dec_depth"]):
        layer(Dd, cfg["dec_heads"], cfg["dec_dim_head"], Dd * 4,
              not (cfg["dec_heads"] == 1 and cfg["dec_dim_head"] == Dd))
    fl += mm(T, Dd, cfg["pixel_values_per_patch"])

    bytes_in = sum(int(a.size) * int(a.dtype.itemsize) for a in args)
    bytes_out = T * cfg["pixel_values_per_patch"] * 4
    return pl.CostEstimate(flops=int(fl), transcendentals=int(tr),
                           bytes_accessed=int(bytes_in + bytes_out))


# ----------------------------------------------------------------------------
# Parameter init (deterministic, synthetic)
# ----------------------------------------------------------------------------
def init_linear(key, din, dout, bias=True):
    kw, kb = jax.random.split(key)
    w = jax.random.normal(kw, (din, dout), _F32) * 0.02
    b = jax.random.normal(kb, (dout,), _F32) * 0.02 if bias else None
    return w, b


def init_transformer(key, dim, depth, heads, dim_head, mlp_dim):
    inner = heads * dim_head
    project_out = not (heads == 1 and dim_head == dim)
    layers = []
    for _ in range(depth):
        key, k1, k2, k3, k4 = jax.random.split(key, 5)
        w_qkv, _ = init_linear(k1, dim, inner * 3, bias=False)
        if project_out:
            w_out, b_out = init_linear(k2, inner, dim)
        else:
            w_out, b_out = None, None
        attn_p = {"ln_g": jnp.ones(dim, _F32), "ln_b": jnp.zeros(dim, _F32),
                  "w_qkv": w_qkv, "w_out": w_out, "b_out": b_out}
        w1, b1 = init_linear(k3, dim, mlp_dim)
        w2, b2 = init_linear(k4, mlp_dim, dim)
        ff_p = {"ln_g": jnp.ones(dim, _F32), "ln_b": jnp.zeros(dim, _F32),
                "w1": w1, "b1": b1, "w2": w2, "b2": b2}
        layers.append((attn_p, ff_p))
    return layers


def init_binmodel_params(key, cfg):
    keys = jax.random.split(key, 8)
    patch_dim = cfg["patch_size"] * cfg["patch_size"] * cfg["channels"]
    patch_w, patch_b = init_linear(keys[0], patch_dim, cfg["encoder_dim"])
    pos_embedding = jax.random.normal(
        keys[1], (1, cfg["num_patches"], cfg["encoder_dim"]), _F32) * 0.02
    enc_layers = init_transformer(keys[2], cfg["encoder_dim"], cfg["enc_depth"],
                                  cfg["enc_heads"], cfg["enc_dim_head"], cfg["enc_mlp_dim"])
    if cfg["encoder_dim"] != cfg["decoder_dim"]:
        e2d_w, e2d_b = init_linear(keys[3], cfg["encoder_dim"], cfg["decoder_dim"])
    else:
        e2d_w, e2d_b = None, None
    dec_layers = init_transformer(keys[4], cfg["decoder_dim"], cfg["dec_depth"],
                                  cfg["dec_heads"], cfg["dec_dim_head"],
                                  cfg["decoder_dim"] * 4)
    pix_w, pix_b = init_linear(keys[5], cfg["decoder_dim"], cfg["pixel_values_per_patch"])
    return {"patch_w": patch_w, "patch_b": patch_b, "pos_embedding": pos_embedding,
            "enc_layers": enc_layers, "e2d_w": e2d_w, "e2d_b": e2d_b,
            "dec_layers": dec_layers, "pix_w": pix_w, "pix_b": pix_b}


# ----------------------------------------------------------------------------
# BINMODEL forward (single fused pallas_call)
# ----------------------------------------------------------------------------
def binmodel_forward(img, params, cfg):
    B, C, H, W = img.shape
    ps = cfg["patch_size"]
    hn, wn = H // ps, W // ps
    N = hn * wn

    # rearrange 'b c (h p1) (w p2) -> b (h w) (p1 p2 c)'  (pure layout, JAX glue)
    xr = img.reshape(B, C, hn, ps, wn, ps)
    xr = jnp.transpose(xr, (0, 2, 4, 3, 5, 1))
    patches = xr.reshape(B, N, ps * ps * C).astype(_F32)

    D_enc, D_dec = cfg["encoder_dim"], cfg["decoder_dim"]
    enc_proj = not (cfg["enc_heads"] == 1 and cfg["enc_dim_head"] == D_enc)
    dec_proj = not (cfg["dec_heads"] == 1 and cfg["dec_dim_head"] == D_dec)
    has_e2d = params["e2d_w"] is not None

    def wt(w):                      # matmul weight -> bf16 (native MXU dtype)
        return w.astype(_BF16)

    def vec(v):                     # bias / LN param -> (1, D) f32
        return v.reshape(1, -1).astype(_F32)

    args = [patches, wt(params["patch_w"]), vec(params["patch_b"]),
            params["pos_embedding"][0, :N].astype(_F32)]

    def add_layer(attn_p, ff_p, proj):
        args.extend([vec(attn_p["ln_g"]), vec(attn_p["ln_b"]), wt(attn_p["w_qkv"])])
        if proj:
            args.extend([wt(attn_p["w_out"]), vec(attn_p["b_out"])])
        args.extend([vec(ff_p["ln_g"]), vec(ff_p["ln_b"]),
                     wt(ff_p["w1"]), vec(ff_p["b1"]),
                     wt(ff_p["w2"]), vec(ff_p["b2"])])

    for attn_p, ff_p in params["enc_layers"]:
        add_layer(attn_p, ff_p, enc_proj)
    if has_e2d:
        args.extend([wt(params["e2d_w"]), vec(params["e2d_b"])])
    for attn_p, ff_p in params["dec_layers"]:
        add_layer(attn_p, ff_p, dec_proj)
    args.extend([wt(params["pix_w"]), vec(params["pix_b"])])

    P = cfg["pixel_values_per_patch"]
    kernel = functools.partial(
        _binformer_fwd_kernel,
        B=B, N=N,
        enc_depth=cfg["enc_depth"], enc_heads=cfg["enc_heads"],
        enc_dim_head=cfg["enc_dim_head"], enc_proj=enc_proj,
        dec_depth=cfg["dec_depth"], dec_heads=cfg["dec_heads"],
        dec_dim_head=cfg["dec_dim_head"], dec_proj=dec_proj,
        has_e2d=has_e2d)

    vmem_spec = lambda: pl.BlockSpec(memory_space=pltpu.MemorySpace.VMEM)
    out = pl.pallas_call(
        kernel,
        in_specs=[vmem_spec() for _ in args],
        out_specs=vmem_spec(),
        out_shape=jax.ShapeDtypeStruct((B, N, P), _F32),
        cost_estimate=_cost_estimate(cfg, B, N, args),
    )(*args)

    return out[:, None, :, :]                      # .unsqueeze(1) -> (B, 1, N, 256)


# ----------------------------------------------------------------------------
if __name__ == "__main__":
    cfg = dict(
        channels=1, patch_size=4, image_size=16,
        num_patches=16,                      # (16/4)^2
        encoder_dim=32, enc_depth=1, enc_heads=4, enc_dim_head=8, enc_mlp_dim=64,
        decoder_dim=48, dec_depth=1, dec_heads=4, dec_dim_head=8,
        pixel_values_per_patch=256,          # hard-coded in the PyTorch module
    )

    key = jax.random.PRNGKey(0)
    k_img, k_par = jax.random.split(key)
    img = jax.random.normal(k_img, (2, cfg["channels"], 16, 16), _F32)   # NCHW
    params = init_binmodel_params(k_par, cfg)

    fwd = jax.jit(lambda image, prm: binmodel_forward(image, prm, cfg))
    out = fwd(img, params)
    out = jax.block_until_ready(out)
    assert out.shape == (2, 1, cfg["num_patches"], cfg["pixel_values_per_patch"]), out.shape
    assert bool(jnp.all(jnp.isfinite(out)))
    print("KERNEL_OK")
</pallas_src>

<mosaic_0001>
module attributes {stable_mosaic.version = 11 : i64} {
  func.func @_binformer_fwd_kernel(%arg0: memref<2x16x16xf32, #tpu.memory_space<vmem>>, %arg1: memref<16x32xbf16, #tpu.memory_space<vmem>>, %arg2: memref<1x32xf32, #tpu.memory_space<vmem>>, %arg3: memref<16x32xf32, #tpu.memory_space<vmem>>, %arg4: memref<1x32xf32, #tpu.memory_space<vmem>>, %arg5: memref<1x32xf32, #tpu.memory_space<vmem>>, %arg6: memref<32x96xbf16, #tpu.memory_space<vmem>>, %arg7: memref<32x32xbf16, #tpu.memory_space<vmem>>, %arg8: memref<1x32xf32, #tpu.memory_space<vmem>>, %arg9: memref<1x32xf32, #tpu.memory_space<vmem>>, %arg10: memref<1x32xf32, #tpu.memory_space<vmem>>, %arg11: memref<32x64xbf16, #tpu.memory_space<vmem>>, %arg12: memref<1x64xf32, #tpu.memory_space<vmem>>, %arg13: memref<64x32xbf16, #tpu.memory_space<vmem>>, %arg14: memref<1x32xf32, #tpu.memory_space<vmem>>, %arg15: memref<32x48xbf16, #tpu.memory_space<vmem>>, %arg16: memref<1x48xf32, #tpu.memory_space<vmem>>, %arg17: memref<1x48xf32, #tpu.memory_space<vmem>>, %arg18: memref<1x48xf32, #tpu.memory_space<vmem>>, %arg19: memref<48x96xbf16, #tpu.memory_space<vmem>>, %arg20: memref<32x48xbf16, #tpu.memory_space<vmem>>, %arg21: memref<1x48xf32, #tpu.memory_space<vmem>>, %arg22: memref<1x48xf32, #tpu.memory_space<vmem>>, %arg23: memref<1x48xf32, #tpu.memory_space<vmem>>, %arg24: memref<48x192xbf16, #tpu.memory_space<vmem>>, %arg25: memref<1x192xf32, #tpu.memory_space<vmem>>, %arg26: memref<192x48xbf16, #tpu.memory_space<vmem>>, %arg27: memref<1x48xf32, #tpu.memory_space<vmem>>, %arg28: memref<48x256xbf16, #tpu.memory_space<vmem>>, %arg29: memref<1x256xf32, #tpu.memory_space<vmem>>, %arg30: memref<2x16x256xf32, #tpu.memory_space<vmem>>) attributes {dimension_semantics = [], scalar_prefetch = 0 : i64, scratch_operands = 0 : i64, tpu.core_type = #tpu.core_type<tc>} {
    %c0 = arith.constant 0 : index
    %c0_0 = arith.constant 0 : index
    %c0_1 = arith.constant 0 : index
    %0 = vector.load %arg0[%c0, %c0_0, %c0_1] : memref<2x16x16xf32, #tpu.memory_space<vmem>>, vector<2x16x16xf32>
    %c0_2 = arith.constant 0 : index
    %c0_3 = arith.constant 0 : index
    %1 = vector.load %arg1[%c0_2, %c0_3] : memref<16x32xbf16, #tpu.memory_space<vmem>>, vector<16x32xbf16>
    %c0_4 = arith.constant 0 : index
    %c0_5 = arith.constant 0 : index
    %2 = vector.load %arg2[%c0_4, %c0_5] : memref<1x32xf32, #tpu.memory_space<vmem>>, vector<1x32xf32>
    %c0_6 = arith.constant 0 : index
    %c0_7 = arith.constant 0 : index
    %3 = vector.load %arg3[%c0_6, %c0_7] : memref<16x32xf32, #tpu.memory_space<vmem>>, vector<16x32xf32>
    %4 = vector.shape_cast %0 : vector<2x16x16xf32> to vector<32x16xf32>
    %5 = arith.truncf %4 : vector<32x16xf32> to vector<32x16xbf16>
    %cst = arith.constant dense<0.000000e+00> : vector<32x32xf32>
    %6 = tpu.matmul %5, %1, %cst {dimension_numbers = #tpu.dot_dimension_numbers<[1], [0], [0], [1], [0, 0, 1, 1], [], []>} : vector<32x16xbf16>, vector<16x32xbf16>, vector<32x32xf32> -> vector<32x32xf32>
    %7 = vector.broadcast %2 : vector<1x32xf32> to vector<32x32xf32>
    %8 = arith.addf %6, %7 : vector<32x32xf32>
    %9 = tpu.concatenate %3, %3 in 0 : vector<16x32xf32>, vector<16x32xf32> -> vector<32x32xf32>
    %10 = arith.addf %8, %9 : vector<32x32xf32>
    %c0_8 = arith.constant 0 : index
    %c0_9 = arith.constant 0 : index
    %11 = vector.load %arg4[%c0_8, %c0_9] : memref<1x32xf32, #tpu.memory_space<vmem>>, vector<1x32xf32>
    %c0_10 = arith.constant 0 : index
    %c0_11 = arith.constant 0 : index
    %12 = vector.load %arg5[%c0_10, %c0_11] : memref<1x32xf32, #tpu.memory_space<vmem>>, vector<1x32xf32>
    %c0_12 = arith.constant 0 : index
    %c0_13 = arith.constant 0 : index
    %13 = vector.load %arg6[%c0_12, %c0_13] : memref<32x96xbf16, #tpu.memory_space<vmem>>, vector<32x96xbf16>
    %c0_14 = arith.constant 0 : index
    %c0_15 = arith.constant 0 : index
    %14 = vector.load %arg7[%c0_14, %c0_15] : memref<32x32xbf16, #tpu.memory_space<vmem>>, vector<32x32xbf16>
    %c0_16 = arith.constant 0 : index
    %c0_17 = arith.constant 0 : index
    %15 = vector.load %arg8[%c0_16, %c0_17] : memref<1x32xf32, #tpu.memory_space<vmem>>, vector<1x32xf32>
    %cst_18 = arith.constant dense<0.000000e+00> : vector<32xf32>
    %16 = vector.multi_reduction <add>, %10, %cst_18 [1] : vector<32x32xf32> to vector<32xf32>
    %17 = vector.shape_cast %16 : vector<32xf32> to vector<32x1xf32>
    %cst_19 = arith.constant 3.200000e+01 : f32
    %18 = vector.broadcast %cst_19 : f32 to vector<32x1xf32>
    %19 = arith.divf %17, %18 : vector<32x1xf32>
    %20 = vector.broadcast %19 : vector<32x1xf32> to vector<32x32xf32>
    %21 = arith.subf %10, %20 : vector<32x32xf32>
    %22 = arith.mulf %21, %21 : vector<32x32xf32>
    %cst_20 = arith.constant dense<0.000000e+00> : vector<32xf32>
    %23 = vector.multi_reduction <add>, %22, %cst_20 [1] : vector<32x32xf32> to vector<32xf32>
    %24 = vector.shape_cast %23 : vector<32xf32> to vector<32x1xf32>
    %cst_21 = arith.constant 3.200000e+01 : f32
    %25 = vector.broadcast %cst_21 : f32 to vector<32x1xf32>
    %26 = arith.divf %24, %25 : vector<32x1xf32>
    %27 = vector.broadcast %19 : vector<32x1xf32> to vector<32x32xf32>
    %28 = arith.subf %10, %27 : vector<32x32xf32>
    %cst_22 = arith.constant 9.99999974E-6 : f32
    %29 = vector.broadcast %cst_22 : f32 to vector<32x1xf32>
    %30 = arith.addf %26, %29 : vector<32x1xf32>
    %31 = math.rsqrt %30 : vector<32x1xf32>
    %32 = vector.broadcast %31 : vector<32x1xf32> to vector<32x32xf32>
    %33 = arith.mulf %28, %32 : vector<32x32xf32>
    %34 = vector.broadcast %11 : vector<1x32xf32> to vector<32x32xf32>
    %35 = arith.mulf %33, %34 : vector<32x32xf32>
    %36 = vector.broadcast %12 : vector<1x32xf32> to vector<32x32xf32>
    %37 = arith.addf %35, %36 : vector<32x32xf32>
    %38 = arith.truncf %37 : vector<32x32xf32> to vector<32x32xbf16>
    %cst_23 = arith.constant dense<0.000000e+00> : vector<32x96xf32>
    %39 = tpu.matmul %38, %13, %cst_23 {dimension_numbers = #tpu.dot_dimension_numbers<[1], [0], [0], [1], [0, 0, 1, 1], [], []>} : vector<32x32xbf16>, vector<32x96xbf16>, vector<32x96xf32> -> vector<32x96xf32>
    %40 = vector.extract_strided_slice %39 {offsets = [0, 0], sizes = [16, 96], strides = [1, 1]} : vector<32x96xf32> to vector<16x96xf32>
    %cst_24 = arith.constant 0.000000e+00 : f32
    %41 = vector.broadcast %cst_24 : f32 to vector<16x32xf32>
    %42 = vector.extract_strided_slice %40 {offsets = [0, 0], sizes = [16, 8], strides = [1, 1]} : vector<16x96xf32> to vector<16x8xf32>
    %43 = vector.extract_strided_slice %40 {offsets = [0, 32], sizes = [16, 8], strides = [1, 1]} : vector<16x96xf32> to vector<16x8xf32>
    %44 = vector.extract_strided_slice %40 {offsets = [0, 64], sizes = [16, 8], strides = [1, 1]} : vector<16x96xf32> to vector<16x8xf32>
    %45 = arith.truncf %42 : vector<16x8xf32> to vector<16x8xbf16>
    %46 = arith.truncf %43 : vector<16x8xf32> to vector<16x8xbf16>
    %cst_25 = arith.constant dense<0.000000e+00> : vector<16x16xf32>
    %47 = tpu.matmul %45, %46, %cst_25 {dimension_numbers = #tpu.dot_dimension_numbers<[1], [1], [0], [0], [0, 0, 1, 0], [], []>} : vector<16x8xbf16>, vector<16x8xbf16>, vector<16x16xf32> -> vector<16x16xf32>
    %cst_26 = arith.constant 0.353553385 : f32
    %48 = vector.broadcast %cst_26 : f32 to vector<16x16xf32>
    %49 = arith.mulf %47, %48 : vector<16x16xf32>
    %cst_27 = arith.constant dense<0xFF800000> : vector<16xf32>
    %50 = vector.multi_reduction <maximumf>, %49, %cst_27 [1] : vector<16x16xf32> to vector<16xf32>
    %51 = vector.shape_cast %50 : vector<16xf32> to vector<16x1xf32>
    %52 = vector.broadcast %51 : vector<16x1xf32> to vector<16x16xf32>
    %53 = arith.subf %49, %52 : vector<16x16xf32>
    %54 = math.exp %53 : vector<16x16xf32>
    %cst_28 = arith.constant dense<0.000000e+00> : vector<16xf32>
    %55 = vector.multi_reduction <add>, %54, %cst_28 [1] : vector<16x16xf32> to vector<16xf32>
    %56 = vector.shape_cast %55 : vector<16xf32> to vector<16x1xf32>
    %57 = tpu.reciprocal %56 {approx = true} : vector<16x1xf32> -> vector<16x1xf32>
    %58 = vector.broadcast %57 : vector<16x1xf32> to vector<16x16xf32>
    %59 = arith.mulf %54, %58 : vector<16x16xf32>
    %60 = arith.truncf %59 : vector<16x16xf32> to vector<16x16xbf16>
    %61 = arith.truncf %44 : vector<16x8xf32> to vector<16x8xbf16>
    %cst_29 = arith.constant dense<0.000000e+00> : vector<16x8xf32>
    %62 = tpu.matmul %60, %61, %cst_29 {dimension_numbers = #tpu.dot_dimension_numbers<[1], [0], [0], [1], [0, 0, 1, 1], [], []>} : vector<16x16xbf16>, vector<16x8xbf16>, vector<16x8xf32> -> vector<16x8xf32>
    %63 = vector.extract_strided_slice %14 {offsets = [0, 0], sizes = [8, 32], strides = [1, 1]} : vector<32x32xbf16> to vector<8x32xbf16>
    %64 = arith.truncf %62 : vector<16x8xf32> to vector<16x8xbf16>
    %cst_30 = arith.constant dense<0.000000e+00> : vector<16x32xf32>
    %65 = tpu.matmul %64, %63, %cst_30 {dimension_numbers = #tpu.dot_dimension_numbers<[1], [0], [0], [1], [0, 0, 1, 1], [], []>} : vector<16x8xbf16>, vector<8x32xbf16>, vector<16x32xf32> -> vector<16x32xf32>
    %66 = arith.addf %41, %65 : vector<16x32xf32>
    %67 = vector.extract_strided_slice %40 {offsets = [0, 8], sizes = [16, 8], strides = [1, 1]} : vector<16x96xf32> to vector<16x8xf32>
    %68 = vector.extract_strided_slice %40 {offsets = [0, 40], sizes = [16, 8], strides = [1, 1]} : vector<16x96xf32> to vector<16x8xf32>
    %69 = vector.extract_strided_slice %40 {offsets = [0, 72], sizes = [16, 8], strides = [1, 1]} : vector<16x96xf32> to vector<16x8xf32>
    %70 = arith.truncf %67 : vector<16x8xf32> to vector<16x8xbf16>
    %71 = arith.truncf %68 : vector<16x8xf32> to vector<16x8xbf16>
    %cst_31 = arith.constant dense<0.000000e+00> : vector<16x16xf32>
    %72 = tpu.matmul %70, %71, %cst_31 {dimension_numbers = #tpu.dot_dimension_numbers<[1], [1], [0], [0], [0, 0, 1, 0], [], []>} : vector<16x8xbf16>, vector<16x8xbf16>, vector<16x16xf32> -> vector<16x16xf32>
    %cst_32 = arith.constant 0.353553385 : f32
    %73 = vector.broadcast %cst_32 : f32 to vector<16x16xf32>
    %74 = arith.mulf %72, %73 : vector<16x16xf32>
    %cst_33 = arith.constant dense<0xFF800000> : vector<16xf32>
    %75 = vector.multi_reduction <maximumf>, %74, %cst_33 [1] : vector<16x16xf32> to vector<16xf32>
    %76 = vector.shape_cast %75 : vector<16xf32> to vector<16x1xf32>
    %77 = vector.broadcast %76 : vector<16x1xf32> to vector<16x16xf32>
    %78 = arith.subf %74, %77 : vector<16x16xf32>
    %79 = math.exp %78 : vector<16x16xf32>
    %cst_34 = arith.constant dense<0.000000e+00> : vector<16xf32>
    %80 = vector.multi_reduction <add>, %79, %cst_34 [1] : vector<16x16xf32> to vector<16xf32>
    %81 = vector.shape_cast %80 : vector<16xf32> to vector<16x1xf32>
    %82 = tpu.reciprocal %81 {approx = true} : vector<16x1xf32> -> vector<16x1xf32>
    %83 = vector.broadcast %82 : vector<16x1xf32> to vector<16x16xf32>
    %84 = arith.mulf %79, %83 : vector<16x16xf32>
    %85 = arith.truncf %84 : vector<16x16xf32> to vector<16x16xbf16>
    %86 = arith.truncf %69 : vector<16x8xf32> to vector<16x8xbf16>
    %cst_35 = arith.constant dense<0.000000e+00> : vector<16x8xf32>
    %87 = tpu.matmul %85, %86, %cst_35 {dimension_numbers = #tpu.dot_dimension_numbers<[1], [0], [0], [1], [0, 0, 1, 1], [], []>} : vector<16x16xbf16>, vector<16x8xbf16>, vector<16x8xf32> -> vector<16x8xf32>
    %88 = vector.extract_strided_slice %14 {offsets = [8, 0], sizes = [8, 32], strides = [1, 1]} : vector<32x32xbf16> to vector<8x32xbf16>
    %89 = arith.truncf %87 : vector<16x8xf32> to vector<16x8xbf16>
    %cst_36 = arith.constant dense<0.000000e+00> : vector<16x32xf32>
    %90 = tpu.matmul %89, %88, %cst_36 {dimension_numbers = #tpu.dot_dimension_numbers<[1], [0], [0], [1], [0, 0, 1, 1], [], []>} : vector<16x8xbf16>, vector<8x32xbf16>, vector<16x32xf32> -> vector<16x32xf32>
    %91 = arith.addf %66, %90 : vector<16x32xf32>
    %92 = vector.extract_strided_slice %40 {offsets = [0, 16], sizes = [16, 8], strides = [1, 1]} : vector<16x96xf32> to vector<16x8xf32>
    %93 = vector.extract_strided_slice %40 {offsets = [0, 48], sizes = [16, 8], strides = [1, 1]} : vector<16x96xf32> to vector<16x8xf32>
    %94 = vector.extract_strided_slice %40 {offsets = [0, 80], sizes = [16, 8], strides = [1, 1]} : vector<16x96xf32> to vector<16x8xf32>
    %95 = arith.truncf %92 : vector<16x8xf32> to vector<16x8xbf16>
    %96 = arith.truncf %93 : vector<16x8xf32> to vector<16x8xbf16>
    %cst_37 = arith.constant dense<0.000000e+00> : vector<16x16xf32>
    %97 = tpu.matmul %95, %96, %cst_37 {dimension_numbers = #tpu.dot_dimension_numbers<[1], [1], [0], [0], [0, 0, 1, 0], [], []>} : vector<16x8xbf16>, vector<16x8xbf16>, vector<16x16xf32> -> vector<16x16xf32>
    %cst_38 = arith.constant 0.353553385 : f32
    %98 = vector.broadcast %cst_38 : f32 to vector<16x16xf32>
    %99 = arith.mulf %97, %98 : vector<16x16xf32>
    %cst_39 = arith.constant dense<0xFF800000> : vector<16xf32>
    %100 = vector.multi_reduction <maximumf>, %99, %cst_39 [1] : vector<16x16xf32> to vector<16xf32>
    %101 = vector.shape_cast %100 : vector<16xf32> to vector<16x1xf32>
    %102 = vector.broadcast %101 : vector<16x1xf32> to vector<16x16xf32>
    %103 = arith.subf %99, %102 : vector<16x16xf32>
    %104 = math.exp %103 : vector<16x16xf32>
    %cst_40 = arith.constant dense<0.000000e+00> : vector<16xf32>
    %105 = vector.multi_reduction <add>, %104, %cst_40 [1] : vector<16x16xf32> to vector<16xf32>
    %106 = vector.shape_cast %105 : vector<16xf32> to vector<16x1xf32>
    %107 = tpu.reciprocal %106 {approx = true} : vector<16x1xf32> -> vector<16x1xf32>
    %108 = vector.broadcast %107 : vector<16x1xf32> to vector<16x16xf32>
    %109 = arith.mulf %104, %108 : vector<16x16xf32>
    %110 = arith.truncf %109 : vector<16x16xf32> to vector<16x16xbf16>
    %111 = arith.truncf %94 : vector<16x8xf32> to vector<16x8xbf16>
    %cst_41 = arith.constant dense<0.000000e+00> : vector<16x8xf32>
    %112 = tpu.matmul %110, %111, %cst_41 {dimension_numbers = #tpu.dot_dimension_numbers<[1], [0], [0], [1], [0, 0, 1, 1], [], []>} : vector<16x16xbf16>, vector<16x8xbf16>, vector<16x8xf32> -> vector<16x8xf32>
    %113 = vector.extract_strided_slice %14 {offsets = [16, 0], sizes = [8, 32], strides = [1, 1]} : vector<32x32xbf16> to vector<8x32xbf16>
    %114 = arith.truncf %112 : vector<16x8xf32> to vector<16x8xbf16>
    %cst_42 = arith.constant dense<0.000000e+00> : vector<16x32xf32>
    %115 = tpu.matmul %114, %113, %cst_42 {dimension_numbers = #tpu.dot_dimension_numbers<[1], [0], [0], [1], [0, 0, 1, 1], [], []>} : vector<16x8xbf16>, vector<8x32xbf16>, vector<16x32xf32> -> vector<16x32xf32>
    %116 = arith.addf %91, %115 : vector<16x32xf32>
    %117 = vector.extract_strided_slice %40 {offsets = [0, 24], sizes = [16, 8], strides = [1, 1]} : vector<16x96xf32> to vector<16x8xf32>
    %118 = vector.extract_strided_slice %40 {offsets = [0, 56], sizes = [16, 8], strides = [1, 1]} : vector<16x96xf32> to vector<16x8xf32>
    %119 = vector.extract_strided_slice %40 {offsets = [0, 88], sizes = [16, 8], strides = [1, 1]} : vector<16x96xf32> to vector<16x8xf32>
    %120 = arith.truncf %117 : vector<16x8xf32> to vector<16x8xbf16>
    %121 = arith.truncf %118 : vector<16x8xf32> to vector<16x8xbf16>
    %cst_43 = arith.constant dense<0.000000e+00> : vector<16x16xf32>
    %122 = tpu.matmul %120, %121, %cst_43 {dimension_numbers = #tpu.dot_dimension_numbers<[1], [1], [0], [0], [0, 0, 1, 0], [], []>} : vector<16x8xbf16>, vector<16x8xbf16>, vector<16x16xf32> -> vector<16x16xf32>
    %cst_44 = arith.constant 0.353553385 : f32
    %123 = vector.broadcast %cst_44 : f32 to vector<16x16xf32>
    %124 = arith.mulf %122, %123 : vector<16x16xf32>
    %cst_45 = arith.constant dense<0xFF800000> : vector<16xf32>
    %125 = vector.multi_reduction <maximumf>, %124, %cst_45 [1] : vector<16x16xf32> to vector<16xf32>
    %126 = vector.shape_cast %125 : vector<16xf32> to vector<16x1xf32>
    %127 = vector.broadcast %126 : vector<16x1xf32> to vector<16x16xf32>
    %128 = arith.subf %124, %127 : vector<16x16xf32>
    %129 = math.exp %128 : vector<16x16xf32>
    %cst_46 = arith.constant dense<0.000000e+00> : vector<16xf32>
    %130 = vector.multi_reduction <add>, %129, %cst_46 [1] : vector<16x16xf32> to vector<16xf32>
    %131 = vector.shape_cast %130 : vector<16xf32> to vector<16x1xf32>
    %132 = tpu.reciprocal %131 {approx = true} : vector<16x1xf32> -> vector<16x1xf32>
    %133 = vector.broadcast %132 : vector<16x1xf32> to vector<16x16xf32>
    %134 = arith.mulf %129, %133 : vector<16x16xf32>
    %135 = arith.truncf %134 : vector<16x16xf32> to vector<16x16xbf16>
    %136 = arith.truncf %119 : vector<16x8xf32> to vector<16x8xbf16>
    %cst_47 = arith.constant dense<0.000000e+00> : vector<16x8xf32>
    %137 = tpu.matmul %135, %136, %cst_47 {dimension_numbers = #tpu.dot_dimension_numbers<[1], [0], [0], [1], [0, 0, 1, 1], [], []>} : vector<16x16xbf16>, vector<16x8xbf16>, vector<16x8xf32> -> vector<16x8xf32>
    %138 = vector.extract_strided_slice %14 {offsets = [24, 0], sizes = [8, 32], strides = [1, 1]} : vector<32x32xbf16> to vector<8x32xbf16>
    %139 = arith.truncf %137 : vector<16x8xf32> to vector<16x8xbf16>
    %cst_48 = arith.constant dense<0.000000e+00> : vector<16x32xf32>
    %140 = tpu.matmul %139, %138, %cst_48 {dimension_numbers = #tpu.dot_dimension_numbers<[1], [0], [0], [1], [0, 0, 1, 1], [], []>} : vector<16x8xbf16>, vector<8x32xbf16>, vector<16x32xf32> -> vector<16x32xf32>
    %141 = arith.addf %116, %140 : vector<16x32xf32>
    %142 = vector.extract_strided_slice %39 {offsets = [16, 0], sizes = [16, 96], strides = [1, 1]} : vector<32x96xf32> to vector<16x96xf32>
    %cst_49 = arith.constant 0.000000e+00 : f32
    %143 = vector.broadcast %cst_49 : f32 to vector<16x32xf32>
    %144 = vector.extract_strided_slice %142 {offsets = [0, 0], sizes = [16, 8], strides = [1, 1]} : vector<16x96xf32> to vector<16x8xf32>
    %145 = vector.extract_strided_slice %142 {offsets = [0, 32], sizes = [16, 8], strides = [1, 1]} : vector<16x96xf32> to vector<16x8xf32>
    %146 = vector.extract_strided_slice %142 {offsets = [0, 64], sizes = [16, 8], strides = [1, 1]} : vector<16x96xf32> to vector<16x8xf32>
    %147 = arith.truncf %144 : vector<16x8xf32> to vector<16x8xbf16>
    %148 = arith.truncf %145 : vector<16x8xf32> to vector<16x8xbf16>
    %cst_50 = arith.constant dense<0.000000e+00> : vector<16x16xf32>
    %149 = tpu.matmul %147, %148, %cst_50 {dimension_numbers = #tpu.dot_dimension_numbers<[1], [1], [0], [0], [0, 0, 1, 0], [], []>} : vector<16x8xbf16>, vector<16x8xbf16>, vector<16x16xf32> -> vector<16x16xf32>
    %cst_51 = arith.constant 0.353553385 : f32
    %150 = vector.broadcast %cst_51 : f32 to vector<16x16xf32>
    %151 = arith.mulf %149, %150 : vector<16x16xf32>
    %cst_52 = arith.constant dense<0xFF800000> : vector<16xf32>
    %152 = vector.multi_reduction <maximumf>, %151, %cst_52 [1] : vector<16x16xf32> to vector<16xf32>
    %153 = vector.shape_cast %152 : vector<16xf32> to vector<16x1xf32>
    %154 = vector.broadcast %153 : vector<16x1xf32> to vector<16x16xf32>
    %155 = arith.subf %151, %154 : vector<16x16xf32>
    %156 = math.exp %155 : vector<16x16xf32>
    %cst_53 = arith.constant dense<0.000000e+00> : vector<16xf32>
    %157 = vector.multi_reduction <add>, %156, %cst_53 [1] : vector<16x16xf32> to vector<16xf32>
    %158 = vector.shape_cast %157 : vector<16xf32> to vector<16x1xf32>
    %159 = tpu.reciprocal %158 {approx = true} : vector<16x1xf32> -> vector<16x1xf32>
    %160 = vector.broadcast %159 : vector<16x1xf32> to vector<16x16xf32>
    %161 = arith.mulf %156, %160 : vector<16x16xf32>
    %162 = arith.truncf %161 : vector<16x16xf32> to vector<16x16xbf16>
    %163 = arith.truncf %146 : vector<16x8xf32> to vector<16x8xbf16>
    %cst_54 = arith.constant dense<0.000000e+00> : vector<16x8xf32>
    %164 = tpu.matmul %162, %163, %cst_54 {dimension_numbers = #tpu.dot_dimension_numbers<[1], [0], [0], [1], [0, 0, 1, 1], [], []>} : vector<16x16xbf16>, vector<16x8xbf16>, vector<16x8xf32> -> vector<16x8xf32>
    %165 = vector.extract_strided_slice %14 {offsets = [0, 0], sizes = [8, 32], strides = [1, 1]} : vector<32x32xbf16> to vector<8x32xbf16>
    %166 = arith.truncf %164 : vector<16x8xf32> to vector<16x8xbf16>
    %cst_55 = arith.constant dense<0.000000e+00> : vector<16x32xf32>
    %167 = tpu.matmul %166, %165, %cst_55 {dimension_numbers = #tpu.dot_dimension_numbers<[1], [0], [0], [1], [0, 0, 1, 1], [], []>} : vector<16x8xbf16>, vector<8x32xbf16>, vector<16x32xf32> -> vector<16x32xf32>
    %168 = arith.addf %143, %167 : vector<16x32xf32>
    %169 = vector.extract_strided_slice %142 {offsets = [0, 8], sizes = [16, 8], strides = [1, 1]} : vector<16x96xf32> to vector<16x8xf32>
    %170 = vector.extract_strided_slice %142 {offsets = [0, 40], sizes = [16, 8], strides = [1, 1]} : vector<16x96xf32> to vector<16x8xf32>
    %171 = vector.extract_strided_slice %142 {offsets = [0, 72], sizes = [16, 8], strides = [1, 1]} : vector<16x96xf32> to vector<16x8xf32>
    %172 = arith.truncf %169 : vector<16x8xf32> to vector<16x8xbf16>
    %173 = arith.truncf %170 : vector<16x8xf32> to vector<16x8xbf16>
    %cst_56 = arith.constant dense<0.000000e+00> : vector<16x16xf32>
    %174 = tpu.matmul %172, %173, %cst_56 {dimension_numbers = #tpu.dot_dimension_numbers<[1], [1], [0], [0], [0, 0, 1, 0], [], []>} : vector<16x8xbf16>, vector<16x8xbf16>, vector<16x16xf32> -> vector<16x16xf32>
    %cst_57 = arith.constant 0.353553385 : f32
    %175 = vector.broadcast %cst_57 : f32 to vector<16x16xf32>
    %176 = arith.mulf %174, %175 : vector<16x16xf32>
    %cst_58 = arith.constant dense<0xFF800000> : vector<16xf32>
    %177 = vector.multi_reduction <maximumf>, %176, %cst_58 [1] : vector<16x16xf32> to vector<16xf32>
    %178 = vector.shape_cast %177 : vector<16xf32> to vector<16x1xf32>
    %179 = vector.broadcast %178 : vector<16x1xf32> to vector<16x16xf32>
    %180 = arith.subf %176, %179 : vector<16x16xf32>
    %181 = math.exp %180 : vector<16x16xf32>
    %cst_59 = arith.constant dense<0.000000e+00> : vector<16xf32>
    %182 = vector.multi_reduction <add>, %181, %cst_59 [1] : vector<16x16xf32> to vector<16xf32>
    %183 = vector.shape_cast %182 : vector<16xf32> to vector<16x1xf32>
    %184 = tpu.reciprocal %183 {approx = true} : vector<16x1xf32> -> vector<16x1xf32>
    %185 = vector.broadcast %184 : vector<16x1xf32> to vector<16x16xf32>
    %186 = arith.mulf %181, %185 : vector<16x16xf32>
    %187 = arith.truncf %186 : vector<16x16xf32> to vector<16x16xbf16>
    %188 = arith.truncf %171 : vector<16x8xf32> to vector<16x8xbf16>
    %cst_60 = arith.constant dense<0.000000e+00> : vector<16x8xf32>
    %189 = tpu.matmul %187, %188, %cst_60 {dimension_numbers = #tpu.dot_dimension_numbers<[1], [0], [0], [1], [0, 0, 1, 1], [], []>} : vector<16x16xbf16>, vector<16x8xbf16>, vector<16x8xf32> -> vector<16x8xf32>
    %190 = vector.extract_strided_slice %14 {offsets = [8, 0], sizes = [8, 32], strides = [1, 1]} : vector<32x32xbf16> to vector<8x32xbf16>
    %191 = arith.truncf %189 : vector<16x8xf32> to vector<16x8xbf16>
    %cst_61 = arith.constant dense<0.000000e+00> : vector<16x32xf32>
    %192 = tpu.matmul %191, %190, %cst_61 {dimension_numbers = #tpu.dot_dimension_numbers<[1], [0], [0], [1], [0, 0, 1, 1], [], []>} : vector<16x8xbf16>, vector<8x32xbf16>, vector<16x32xf32> -> vector<16x32xf32>
    %193 = arith.addf %168, %192 : vector<16x32xf32>
    %194 = vector.extract_strided_slice %142 {offsets = [0, 16], sizes = [16, 8], strides = [1, 1]} : vector<16x96xf32> to vector<16x8xf32>
    %195 = vector.extract_strided_slice %142 {offsets = [0, 48], sizes = [16, 8], strides = [1, 1]} : vector<16x96xf32> to vector<16x8xf32>
    %196 = vector.extract_strided_slice %142 {offsets = [0, 80], sizes = [16, 8], strides = [1, 1]} : vector<16x96xf32> to vector<16x8xf32>
    %197 = arith.truncf %194 : vector<16x8xf32> to vector<16x8xbf16>
    %198 = arith.truncf %195 : vector<16x8xf32> to vector<16x8xbf16>
    %cst_62 = arith.constant dense<0.000000e+00> : vector<16x16xf32>
    %199 = tpu.matmul %197, %198, %cst_62 {dimension_numbers = #tpu.dot_dimension_numbers<[1], [1], [0], [0], [0, 0, 1, 0], [], []>} : vector<16x8xbf16>, vector<16x8xbf16>, vector<16x16xf32> -> vector<16x16xf32>
    %cst_63 = arith.constant 0.353553385 : f32
    %200 = vector.broadcast %cst_63 : f32 to vector<16x16xf32>
    %201 = arith.mulf %199, %200 : vector<16x16xf32>
    %cst_64 = arith.constant dense<0xFF800000> : vector<16xf32>
    %202 = vector.multi_reduction <maximumf>, %201, %cst_64 [1] : vector<16x16xf32> to vector<16xf32>
    %203 = vector.shape_cast %202 : vector<16xf32> to vector<16x1xf32>
    %204 = vector.broadcast %203 : vector<16x1xf32> to vector<16x16xf32>
    %205 = arith.subf %201, %204 : vector<16x16xf32>
    %206 = math.exp %205 : vector<16x16xf32>
    %cst_65 = arith.constant dense<0.000000e+00> : vector<16xf32>
    %207 = vector.multi_reduction <add>, %206, %cst_65 [1] : vector<16x16xf32> to vector<16xf32>
    %208 = vector.shape_cast %207 : vector<16xf32> to vector<16x1xf32>
    %209 = tpu.reciprocal %208 {approx = true} : vector<16x1xf32> -> vector<16x1xf32>
    %210 = vector.broadcast %209 : vector<16x1xf32> to vector<16x16xf32>
    %211 = arith.mulf %206, %210 : vector<16x16xf32>
    %212 = arith.truncf %211 : vector<16x16xf32> to vector<16x16xbf16>
    %213 = arith.truncf %196 : vector<16x8xf32> to vector<16x8xbf16>
    %cst_66 = arith.constant dense<0.000000e+00> : vector<16x8xf32>
    %214 = tpu.matmul %212, %213, %cst_66 {dimension_numbers = #tpu.dot_dimension_numbers<[1], [0], [0], [1], [0, 0, 1, 1], [], []>} : vector<16x16xbf16>, vector<16x8xbf16>, vector<16x8xf32> -> vector<16x8xf32>
    %215 = vector.extract_strided_slice %14 {offsets = [16, 0], sizes = [8, 32], strides = [1, 1]} : vector<32x32xbf16> to vector<8x32xbf16>
    %216 = arith.truncf %214 : vector<16x8xf32> to vector<16x8xbf16>
    %cst_67 = arith.constant dense<0.000000e+00> : vector<16x32xf32>
    %217 = tpu.matmul %216, %215, %cst_67 {dimension_numbers = #tpu.dot_dimension_numbers<[1], [0], [0], [1], [0, 0, 1, 1], [], []>} : vector<16x8xbf16>, vector<8x32xbf16>, vector<16x32xf32> -> vector<16x32xf32>
    %218 = arith.addf %193, %217 : vector<16x32xf32>
    %219 = vector.extract_strided_slice %142 {offsets = [0, 24], sizes = [16, 8], strides = [1, 1]} : vector<16x96xf32> to vector<16x8xf32>
    %220 = vector.extract_strided_slice %142 {offsets = [0, 56], sizes = [16, 8], strides = [1, 1]} : vector<16x96xf32> to vector<16x8xf32>
    %221 = vector.extract_strided_slice %142 {offsets = [0, 88], sizes = [16, 8], strides = [1, 1]} : vector<16x96xf32> to vector<16x8xf32>
    %222 = arith.truncf %219 : vector<16x8xf32> to vector<16x8xbf16>
    %223 = arith.truncf %220 : vector<16x8xf32> to vector<16x8xbf16>
    %cst_68 = arith.constant dense<0.000000e+00> : vector<16x16xf32>
    %224 = tpu.matmul %222, %223, %cst_68 {dimension_numbers = #tpu.dot_dimension_numbers<[1], [1], [0], [0], [0, 0, 1, 0], [], []>} : vector<16x8xbf16>, vector<16x8xbf16>, vector<16x16xf32> -> vector<16x16xf32>
    %cst_69 = arith.constant 0.353553385 : f32
    %225 = vector.broadcast %cst_69 : f32 to vector<16x16xf32>
    %226 = arith.mulf %224, %225 : vector<16x16xf32>
    %cst_70 = arith.constant dense<0xFF800000> : vector<16xf32>
    %227 = vector.multi_reduction <maximumf>, %226, %cst_70 [1] : vector<16x16xf32> to vector<16xf32>
    %228 = vector.shape_cast %227 : vector<16xf32> to vector<16x1xf32>
    %229 = vector.broadcast %228 : vector<16x1xf32> to vector<16x16xf32>
    %230 = arith.subf %226, %229 : vector<16x16xf32>
    %231 = math.exp %230 : vector<16x16xf32>
    %cst_71 = arith.constant dense<0.000000e+00> : vector<16xf32>
    %232 = vector.multi_reduction <add>, %231, %cst_71 [1] : vector<16x16xf32> to vector<16xf32>
    %233 = vector.shape_cast %232 : vector<16xf32> to vector<16x1xf32>
    %234 = tpu.reciprocal %233 {approx = true} : vector<16x1xf32> -> vector<16x1xf32>
    %235 = vector.broadcast %234 : vector<16x1xf32> to vector<16x16xf32>
    %236 = arith.mulf %231, %235 : vector<16x16xf32>
    %237 = arith.truncf %236 : vector<16x16xf32> to vector<16x16xbf16>
    %238 = arith.truncf %221 : vector<16x8xf32> to vector<16x8xbf16>
    %cst_72 = arith.constant dense<0.000000e+00> : vector<16x8xf32>
    %239 = tpu.matmul %237, %238, %cst_72 {dimension_numbers = #tpu.dot_dimension_numbers<[1], [0], [0], [1], [0, 0, 1, 1], [], []>} : vector<16x16xbf16>, vector<16x8xbf16>, vector<16x8xf32> -> vector<16x8xf32>
    %240 = vector.extract_strided_slice %14 {offsets = [24, 0], sizes = [8, 32], strides = [1, 1]} : vector<32x32xbf16> to vector<8x32xbf16>
    %241 = arith.truncf %239 : vector<16x8xf32> to vector<16x8xbf16>
    %cst_73 = arith.constant dense<0.000000e+00> : vector<16x32xf32>
    %242 = tpu.matmul %241, %240, %cst_73 {dimension_numbers = #tpu.dot_dimension_numbers<[1], [0], [0], [1], [0, 0, 1, 1], [], []>} : vector<16x8xbf16>, vector<8x32xbf16>, vector<16x32xf32> -> vector<16x32xf32>
    %243 = arith.addf %218, %242 : vector<16x32xf32>
    %244 = tpu.concatenate %141, %243 in 0 : vector<16x32xf32>, vector<16x32xf32> -> vector<32x32xf32>
    %245 = vector.broadcast %15 : vector<1x32xf32> to vector<32x32xf32>
    %246 = arith.addf %244, %245 : vector<32x32xf32>
    %247 = arith.addf %246, %10 : vector<32x32xf32>
    %c0_74 = arith.constant 0 : index
    %c0_75 = arith.constant 0 : index
    %248 = vector.load %arg9[%c0_74, %c0_75] : memref<1x32xf32, #tpu.memory_space<vmem>>, vector<1x32xf32>
    %c0_76 = arith.constant 0 : index
    %c0_77 = arith.constant 0 : index
    %249 = vector.load %arg10[%c0_76, %c0_77] : memref<1x32xf32, #tpu.memory_space<vmem>>, vector<1x32xf32>
    %c0_78 = arith.constant 0 : index
    %c0_79 = arith.constant 0 : index
    %250 = vector.load %arg11[%c0_78, %c0_79] : memref<32x64xbf16, #tpu.memory_space<vmem>>, vector<32x64xbf16>
    %c0_80 = arith.constant 0 : index
    %c0_81 = arith.constant 0 : index
    %251 = vector.load %arg12[%c0_80, %c0_81] : memref<1x64xf32, #tpu.memory_space<vmem>>, vector<1x64xf32>
    %c0_82 = arith.constant 0 : index
    %c0_83 = arith.constant 0 : index
    %252 = vector.load %arg13[%c0_82, %c0_83] : memref<64x32xbf16, #tpu.memory_space<vmem>>, vector<64x32xbf16>
    %c0_84 = arith.constant 0 : index
    %c0_85 = arith.constant 0 : index
    %253 = vector.load %arg14[%c0_84, %c0_85] : memref<1x32xf32, #tpu.memory_space<vmem>>, vector<1x32xf32>
    %cst_86 = arith.constant dense<0.000000e+00> : vector<32xf32>
    %254 = vector.multi_reduction <add>, %247, %cst_86 [1] : vector<32x32xf32> to vector<32xf32>
    %255 = vector.shape_cast %254 : vector<32xf32> to vector<32x1xf32>
    %cst_87 = arith.constant 3.200000e+01 : f32
    %256 = vector.broadcast %cst_87 : f32 to vector<32x1xf32>
    %257 = arith.divf %255, %256 : vector<32x1xf32>
    %258 = vector.broadcast %257 : vector<32x1xf32> to vector<32x32xf32>
    %259 = arith.subf %247, %258 : vector<32x32xf32>
    %260 = arith.mulf %259, %259 : vector<32x32xf32>
    %cst_88 = arith.constant dense<0.000000e+00> : vector<32xf32>
    %261 = vector.multi_reduction <add>, %260, %cst_88 [1] : vector<32x32xf32> to vector<32xf32>
    %262 = vector.shape_cast %261 : vector<32xf32> to vector<32x1xf32>
    %cst_89 = arith.constant 3.200000e+01 : f32
    %263 = vector.broadcast %cst_89 : f32 to vector<32x1xf32>
    %264 = arith.divf %262, %263 : vector<32x1xf32>
    %265 = vector.broadcast %257 : vector<32x1xf32> to vector<32x32xf32>
    %266 = arith.subf %247, %265 : vector<32x32xf32>
    %cst_90 = arith.constant 9.99999974E-6 : f32
    %267 = vector.broadcast %cst_90 : f32 to vector<32x1xf32>
    %268 = arith.addf %264, %267 : vector<32x1xf32>
    %269 = math.rsqrt %268 : vector<32x1xf32>
    %270 = vector.broadcast %269 : vector<32x1xf32> to vector<32x32xf32>
    %271 = arith.mulf %266, %270 : vector<32x32xf32>
    %272 = vector.broadcast %248 : vector<1x32xf32> to vector<32x32xf32>
    %273 = arith.mulf %271, %272 : vector<32x32xf32>
    %274 = vector.broadcast %249 : vector<1x32xf32> to vector<32x32xf32>
    %275 = arith.addf %273, %274 : vector<32x32xf32>
    %276 = arith.truncf %275 : vector<32x32xf32> to vector<32x32xbf16>
    %cst_91 = arith.constant dense<0.000000e+00> : vector<32x64xf32>
    %277 = tpu.matmul %276, %250, %cst_91 {dimension_numbers = #tpu.dot_dimension_numbers<[1], [0], [0], [1], [0, 0, 1, 1], [], []>} : vector<32x32xbf16>, vector<32x64xbf16>, vector<32x64xf32> -> vector<32x64xf32>
    %278 = vector.broadcast %251 : vector<1x64xf32> to vector<32x64xf32>
    %279 = arith.addf %277, %278 : vector<32x64xf32>
    %cst_92 = arith.constant 5.000000e-01 : f32
    %280 = vector.broadcast %cst_92 : f32 to vector<32x64xf32>
    %281 = arith.mulf %280, %279 : vector<32x64xf32>
    %282 = arith.mulf %279, %279 : vector<32x64xf32>
    %283 = arith.mulf %282, %279 : vector<32x64xf32>
    %cst_93 = arith.constant 4.471500e-02 : f32
    %284 = vector.broadcast %cst_93 : f32 to vector<32x64xf32>
    %285 = arith.mulf %284, %283 : vector<32x64xf32>
    %286 = arith.addf %279, %285 : vector<32x64xf32>
    %cst_94 = arith.constant 0.797884583 : f32
    %287 = vector.broadcast %cst_94 : f32 to vector<32x64xf32>
    %288 = arith.mulf %287, %286 : vector<32x64xf32>
    %289 = math.tanh %288 : vector<32x64xf32>
    %cst_95 = arith.constant 1.000000e+00 : f32
    %290 = vector.broadcast %cst_95 : f32 to vector<32x64xf32>
    %291 = arith.addf %290, %289 : vector<32x64xf32>
    %292 = arith.mulf %281, %291 : vector<32x64xf32>
    %293 = arith.truncf %292 : vector<32x64xf32> to vector<32x64xbf16>
    %cst_96 = arith.constant dense<0.000000e+00> : vector<32x32xf32>
    %294 = tpu.matmul %293, %252, %cst_96 {dimension_numbers = #tpu.dot_dimension_numbers<[1], [0], [0], [1], [0, 0, 1, 1], [], []>} : vector<32x64xbf16>, vector<64x32xbf16>, vector<32x32xf32> -> vector<32x32xf32>
    %295 = vector.broadcast %253 : vector<1x32xf32> to vector<32x32xf32>
    %296 = arith.addf %294, %295 : vector<32x32xf32>
    %297 = arith.addf %296, %247 : vector<32x32xf32>
    %c0_97 = arith.constant 0 : index
    %c0_98 = arith.constant 0 : index
    %298 = vector.load %arg15[%c0_97, %c0_98] : memref<32x48xbf16, #tpu.memory_space<vmem>>, vector<32x48xbf16>
    %c0_99 = arith.constant 0 : index
    %c0_100 = arith.constant 0 : index
    %299 = vector.load %arg16[%c0_99, %c0_100] : memref<1x48xf32, #tpu.memory_space<vmem>>, vector<1x48xf32>
    %300 = arith.truncf %297 : vector<32x32xf32> to vector<32x32xbf16>
    %cst_101 = arith.constant dense<0.000000e+00> : vector<32x48xf32>
    %301 = tpu.matmul %300, %298, %cst_101 {dimension_numbers = #tpu.dot_dimension_numbers<[1], [0], [0], [1], [0, 0, 1, 1], [], []>} : vector<32x32xbf16>, vector<32x48xbf16>, vector<32x48xf32> -> vector<32x48xf32>
    %302 = vector.broadcast %299 : vector<1x48xf32> to vector<32x48xf32>
    %303 = arith.addf %301, %302 : vector<32x48xf32>
    %c0_102 = arith.constant 0 : index
    %c0_103 = arith.constant 0 : index
    %304 = vector.load %arg17[%c0_102, %c0_103] : memref<1x48xf32, #tpu.memory_space<vmem>>, vector<1x48xf32>
    %c0_104 = arith.constant 0 : index
    %c0_105 = arith.constant 0 : index
    %305 = vector.load %arg18[%c0_104, %c0_105] : memref<1x48xf32, #tpu.memory_space<vmem>>, vector<1x48xf32>
    %c0_106 = arith.constant 0 : index
    %c0_107 = arith.constant 0 : index
    %306 = vector.load %arg19[%c0_106, %c0_107] : memref<48x96xbf16, #tpu.memory_space<vmem>>, vector<48x96xbf16>
    %c0_108 = arith.constant 0 : index
    %c0_109 = arith.constant 0 : index
    %307 = vector.load %arg20[%c0_108, %c0_109] : memref<32x48xbf16, #tpu.memory_space<vmem>>, vector<32x48xbf16>
    %c0_110 = arith.constant 0 : index
    %c0_111 = arith.constant 0 : index
    %308 = vector.load %arg21[%c0_110, %c0_111] : memref<1x48xf32, #tpu.memory_space<vmem>>, vector<1x48xf32>
    %cst_112 = arith.constant dense<0.000000e+00> : vector<32xf32>
    %309 = vector.multi_reduction <add>, %303, %cst_112 [1] : vector<32x48xf32> to vector<32xf32>
    %310 = vector.shape_cast %309 : vector<32xf32> to vector<32x1xf32>
    %cst_113 = arith.constant 4.800000e+01 : f32
    %311 = vector.broadcast %cst_113 : f32 to vector<32x1xf32>
    %312 = arith.divf %310, %311 : vector<32x1xf32>
    %313 = vector.broadcast %312 : vector<32x1xf32> to vector<32x48xf32>
    %314 = arith.subf %303, %313 : vector<32x48xf32>
    %315 = arith.mulf %314, %314 : vector<32x48xf32>
    %cst_114 = arith.constant dense<0.000000e+00> : vector<32xf32>
    %316 = vector.multi_reduction <add>, %315, %cst_114 [1] : vector<32x48xf32> to vector<32xf32>
    %317 = vector.shape_cast %316 : vector<32xf32> to vector<32x1xf32>
    %cst_115 = arith.constant 4.800000e+01 : f32
    %318 = vector.broadcast %cst_115 : f32 to vector<32x1xf32>
    %319 = arith.divf %317, %318 : vector<32x1xf32>
    %320 = vector.broadcast %312 : vector<32x1xf32> to vector<32x48xf32>
    %321 = arith.subf %303, %320 : vector<32x48xf32>
    %cst_116 = arith.constant 9.99999974E-6 : f32
    %322 = vector.broadcast %cst_116 : f32 to vector<32x1xf32>
    %323 = arith.addf %319, %322 : vector<32x1xf32>
    %324 = math.rsqrt %323 : vector<32x1xf32>
    %325 = vector.broadcast %324 : vector<32x1xf32> to vector<32x48xf32>
    %326 = arith.mulf %321, %325 : vector<32x48xf32>
    %327 = vector.broadcast %304 : vector<1x48xf32> to vector<32x48xf32>
    %328 = arith.mulf %326, %327 : vector<32x48xf32>
    %329 = vector.broadcast %305 : vector<1x48xf32> to vector<32x48xf32>
    %330 = arith.addf %328, %329 : vector<32x48xf32>
    %331 = arith.truncf %330 : vector<32x48xf32> to vector<32x48xbf16>
    %cst_117 = arith.constant dense<0.000000e+00> : vector<32x96xf32>
    %332 = tpu.matmul %331, %306, %cst_117 {dimension_numbers = #tpu.dot_dimension_numbers<[1], [0], [0], [1], [0, 0, 1, 1], [], []>} : vector<32x48xbf16>, vector<48x96xbf16>, vector<32x96xf32> -> vector<32x96xf32>
    %333 = vector.extract_strided_slice %332 {offsets = [0, 0], sizes = [16, 96], strides = [1, 1]} : vector<32x96xf32> to vector<16x96xf32>
    %cst_118 = arith.constant 0.000000e+00 : f32
    %334 = vector.broadcast %cst_118 : f32 to vector<16x48xf32>
    %335 = vector.extract_strided_slice %333 {offsets = [0, 0], sizes = [16, 8], strides = [1, 1]} : vector<16x96xf32> to vector<16x8xf32>
    %336 = vector.extract_strided_slice %333 {offsets = [0, 32], sizes = [16, 8], strides = [1, 1]} : vector<16x96xf32> to vector<16x8xf32>
    %337 = vector.extract_strided_slice %333 {offsets = [0, 64], sizes = [16, 8], strides = [1, 1]} : vector<16x96xf32> to vector<16x8xf32>
    %338 = arith.truncf %335 : vector<16x8xf32> to vector<16x8xbf16>
    %339 = arith.truncf %336 : vector<16x8xf32> to vector<16x8xbf16>
    %cst_119 = arith.constant dense<0.000000e+00> : vector<16x16xf32>
    %340 = tpu.matmul %338, %339, %cst_119 {dimension_numbers = #tpu.dot_dimension_numbers<[1], [1], [0], [0], [0, 0, 1, 0], [], []>} : vector<16x8xbf16>, vector<16x8xbf16>, vector<16x16xf32> -> vector<16x16xf32>
    %cst_120 = arith.constant 0.353553385 : f32
    %341 = vector.broadcast %cst_120 : f32 to vector<16x16xf32>
    %342 = arith.mulf %340, %341 : vector<16x16xf32>
    %cst_121 = arith.constant dense<0xFF800000> : vector<16xf32>
    %343 = vector.multi_reduction <maximumf>, %342, %cst_121 [1] : vector<16x16xf32> to vector<16xf32>
    %344 = vector.shape_cast %343 : vector<16xf32> to vector<16x1xf32>
    %345 = vector.broadcast %344 : vector<16x1xf32> to vector<16x16xf32>
    %346 = arith.subf %342, %345 : vector<16x16xf32>
    %347 = math.exp %346 : vector<16x16xf32>
    %cst_122 = arith.constant dense<0.000000e+00> : vector<16xf32>
    %348 = vector.multi_reduction <add>, %347, %cst_122 [1] : vector<16x16xf32> to vector<16xf32>
    %349 = vector.shape_cast %348 : vector<16xf32> to vector<16x1xf32>
    %350 = tpu.reciprocal %349 {approx = true} : vector<16x1xf32> -> vector<16x1xf32>
    %351 = vector.broadcast %350 : vector<16x1xf32> to vector<16x16xf32>
    %352 = arith.mulf %347, %351 : vector<16x16xf32>
    %353 = arith.truncf %352 : vector<16x16xf32> to vector<16x16xbf16>
    %354 = arith.truncf %337 : vector<16x8xf32> to vector<16x8xbf16>
    %cst_123 = arith.constant dense<0.000000e+00> : vector<16x8xf32>
    %355 = tpu.matmul %353, %354, %cst_123 {dimension_numbers = #tpu.dot_dimension_numbers<[1], [0], [0], [1], [0, 0, 1, 1], [], []>} : vector<16x16xbf16>, vector<16x8xbf16>, vector<16x8xf32> -> vector<16x8xf32>
    %356 = vector.extract_strided_slice %307 {offsets = [0, 0], sizes = [8, 48], strides = [1, 1]} : vector<32x48xbf16> to vector<8x48xbf16>
    %357 = arith.truncf %355 : vector<16x8xf32> to vector<16x8xbf16>
    %cst_124 = arith.constant dense<0.000000e+00> : vector<16x48xf32>
    %358 = tpu.matmul %357, %356, %cst_124 {dimension_numbers = #tpu.dot_dimension_numbers<[1], [0], [0], [1], [0, 0, 1, 1], [], []>} : vector<16x8xbf16>, vector<8x48xbf16>, vector<16x48xf32> -> vector<16x48xf32>
    %359 = arith.addf %334, %358 : vector<16x48xf32>
    %360 = vector.extract_strided_slice %333 {offsets = [0, 8], sizes = [16, 8], strides = [1, 1]} : vector<16x96xf32> to vector<16x8xf32>
    %361 = vector.extract_strided_slice %333 {offsets = [0, 40], sizes = [16, 8], strides = [1, 1]} : vector<16x96xf32> to vector<16x8xf32>
    %362 = vector.extract_strided_slice %333 {offsets = [0, 72], sizes = [16, 8], strides = [1, 1]} : vector<16x96xf32> to vector<16x8xf32>
    %363 = arith.truncf %360 : vector<16x8xf32> to vector<16x8xbf16>
    %364 = arith.truncf %361 : vector<16x8xf32> to vector<16x8xbf16>
    %cst_125 = arith.constant dense<0.000000e+00> : vector<16x16xf32>
    %365 = tpu.matmul %363, %364, %cst_125 {dimension_numbers = #tpu.dot_dimension_numbers<[1], [1], [0], [0], [0, 0, 1, 0], [], []>} : vector<16x8xbf16>, vector<16x8xbf16>, vector<16x16xf32> -> vector<16x16xf32>
    %cst_126 = arith.constant 0.353553385 : f32
    %366 = vector.broadcast %cst_126 : f32 to vector<16x16xf32>
    %367 = arith.mulf %365, %366 : vector<16x16xf32>
    %cst_127 = arith.constant dense<0xFF800000> : vector<16xf32>
    %368 = vector.multi_reduction <maximumf>, %367, %cst_127 [1] : vector<16x16xf32> to vector<16xf32>
    %369 = vector.shape_cast %368 : vector<16xf32> to vector<16x1xf32>
    %370 = vector.broadcast %369 : vector<16x1xf32> to vector<16x16xf32>
    %371 = arith.subf %367, %370 : vector<16x16xf32>
    %372 = math.exp %371 : vector<16x16xf32>
    %cst_128 = arith.constant dense<0.000000e+00> : vector<16xf32>
    %373 = vector.multi_reduction <add>, %372, %cst_128 [1] : vector<16x16xf32> to vector<16xf32>
    %374 = vector.shape_cast %373 : vector<16xf32> to vector<16x1xf32>
    %375 = tpu.reciprocal %374 {approx = true} : vector<16x1xf32> -> vector<16x1xf32>
    %376 = vector.broadcast %375 : vector<16x1xf32> to vector<16x16xf32>
    %377 = arith.mulf %372, %376 : vector<16x16xf32>
    %378 = arith.truncf %377 : vector<16x16xf32> to vector<16x16xbf16>
    %379 = arith.truncf %362 : vector<16x8xf32> to vector<16x8xbf16>
    %cst_129 = arith.constant dense<0.000000e+00> : vector<16x8xf32>
    %380 = tpu.matmul %378, %379, %cst_129 {dimension_numbers = #tpu.dot_dimension_numbers<[1], [0], [0], [1], [0, 0, 1, 1], [], []>} : vector<16x16xbf16>, vector<16x8xbf16>, vector<16x8xf32> -> vector<16x8xf32>
    %381 = vector.extract_strided_slice %307 {offsets = [8, 0], sizes = [8, 48], strides = [1, 1]} : vector<32x48xbf16> to vector<8x48xbf16>
    %382 = arith.truncf %380 : vector<16x8xf32> to vector<16x8xbf16>
    %cst_130 = arith.constant dense<0.000000e+00> : vector<16x48xf32>
    %383 = tpu.matmul %382, %381, %cst_130 {dimension_numbers = #tpu.dot_dimension_numbers<[1], [0], [0], [1], [0, 0, 1, 1], [], []>} : vector<16x8xbf16>, vector<8x48xbf16>, vector<16x48xf32> -> vector<16x48xf32>
    %384 = arith.addf %359, %383 : vector<16x48xf32>
    %385 = vector.extract_strided_slice %333 {offsets = [0, 16], sizes = [16, 8], strides = [1, 1]} : vector<16x96xf32> to vector<16x8xf32>
    %386 = vector.extract_strided_slice %333 {offsets = [0, 48], sizes = [16, 8], strides = [1, 1]} : vector<16x96xf32> to vector<16x8xf32>
    %387 = vector.extract_strided_slice %333 {offsets = [0, 80], sizes = [16, 8], strides = [1, 1]} : vector<16x96xf32> to vector<16x8xf32>
    %388 = arith.truncf %385 : vector<16x8xf32> to vector<16x8xbf16>
    %389 = arith.truncf %386 : vector<16x8xf32> to vector<16x8xbf16>
    %cst_131 = arith.constant dense<0.000000e+00> : vector<16x16xf32>
    %390 = tpu.matmul %388, %389, %cst_131 {dimension_numbers = #tpu.dot_dimension_numbers<[1], [1], [0], [0], [0, 0, 1, 0], [], []>} : vector<16x8xbf16>, vector<16x8xbf16>, vector<16x16xf32> -> vector<16x16xf32>
    %cst_132 = arith.constant 0.353553385 : f32
    %391 = vector.broadcast %cst_132 : f32 to vector<16x16xf32>
    %392 = arith.mulf %390, %391 : vector<16x16xf32>
    %cst_133 = arith.constant dense<0xFF800000> : vector<16xf32>
    %393 = vector.multi_reduction <maximumf>, %392, %cst_133 [1] : vector<16x16xf32> to vector<16xf32>
    %394 = vector.shape_cast %393 : vector<16xf32> to vector<16x1xf32>
    %395 = vector.broadcast %394 : vector<16x1xf32> to vector<16x16xf32>
    %396 = arith.subf %392, %395 : vector<16x16xf32>
    %397 = math.exp %396 : vector<16x16xf32>
    %cst_134 = arith.constant dense<0.000000e+00> : vector<16xf32>
    %398 = vector.multi_reduction <add>, %397, %cst_134 [1] : vector<16x16xf32> to vector<16xf32>
    %399 = vector.shape_cast %398 : vector<16xf32> to vector<16x1xf32>
    %400 = tpu.reciprocal %399 {approx = true} : vector<16x1xf32> -> vector<16x1xf32>
    %401 = vector.broadcast %400 : vector<16x1xf32> to vector<16x16xf32>
    %402 = arith.mulf %397, %401 : vector<16x16xf32>
    %403 = arith.truncf %402 : vector<16x16xf32> to vector<16x16xbf16>
    %404 = arith.truncf %387 : vector<16x8xf32> to vector<16x8xbf16>
    %cst_135 = arith.constant dense<0.000000e+00> : vector<16x8xf32>
    %405 = tpu.matmul %403, %404, %cst_135 {dimension_numbers = #tpu.dot_dimension_numbers<[1], [0], [0], [1], [0, 0, 1, 1], [], []>} : vector<16x16xbf16>, vector<16x8xbf16>, vector<16x8xf32> -> vector<16x8xf32>
    %406 = vector.extract_strided_slice %307 {offsets = [16, 0], sizes = [8, 48], strides = [1, 1]} : vector<32x48xbf16> to vector<8x48xbf16>
    %407 = arith.truncf %405 : vector<16x8xf32> to vector<16x8xbf16>
    %cst_136 = arith.constant dense<0.000000e+00> : vector<16x48xf32>
    %408 = tpu.matmul %407, %406, %cst_136 {dimension_numbers = #tpu.dot_dimension_numbers<[1], [0], [0], [1], [0, 0, 1, 1], [], []>} : vector<16x8xbf16>, vector<8x48xbf16>, vector<16x48xf32> -> vector<16x48xf32>
    %409 = arith.addf %384, %408 : vector<16x48xf32>
    %410 = vector.extract_strided_slice %333 {offsets = [0, 24], sizes = [16, 8], strides = [1, 1]} : vector<16x96xf32> to vector<16x8xf32>
    %411 = vector.extract_strided_slice %333 {offsets = [0, 56], sizes = [16, 8], strides = [1, 1]} : vector<16x96xf32> to vector<16x8xf32>
    %412 = vector.extract_strided_slice %333 {offsets = [0, 88], sizes = [16, 8], strides = [1, 1]} : vector<16x96xf32> to vector<16x8xf32>
    %413 = arith.truncf %410 : vector<16x8xf32> to vector<16x8xbf16>
    %414 = arith.truncf %411 : vector<16x8xf32> to vector<16x8xbf16>
    %cst_137 = arith.constant dense<0.000000e+00> : vector<16x16xf32>
    %415 = tpu.matmul %413, %414, %cst_137 {dimension_numbers = #tpu.dot_dimension_numbers<[1], [1], [0], [0], [0, 0, 1, 0], [], []>} : vector<16x8xbf16>, vector<16x8xbf16>, vector<16x16xf32> -> vector<16x16xf32>
    %cst_138 = arith.constant 0.353553385 : f32
    %416 = vector.broadcast %cst_138 : f32 to vector<16x16xf32>
    %417 = arith.mulf %415, %416 : vector<16x16xf32>
    %cst_139 = arith.constant dense<0xFF800000> : vector<16xf32>
    %418 = vector.multi_reduction <maximumf>, %417, %cst_139 [1] : vector<16x16xf32> to vector<16xf32>
    %419 = vector.shape_cast %418 : vector<16xf32> to vector<16x1xf32>
    %420 = vector.broadcast %419 : vector<16x1xf32> to vector<16x16xf32>
    %421 = arith.subf %417, %420 : vector<16x16xf32>
    %422 = math.exp %421 : vector<16x16xf32>
    %cst_140 = arith.constant dense<0.000000e+00> : vector<16xf32>
    %423 = vector.multi_reduction <add>, %422, %cst_140 [1] : vector<16x16xf32> to vector<16xf32>
    %424 = vector.shape_cast %423 : vector<16xf32> to vector<16x1xf32>
    %425 = tpu.reciprocal %424 {approx = true} : vector<16x1xf32> -> vector<16x1xf32>
    %426 = vector.broadcast %425 : vector<16x1xf32> to vector<16x16xf32>
    %427 = arith.mulf %422, %426 : vector<16x16xf32>
    %428 = arith.truncf %427 : vector<16x16xf32> to vector<16x16xbf16>
    %429 = arith.truncf %412 : vector<16x8xf32> to vector<16x8xbf16>
    %cst_141 = arith.constant dense<0.000000e+00> : vector<16x8xf32>
    %430 = tpu.matmul %428, %429, %cst_141 {dimension_numbers = #tpu.dot_dimension_numbers<[1], [0], [0], [1], [0, 0, 1, 1], [], []>} : vector<16x16xbf16>, vector<16x8xbf16>, vector<16x8xf32> -> vector<16x8xf32>
    %431 = vector.extract_strided_slice %307 {offsets = [24, 0], sizes = [8, 48], strides = [1, 1]} : vector<32x48xbf16> to vector<8x48xbf16>
    %432 = arith.truncf %430 : vector<16x8xf32> to vector<16x8xbf16>
    %cst_142 = arith.constant dense<0.000000e+00> : vector<16x48xf32>
    %433 = tpu.matmul %432, %431, %cst_142 {dimension_numbers = #tpu.dot_dimension_numbers<[1], [0], [0], [1], [0, 0, 1, 1], [], []>} : vector<16x8xbf16>, vector<8x48xbf16>, vector<16x48xf32> -> vector<16x48xf32>
    %434 = arith.addf %409, %433 : vector<16x48xf32>
    %435 = vector.extract_strided_slice %332 {offsets = [16, 0], sizes = [16, 96], strides = [1, 1]} : vector<32x96xf32> to vector<16x96xf32>
    %cst_143 = arith.constant 0.000000e+00 : f32
    %436 = vector.broadcast %cst_143 : f32 to vector<16x48xf32>
    %437 = vector.extract_strided_slice %435 {offsets = [0, 0], sizes = [16, 8], strides = [1, 1]} : vector<16x96xf32> to vector<16x8xf32>
    %438 = vector.extract_strided_slice %435 {offsets = [0, 32], sizes = [16, 8], strides = [1, 1]} : vector<16x96xf32> to vector<16x8xf32>
    %439 = vector.extract_strided_slice %435 {offsets = [0, 64], sizes = [16, 8], strides = [1, 1]} : vector<16x96xf32> to vector<16x8xf32>
    %440 = arith.truncf %437 : vector<16x8xf32> to vector<16x8xbf16>
    %441 = arith.truncf %438 : vector<16x8xf32> to vector<16x8xbf16>
    %cst_144 = arith.constant dense<0.000000e+00> : vector<16x16xf32>
    %442 = tpu.matmul %440, %441, %cst_144 {dimension_numbers = #tpu.dot_dimension_numbers<[1], [1], [0], [0], [0, 0, 1, 0], [], []>} : vector<16x8xbf16>, vector<16x8xbf16>, vector<16x16xf32> -> vector<16x16xf32>
    %cst_145 = arith.constant 0.353553385 : f32
    %443 = vector.broadcast %cst_145 : f32 to vector<16x16xf32>
    %444 = arith.mulf %442, %443 : vector<16x16xf32>
    %cst_146 = arith.constant dense<0xFF800000> : vector<16xf32>
    %445 = vector.multi_reduction <maximumf>, %444, %cst_146 [1] : vector<16x16xf32> to vector<16xf32>
    %446 = vector.shape_cast %445 : vector<16xf32> to vector<16x1xf32>
    %447 = vector.broadcast %446 : vector<16x1xf32> to vector<16x16xf32>
    %448 = arith.subf %444, %447 : vector<16x16xf32>
    %449 = math.exp %448 : vector<16x16xf32>
    %cst_147 = arith.constant dense<0.000000e+00> : vector<16xf32>
    %450 = vector.multi_reduction <add>, %449, %cst_147 [1] : vector<16x16xf32> to vector<16xf32>
    %451 = vector.shape_cast %450 : vector<16xf32> to vector<16x1xf32>
    %452 = tpu.reciprocal %451 {approx = true} : vector<16x1xf32> -> vector<16x1xf32>
    %453 = vector.broadcast %452 : vector<16x1xf32> to vector<16x16xf32>
    %454 = arith.mulf %449, %453 : vector<16x16xf32>
    %455 = arith.truncf %454 : vector<16x16xf32> to vector<16x16xbf16>
    %456 = arith.truncf %439 : vector<16x8xf32> to vector<16x8xbf16>
    %cst_148 = arith.constant dense<0.000000e+00> : vector<16x8xf32>
    %457 = tpu.matmul %455, %456, %cst_148 {dimension_numbers = #tpu.dot_dimension_numbers<[1], [0], [0], [1], [0, 0, 1, 1], [], []>} : vector<16x16xbf16>, vector<16x8xbf16>, vector<16x8xf32> -> vector<16x8xf32>
    %458 = vector.extract_strided_slice %307 {offsets = [0, 0], sizes = [8, 48], strides = [1, 1]} : vector<32x48xbf16> to vector<8x48xbf16>
    %459 = arith.truncf %457 : vector<16x8xf32> to vector<16x8xbf16>
    %cst_149 = arith.constant dense<0.000000e+00> : vector<16x48xf32>
    %460 = tpu.matmul %459, %458, %cst_149 {dimension_numbers = #tpu.dot_dimension_numbers<[1], [0], [0], [1], [0, 0, 1, 1], [], []>} : vector<16x8xbf16>, vector<8x48xbf16>, vector<16x48xf32> -> vector<16x48xf32>
    %461 = arith.addf %436, %460 : vector<16x48xf32>
    %462 = vector.extract_strided_slice %435 {offsets = [0, 8], sizes = [16, 8], strides = [1, 1]} : vector<16x96xf32> to vector<16x8xf32>
    %463 = vector.extract_strided_slice %435 {offsets = [0, 40], sizes = [16, 8], strides = [1, 1]} : vector<16x96xf32> to vector<16x8xf32>
    %464 = vector.extract_strided_slice %435 {offsets = [0, 72], sizes = [16, 8], strides = [1, 1]} : vector<16x96xf32> to vector<16x8xf32>
    %465 = arith.truncf %462 : vector<16x8xf32> to vector<16x8xbf16>
    %466 = arith.truncf %463 : vector<16x8xf32> to vector<16x8xbf16>
    %cst_150 = arith.constant dense<0.000000e+00> : vector<16x16xf32>
    %467 = tpu.matmul %465, %466, %cst_150 {dimension_numbers = #tpu.dot_dimension_numbers<[1], [1], [0], [0], [0, 0, 1, 0], [], []>} : vector<16x8xbf16>, vector<16x8xbf16>, vector<16x16xf32> -> vector<16x16xf32>
    %cst_151 = arith.constant 0.353553385 : f32
    %468 = vector.broadcast %cst_151 : f32 to vector<16x16xf32>
    %469 = arith.mulf %467, %468 : vector<16x16xf32>
    %cst_152 = arith.constant dense<0xFF800000> : vector<16xf32>
    %470 = vector.multi_reduction <maximumf>, %469, %cst_152 [1] : vector<16x16xf32> to vector<16xf32>
    %471 = vector.shape_cast %470 : vector<16xf32> to vector<16x1xf32>
    %472 = vector.broadcast %471 : vector<16x1xf32> to vector<16x16xf32>
    %473 = arith.subf %469, %472 : vector<16x16xf32>
    %474 = math.exp %473 : vector<16x16xf32>
    %cst_153 = arith.constant dense<0.000000e+00> : vector<16xf32>
    %475 = vector.multi_reduction <add>, %474, %cst_153 [1] : vector<16x16xf32> to vector<16xf32>
    %476 = vector.shape_cast %475 : vector<16xf32> to vector<16x1xf32>
    %477 = tpu.reciprocal %476 {approx = true} : vector<16x1xf32> -> vector<16x1xf32>
    %478 = vector.broadcast %477 : vector<16x1xf32> to vector<16x16xf32>
    %479 = arith.mulf %474, %478 : vector<16x16xf32>
    %480 = arith.truncf %479 : vector<16x16xf32> to vector<16x16xbf16>
    %481 = arith.truncf %464 : vector<16x8xf32> to vector<16x8xbf16>
    %cst_154 = arith.constant dense<0.000000e+00> : vector<16x8xf32>
    %482 = tpu.matmul %480, %481, %cst_154 {dimension_numbers = #tpu.dot_dimension_numbers<[1], [0], [0], [1], [0, 0, 1, 1], [], []>} : vector<16x16xbf16>, vector<16x8xbf16>, vector<16x8xf32> -> vector<16x8xf32>
    %483 = vector.extract_strided_slice %307 {offsets = [8, 0], sizes = [8, 48], strides = [1, 1]} : vector<32x48xbf16> to vector<8x48xbf16>
    %484 = arith.truncf %482 : vector<16x8xf32> to vector<16x8xbf16>
    %cst_155 = arith.constant dense<0.000000e+00> : vector<16x48xf32>
    %485 = tpu.matmul %484, %483, %cst_155 {dimension_numbers = #tpu.dot_dimension_numbers<[1], [0], [0], [1], [0, 0, 1, 1], [], []>} : vector<16x8xbf16>, vector<8x48xbf16>, vector<16x48xf32> -> vector<16x48xf32>
    %486 = arith.addf %461, %485 : vector<16x48xf32>
    %487 = vector.extract_strided_slice %435 {offsets = [0, 16], sizes = [16, 8], strides = [1, 1]} : vector<16x96xf32> to vector<16x8xf32>
    %488 = vector.extract_strided_slice %435 {offsets = [0, 48], sizes = [16, 8], strides = [1, 1]} : vector<16x96xf32> to vector<16x8xf32>
    %489 = vector.extract_strided_slice %435 {offsets = [0, 80], sizes = [16, 8], strides = [1, 1]} : vector<16x96xf32> to vector<16x8xf32>
    %490 = arith.truncf %487 : vector<16x8xf32> to vector<16x8xbf16>
    %491 = arith.truncf %488 : vector<16x8xf32> to vector<16x8xbf16>
    %cst_156 = arith.constant dense<0.000000e+00> : vector<16x16xf32>
    %492 = tpu.matmul %490, %491, %cst_156 {dimension_numbers = #tpu.dot_dimension_numbers<[1], [1], [0], [0], [0, 0, 1, 0], [], []>} : vector<16x8xbf16>, vector<16x8xbf16>, vector<16x16xf32> -> vector<16x16xf32>
    %cst_157 = arith.constant 0.353553385 : f32
    %493 = vector.broadcast %cst_157 : f32 to vector<16x16xf32>
    %494 = arith.mulf %492, %493 : vector<16x16xf32>
    %cst_158 = arith.constant dense<0xFF800000> : vector<16xf32>
    %495 = vector.multi_reduction <maximumf>, %494, %cst_158 [1] : vector<16x16xf32> to vector<16xf32>
    %496 = vector.shape_cast %495 : vector<16xf32> to vector<16x1xf32>
    %497 = vector.broadcast %496 : vector<16x1xf32> to vector<16x16xf32>
    %498 = arith.subf %494, %497 : vector<16x16xf32>
    %499 = math.exp %498 : vector<16x16xf32>
    %cst_159 = arith.constant dense<0.000000e+00> : vector<16xf32>
    %500 = vector.multi_reduction <add>, %499, %cst_159 [1] : vector<16x16xf32> to vector<16xf32>
    %501 = vector.shape_cast %500 : vector<16xf32> to vector<16x1xf32>
    %502 = tpu.reciprocal %501 {approx = true} : vector<16x1xf32> -> vector<16x1xf32>
    %503 = vector.broadcast %502 : vector<16x1xf32> to vector<16x16xf32>
    %504 = arith.mulf %499, %503 : vector<16x16xf32>
    %505 = arith.truncf %504 : vector<16x16xf32> to vector<16x16xbf16>
    %506 = arith.truncf %489 : vector<16x8xf32> to vector<16x8xbf16>
    %cst_160 = arith.constant dense<0.000000e+00> : vector<16x8xf32>
    %507 = tpu.matmul %505, %506, %cst_160 {dimension_numbers = #tpu.dot_dimension_numbers<[1], [0], [0], [1], [0, 0, 1, 1], [], []>} : vector<16x16xbf16>, vector<16x8xbf16>, vector<16x8xf32> -> vector<16x8xf32>
    %508 = vector.extract_strided_slice %307 {offsets = [16, 0], sizes = [8, 48], strides = [1, 1]} : vector<32x48xbf16> to vector<8x48xbf16>
    %509 = arith.truncf %507 : vector<16x8xf32> to vector<16x8xbf16>
    %cst_161 = arith.constant dense<0.000000e+00> : vector<16x48xf32>
    %510 = tpu.matmul %509, %508, %cst_161 {dimension_numbers = #tpu.dot_dimension_numbers<[1], [0], [0], [1], [0, 0, 1, 1], [], []>} : vector<16x8xbf16>, vector<8x48xbf16>, vector<16x48xf32> -> vector<16x48xf32>
    %511 = arith.addf %486, %510 : vector<16x48xf32>
    %512 = vector.extract_strided_slice %435 {offsets = [0, 24], sizes = [16, 8], strides = [1, 1]} : vector<16x96xf32> to vector<16x8xf32>
    %513 = vector.extract_strided_slice %435 {offsets = [0, 56], sizes = [16, 8], strides = [1, 1]} : vector<16x96xf32> to vector<16x8xf32>
    %514 = vector.extract_strided_slice %435 {offsets = [0, 88], sizes = [16, 8], strides = [1, 1]} : vector<16x96xf32> to vector<16x8xf32>
    %515 = arith.truncf %512 : vector<16x8xf32> to vector<16x8xbf16>
    %516 = arith.truncf %513 : vector<16x8xf32> to vector<16x8xbf16>
    %cst_162 = arith.constant dense<0.000000e+00> : vector<16x16xf32>
    %517 = tpu.matmul %515, %516, %cst_162 {dimension_numbers = #tpu.dot_dimension_numbers<[1], [1], [0], [0], [0, 0, 1, 0], [], []>} : vector<16x8xbf16>, vector<16x8xbf16>, vector<16x16xf32> -> vector<16x16xf32>
    %cst_163 = arith.constant 0.353553385 : f32
    %518 = vector.broadcast %cst_163 : f32 to vector<16x16xf32>
    %519 = arith.mulf %517, %518 : vector<16x16xf32>
    %cst_164 = arith.constant dense<0xFF800000> : vector<16xf32>
    %520 = vector.multi_reduction <maximumf>, %519, %cst_164 [1] : vector<16x16xf32> to vector<16xf32>
    %521 = vector.shape_cast %520 : vector<16xf32> to vector<16x1xf32>
    %522 = vector.broadcast %521 : vector<16x1xf32> to vector<16x16xf32>
    %523 = arith.subf %519, %522 : vector<16x16xf32>
    %524 = math.exp %523 : vector<16x16xf32>
    %cst_165 = arith.constant dense<0.000000e+00> : vector<16xf32>
    %525 = vector.multi_reduction <add>, %524, %cst_165 [1] : vector<16x16xf32> to vector<16xf32>
    %526 = vector.shape_cast %525 : vector<16xf32> to vector<16x1xf32>
    %527 = tpu.reciprocal %526 {approx = true} : vector<16x1xf32> -> vector<16x1xf32>
    %528 = vector.broadcast %527 : vector<16x1xf32> to vector<16x16xf32>
    %529 = arith.mulf %524, %528 : vector<16x16xf32>
    %530 = arith.truncf %529 : vector<16x16xf32> to vector<16x16xbf16>
    %531 = arith.truncf %514 : vector<16x8xf32> to vector<16x8xbf16>
    %cst_166 = arith.constant dense<0.000000e+00> : vector<16x8xf32>
    %532 = tpu.matmul %530, %531, %cst_166 {dimension_numbers = #tpu.dot_dimension_numbers<[1], [0], [0], [1], [0, 0, 1, 1], [], []>} : vector<16x16xbf16>, vector<16x8xbf16>, vector<16x8xf32> -> vector<16x8xf32>
    %533 = vector.extract_strided_slice %307 {offsets = [24, 0], sizes = [8, 48], strides = [1, 1]} : vector<32x48xbf16> to vector<8x48xbf16>
    %534 = arith.truncf %532 : vector<16x8xf32> to vector<16x8xbf16>
    %cst_167 = arith.constant dense<0.000000e+00> : vector<16x48xf32>
    %535 = tpu.matmul %534, %533, %cst_167 {dimension_numbers = #tpu.dot_dimension_numbers<[1], [0], [0], [1], [0, 0, 1, 1], [], []>} : vector<16x8xbf16>, vector<8x48xbf16>, vector<16x48xf32> -> vector<16x48xf32>
    %536 = arith.addf %511, %535 : vector<16x48xf32>
    %537 = tpu.concatenate %434, %536 in 0 : vector<16x48xf32>, vector<16x48xf32> -> vector<32x48xf32>
    %538 = vector.broadcast %308 : vector<1x48xf32> to vector<32x48xf32>
    %539 = arith.addf %537, %538 : vector<32x48xf32>
    %540 = arith.addf %539, %303 : vector<32x48xf32>
    %c0_168 = arith.constant 0 : index
    %c0_169 = arith.constant 0 : index
    %541 = vector.load %arg22[%c0_168, %c0_169] : memref<1x48xf32, #tpu.memory_space<vmem>>, vector<1x48xf32>
    %c0_170 = arith.constant 0 : index
    %c0_171 = arith.constant 0 : index
    %542 = vector.load %arg23[%c0_170, %c0_171] : memref<1x48xf32, #tpu.memory_space<vmem>>, vector<1x48xf32>
    %c0_172 = arith.constant 0 : index
    %c0_173 = arith.constant 0 : index
    %543 = vector.load %arg24[%c0_172, %c0_173] : memref<48x192xbf16, #tpu.memory_space<vmem>>, vector<48x192xbf16>
    %c0_174 = arith.constant 0 : index
    %c0_175 = arith.constant 0 : index
    %544 = vector.load %arg25[%c0_174, %c0_175] : memref<1x192xf32, #tpu.memory_space<vmem>>, vector<1x192xf32>
    %c0_176 = arith.constant 0 : index
    %c0_177 = arith.constant 0 : index
    %545 = vector.load %arg26[%c0_176, %c0_177] : memref<192x48xbf16, #tpu.memory_space<vmem>>, vector<192x48xbf16>
    %c0_178 = arith.constant 0 : index
    %c0_179 = arith.constant 0 : index
    %546 = vector.load %arg27[%c0_178, %c0_179] : memref<1x48xf32, #tpu.memory_space<vmem>>, vector<1x48xf32>
    %cst_180 = arith.constant dense<0.000000e+00> : vector<32xf32>
    %547 = vector.multi_reduction <add>, %540, %cst_180 [1] : vector<32x48xf32> to vector<32xf32>
    %548 = vector.shape_cast %547 : vector<32xf32> to vector<32x1xf32>
    %cst_181 = arith.constant 4.800000e+01 : f32
    %549 = vector.broadcast %cst_181 : f32 to vector<32x1xf32>
    %550 = arith.divf %548, %549 : vector<32x1xf32>
    %551 = vector.broadcast %550 : vector<32x1xf32> to vector<32x48xf32>
    %552 = arith.subf %540, %551 : vector<32x48xf32>
    %553 = arith.mulf %552, %552 : vector<32x48xf32>
    %cst_182 = arith.constant dense<0.000000e+00> : vector<32xf32>
    %554 = vector.multi_reduction <add>, %553, %cst_182 [1] : vector<32x48xf32> to vector<32xf32>
    %555 = vector.shape_cast %554 : vector<32xf32> to vector<32x1xf32>
    %cst_183 = arith.constant 4.800000e+01 : f32
    %556 = vector.broadcast %cst_183 : f32 to vector<32x1xf32>
    %557 = arith.divf %555, %556 : vector<32x1xf32>
    %558 = vector.broadcast %550 : vector<32x1xf32> to vector<32x48xf32>
    %559 = arith.subf %540, %558 : vector<32x48xf32>
    %cst_184 = arith.constant 9.99999974E-6 : f32
    %560 = vector.broadcast %cst_184 : f32 to vector<32x1xf32>
    %561 = arith.addf %557, %560 : vector<32x1xf32>
    %562 = math.rsqrt %561 : vector<32x1xf32>
    %563 = vector.broadcast %562 : vector<32x1xf32> to vector<32x48xf32>
    %564 = arith.mulf %559, %563 : vector<32x48xf32>
    %565 = vector.broadcast %541 : vector<1x48xf32> to vector<32x48xf32>
    %566 = arith.mulf %564, %565 : vector<32x48xf32>
    %567 = vector.broadcast %542 : vector<1x48xf32> to vector<32x48xf32>
    %568 = arith.addf %566, %567 : vector<32x48xf32>
    %569 = arith.truncf %568 : vector<32x48xf32> to vector<32x48xbf16>
    %cst_185 = arith.constant dense<0.000000e+00> : vector<32x192xf32>
    %570 = tpu.matmul %569, %543, %cst_185 {dimension_numbers = #tpu.dot_dimension_numbers<[1], [0], [0], [1], [0, 0, 1, 1], [], []>} : vector<32x48xbf16>, vector<48x192xbf16>, vector<32x192xf32> -> vector<32x192xf32>
    %571 = vector.broadcast %544 : vector<1x192xf32> to vector<32x192xf32>
    %572 = arith.addf %570, %571 : vector<32x192xf32>
    %cst_186 = arith.constant 5.000000e-01 : f32
    %573 = vector.broadcast %cst_186 : f32 to vector<32x192xf32>
    %574 = arith.mulf %573, %572 : vector<32x192xf32>
    %575 = arith.mulf %572, %572 : vector<32x192xf32>
    %576 = arith.mulf %575, %572 : vector<32x192xf32>
    %cst_187 = arith.constant 4.471500e-02 : f32
    %577 = vector.broadcast %cst_187 : f32 to vector<32x192xf32>
    %578 = arith.mulf %577, %576 : vector<32x192xf32>
    %579 = arith.addf %572, %578 : vector<32x192xf32>
    %cst_188 = arith.constant 0.797884583 : f32
    %580 = vector.broadcast %cst_188 : f32 to vector<32x192xf32>
    %581 = arith.mulf %580, %579 : vector<32x192xf32>
    %582 = math.tanh %581 : vector<32x192xf32>
    %cst_189 = arith.constant 1.000000e+00 : f32
    %583 = vector.broadcast %cst_189 : f32 to vector<32x192xf32>
    %584 = arith.addf %583, %582 : vector<32x192xf32>
    %585 = arith.mulf %574, %584 : vector<32x192xf32>
    %586 = arith.truncf %585 : vector<32x192xf32> to vector<32x192xbf16>
    %cst_190 = arith.constant dense<0.000000e+00> : vector<32x48xf32>
    %587 = tpu.matmul %586, %545, %cst_190 {dimension_numbers = #tpu.dot_dimension_numbers<[1], [0], [0], [1], [0, 0, 1, 1], [], []>} : vector<32x192xbf16>, vector<192x48xbf16>, vector<32x48xf32> -> vector<32x48xf32>
    %588 = vector.broadcast %546 : vector<1x48xf32> to vector<32x48xf32>
    %589 = arith.addf %587, %588 : vector<32x48xf32>
    %590 = arith.addf %589, %540 : vector<32x48xf32>
    %c0_191 = arith.constant 0 : index
    %c0_192 = arith.constant 0 : index
    %591 = vector.load %arg28[%c0_191, %c0_192] : memref<48x256xbf16, #tpu.memory_space<vmem>>, vector<48x256xbf16>
    %c0_193 = arith.constant 0 : index
    %c0_194 = arith.constant 0 : index
    %592 = vector.load %arg29[%c0_193, %c0_194] : memref<1x256xf32, #tpu.memory_space<vmem>>, vector<1x256xf32>
    %593 = arith.truncf %590 : vector<32x48xf32> to vector<32x48xbf16>
    %cst_195 = arith.constant dense<0.000000e+00> : vector<32x256xf32>
    %594 = tpu.matmul %593, %591, %cst_195 {dimension_numbers = #tpu.dot_dimension_numbers<[1], [0], [0], [1], [0, 0, 1, 1], [], []>} : vector<32x48xbf16>, vector<48x256xbf16>, vector<32x256xf32> -> vector<32x256xf32>
    %595 = vector.broadcast %592 : vector<1x256xf32> to vector<32x256xf32>
    %596 = arith.addf %594, %595 : vector<32x256xf32>
    %597 = vector.shape_cast %596 : vector<32x256xf32> to vector<2x16x256xf32>
    %c0_196 = arith.constant 0 : index
    %c0_197 = arith.constant 0 : index
    %c0_198 = arith.constant 0 : index
    %598 = vector.load %arg30[%c0_196, %c0_197, %c0_198] : memref<2x16x256xf32, #tpu.memory_space<vmem>>, vector<2x16x256xf32>
    tpu.vector_store %arg30[%c0_196, %c0_197, %c0_198], %597 {strides = array<i32>} : memref<2x16x256xf32, #tpu.memory_space<vmem>>, vector<2x16x256xf32>,
    return
  }
}

</mosaic_0001>

<bundles_post_ra>
// kernel: _lambda_.1
= control target key start
LH: loop header
LB: loop body
LE: loop exit
PB: predicated region body
PF: predicated region fallthrough
CT: control target
= control target key end

     0   :  { %s3360_s6 = smov 1   ;;  %s3361_s10 = smov 2   ;;  %s4292_s0 = inlined_call_operand.smem [shape: u32[31], index: -1, kind: input, shape index: {}] }
   0x1   :  { %s3414_s5 = sld [smem:[%s4292_s0]]   ;;  %s3362_s14 = smov 3  }
   0x2   :  { %s3419_s9 = sld [smem:[%s4292_s0 + %s3360_s6]]   ;;  %s3363_s18 = smov 4  }
   0x3   :  { %s3424_s13 = sld [smem:[%s4292_s0 + %s3361_s10]]   ;;  %s3364_s22 = smov 5  }
   0x4   :  { %s3429_s17 = sld [smem:[%s4292_s0 + %s3362_s14]]   ;;  %s3365_s26 = smov 6  }
   0x5   :  { %s3434_s21 = sld [smem:[%s4292_s0 + %s3363_s18]]   ;;  %s3366_s30 = smov 7  }
   0x6   :  { %s3439_s25 = sld [smem:[%s4292_s0 + %s3364_s22]]   ;;  %s3367_s4 = smov 8  }
   0x7   :  { %s3444_s29 = sld [smem:[%s4292_s0 + %s3365_s26]]   ;;  %s3368_s10 = smov 9  }
   0x8   :  { %s3449_s3 = sld [smem:[%s4292_s0 + %s3366_s30]]   ;;  %s3369_s15 = smov 10  }
   0x9   :  { %s3454_s8 = sld [smem:[%s4292_s0 + %s3367_s4]]   ;;  %s3370_s20 = smov 11  }
   0xa   :  { %s3459_s14 = sld [smem:[%s4292_s0 + %s3368_s10]]   ;;  %s3371_s26 = smov 12  }
   0xb   :  { %s3464_s19 = sld [smem:[%s4292_s0 + %s3369_s15]]   ;;  %s3372_s1 = smov 13  }
   0xc   :  { %s3469_s24 = sld [smem:[%s4292_s0 + %s3370_s20]]   ;;  %s3373_s7 = smov 14  }
   0xd   :  { %s3474_s30 = sld [smem:[%s4292_s0 + %s3371_s26]]   ;;  %s3374_s15 = smov 15  }
   0xe   :  { %s3479_s6 = sld [smem:[%s4292_s0 + %s3372_s1]]   ;;  %s3375_s22 = smov 16  }
   0xf   :  { %s3484_s12 = sld [smem:[%s4292_s0 + %s3373_s7]]   ;;  %s3376_s28 = smov 17  }
  0x10   :  { %s3489_s20 = sld [smem:[%s4292_s0 + %s3374_s15]]   ;;  %s3377_s7 = smov 18  }
  0x11   :  { %s3494_s27 = sld [smem:[%s4292_s0 + %s3375_s22]]   ;;  %s3378_s15 = smov 19  }
  0x12   :  { %s3499_s4 = sld [smem:[%s4292_s0 + %s3376_s28]]   ;;  %s3379_s22 = smov 20  }
  0x13   :  { %s3380_s28 = smov 21  }
  0x15   :  { %4298 = sst [smem:[#allocation5_spill]] %s3484_s12 }
  0x16   :  { %4299 = sst [smem:[#allocation6_spill]] %s3489_s20 }
  0x17   :  { %4300 = sst [smem:[#allocation7_spill]] %s3494_s27 }
  0x18   :  { %4301 = sst [smem:[#allocation8_spill]] %s3499_s4 }
  0x19   :  { %s3504_s12 = sld [smem:[%s4292_s0 + %s3377_s7]]   ;;  %s3381_s7 = smov 22  }
  0x1a   :  { %s3509_s20 = sld [smem:[%s4292_s0 + %s3378_s15]]   ;;  %s3382_s15 = smov 23  }
  0x1b   :  { %s3514_s27 = sld [smem:[%s4292_s0 + %s3379_s22]]   ;;  %s3383_s22 = smov 24  }
  0x1c   :  { %s3519_s4 = sld [smem:[%s4292_s0 + %s3380_s28]]   ;;  %s3384_s28 = smov 25  }
  0x1f   :  { %4302 = sst [smem:[#allocation9_spill]] %s3504_s12 }
  0x20   :  { %4303 = sst [smem:[#allocation10_spill]] %s3509_s20 }
  0x21   :  { %4304 = sst [smem:[#allocation11_spill]] %s3514_s27 }
  0x22   :  { %4305 = sst [smem:[#allocation12_spill]] %s3519_s4 }
  0x23   :  { %s3524_s12 = sld [smem:[%s4292_s0 + %s3381_s7]]   ;;  %s3385_s7 = smov 26  }
  0x24   :  { %s3529_s20 = sld [smem:[%s4292_s0 + %s3382_s15]]   ;;  %s3386_s15 = smov 27  }
  0x25   :  { %s3534_s27 = sld [smem:[%s4292_s0 + %s3383_s22]]   ;;  %s3387_s22 = smov 28  }
  0x26   :  { %s3539_s4 = sld [smem:[%s4292_s0 + %s3384_s28]]   ;;  %s3388_s28 = smov 29  }
  0x29   :  { %4306 = sst [smem:[#allocation13_spill]] %s3524_s12 }
  0x2a   :  { %4307 = sst [smem:[#allocation14_spill]] %s3529_s20 }
  0x2b   :  { %4308 = sst [smem:[#allocation15_spill]] %s3534_s27 }
  0x2c   :  { %4309 = sst [smem:[#allocation16_spill]] %s3539_s4 }
  0x2d   :  { %s3544_s12 = sld [smem:[%s4292_s0 + %s3385_s7]]   ;;  %s3389_s7 = smov 30  }
  0x2e   :  { %s3549_s20 = sld [smem:[%s4292_s0 + %s3386_s15]]  }
  0x2f   :  { %s3554_s27 = sld [smem:[%s4292_s0 + %s3387_s22]]  }
  0x30   :  { %s3559_s4 = sld [smem:[%s4292_s0 + %s3388_s28]]  }
  0x33   :  { %4310 = sst [smem:[#allocation17_spill]] %s3544_s12 }
  0x34   :  { %s3564_s12 = sld [smem:[%s4292_s0 + %s3389_s7]]  }
  0x35   :  { %v3046_v0 = vld [vmem:[%s3419_s9] sm:$0xff]  ;;  %v129_v2 = vld [vmem:[%s3414_s5 + $0x8] sm:$0xff]  ;;  %vm148_vm0 = vcmask 130048  }
  0x36   :  { %v128_v1 = vld [vmem:[%s3414_s5] sm:$0xff]  ;;  %162 = vmatpush.bf16.msra.mxu0 %v3046_v0  ;;  %3084 = vmatpush.bf16.msra.mxu2 %v3046_v0 }
  0x37   :  { %v137_v3 = vpack.c.bf16 %v129_v2, %v128_v1 }
  0x39   :  { %2828 = vmatmul.msk.bf16.vlgmr.msra.gmra.mxu0 %vm148_vm0, %v137_v3 }
  0x3a   :  { %66 = vsyncpa [#allocation3], 0  ;;  %v3571_v4 = vld [vmem:[%s3424_s13] ss:$0 sm:$0xff]  ;;  %vm189_vm1 = vcmask 261120   ;;  %v3580_v10 = vld [vmem:[%s3429_s17 + $0x8] sm:$0xff] }
  0x3b   :  { %v135_v5 = vld [vmem:[%s3429_s17] sm:$0xff]  ;;  %v3390_v15 = vmov 32.0   ;;  %v130_v16 = vld [vmem:[%s3414_s5 + $0x10] sm:$0xff]  ;;  %v131_v17 = vld [vmem:[%s3414_s5 + $0x18] sm:$0xff]  ;;  %s3391_s0 = smov 96   ;;  %s3392_s5 = smov 64  }
  0x3c   :  { %3146 = vrcp.f32 %v3390_v15  ;;  %v138_v19 = vpack.c.bf16 %v131_v17, %v130_v16  ;;  %v3048_v39 = vld [vmem:[%s3444_s29 + $0x8] sm:$0xff]  ;;  %v3047_v41 = vld [vmem:[%s3444_s29] sm:$0xff]  ;;  %vm342_vm9 = vcmask 64512   ;;  %s3393_s9 = smov 120   ;;  %s3394_s13 = smov 80  }
  0x3d   :  { %325 = vmatpush.bf16.msra.mxu1 %v3048_v39  ;;  %v3609_v60 = vld [vmem:[%s3434_s21] ss:$0 sm:$0xff]  ;;  %s3395_s17 = smov 88   ;;  %s3396_s21 = smov 112  }
  0x3e   :  { %2829 = vmatmul.msk.bf16.vlgmr.msra.gmra.mxu2 %vm148_vm0, %v138_v19  ;;  %v3613_v1 = vld [vmem:[%s3439_s25] ss:$0 sm:$0xff]  ;;  %s3397_s25 = smov 56   ;;  %s3398_s29 = smov 104  }
  0x3f   :  { %s3399_s15 = smov 48   ;;  %s3400_s16 = smov 72  }
  0x40   :  { %s3401_s18 = smov 40   ;;  %s4318_s22 = sld [smem:[#allocation12_spill]] }
  0x41   :  { %326 = vmatpush.bf16.msra.mxu1 %v3047_v41  ;;  %s4319_s23 = sld [smem:[#allocation15_spill]]  ;;  %s3350_s11 = scalar_lea.hbm %s3564_s12, 64 }
  0x42   :  { %v3147_v18 = vpop.eup %3146  ;;  %s4320_s26 = sld [smem:[#allocation13_spill]] }
  0x43   :  { %v203_v20 = vmul.f32 32.0, %v3147_v18  ;;  %vm207_vm2 = vweird.f32 %v3147_v18  ;;  %s4321_s28 = sld [smem:[#allocation14_spill]] }
  0x44   :  { %s4322_s1 = sld [smem:[#allocation17_spill]] }
  0x45   :  { %v204_v21 = vsub.f32 1.0, %v203_v20  ;;  %s4323_s2 = sld [smem:[#allocation16_spill]] }
  0x47   :  { %v205_v22 = vmul.f32 %v3147_v18, %v204_v21 }
  0x49   :  { %v206_v23 = vadd.f32 %v3147_v18, %v205_v22 }
  0x4b   :  { %v3591_v24 = vsel %vm207_vm2, %v3147_v18, %v206_v23  ;;  %vm482_vm2 = vcmask 1043456  }
  0xb6   :  { %v164_v6 = vpop.f32.mrf.mxu0 }
  0xb7   :  { %v165_v7 = vadd.f32 %v3571_v4, %v164_v6 }
  0xb9   :  { %v3575_v8 = vadd.f32 %v165_v7, %v135_v5 }
  0xbb   :  { %v190_v9 = vsel %vm189_vm1, %v3575_v8, 0.0 }
  0xbc   :  { %191 = vadd.xlane.f32.xlu0 %v190_v9 }
  0xbe   :  { %v166_v11 = vpop.f32.mrf.mxu0 }
  0xbf   :  { %v167_v12 = vadd.f32 %v3571_v4, %v166_v11 }
  0xc1   :  { %v3584_v13 = vadd.f32 %v167_v12, %v3580_v10  ;;  %v169_v35 = vpop.f32.mrf.mxu2 }
  0xc2   :  { %v170_v36 = vadd.f32 %v3571_v4, %v169_v35 }
  0xc3   :  { %v193_v14 = vsel %vm189_vm1, %v3584_v13, 0.0 }
  0xc4   :  { %194 = vadd.xlane.f32.xlu0 %v193_v14  ;;  %v3600_v37 = vadd.f32 %v170_v36, %v135_v5 }
  0xc6   :  { %v196_v38 = vsel %vm189_vm1, %v3600_v37, 0.0 }
  0xc9   :  { %v171_v22 = vpop.f32.mrf.mxu2 }
 0x12f   :  { %v192_v25 = vpop.xlane.xlu0 %191 }
 0x130   :  { %v209_v26 = vmul.f32 %v3591_v24, %v192_v25 }
 0x132   :  { %v213_v27 = vsub.f32 %v3575_v8, %v209_v26 }
 0x134   :  { %v217_v28 = vmul.f32 %v213_v27, %v213_v27 }
 0x136   :  { %v221_v29 = vsel %vm189_vm1, %v217_v28, 0.0 }
 0x137   :  { %222 = vadd.xlane.f32.xlu1 %v221_v29  ;;  %v195_v30 = vpop.xlane.xlu0 %194  ;;  %v172_v29 = vadd.f32 %v3571_v4, %v171_v22 }
 0x138   :  { %v210_v31 = vmul.f32 %v3591_v24, %v195_v30 }
 0x13a   :  { %v214_v32 = vsub.f32 %v3584_v13, %v210_v31  ;;  %v3639_v31 = vadd.f32 %v172_v29, %v3580_v10 }
 0x13c   :  { %v218_v33 = vmul.f32 %v214_v32, %v214_v32 }
 0x13e   :  { %v224_v34 = vsel %vm189_vm1, %v218_v33, 0.0 }
 0x13f   :  { %225 = vadd.xlane.f32.xlu1 %v224_v34 }
 0x147   :  { %197 = vadd.xlane.f32.xlu1 %v196_v38 }
 0x1aa   :  { %v223_v40 = vpop.xlane.xlu1 %222 }
 0x1ab   :  { %v233_v42 = vmul.f32 %v223_v40, %v3591_v24 }
 0x1ad   :  { %v237_v43 = vadd.f32 1e-05, %v233_v42 }
 0x1af   :  { %3148 = vrsqrt.f32 %v237_v43  ;;  %vm247_vm4 = vweird.f32 %v237_v43 }
 0x1b2   :  { %v226_v44 = vpop.xlane.xlu1 %225 }
 0x1b3   :  { %v234_v45 = vmul.f32 %v226_v44, %v3591_v24 }
 0x1b5   :  { %v3149_v46 = vpop.eup %3148  ;;  %v238_v47 = vadd.f32 1e-05, %v234_v45 }
 0x1b6   :  { %v242_v48 = vmul.f32 %v3149_v46, %v237_v43  ;;  %vm248_vm3 = vweird.f32 %v3149_v46 }
 0x1b7   :  { %3150 = vrsqrt.f32 %v238_v47  ;;  %vm249_vm5 = vmor %vm247_vm4, %vm248_vm3  ;;  %vm257_vm7 = vweird.f32 %v238_v47 }
 0x1b8   :  { %v243_v49 = vmul.f32 %v3149_v46, %v242_v48 }
 0x1ba   :  { %v244_v50 = vmul.f32 0.5, %v243_v49  ;;  %v198_v7 = vpop.xlane.xlu1 %197 }
 0x1bb   :  { %v211_v9 = vmul.f32 %v3591_v24, %v198_v7 }
 0x1bc   :  { %v245_v51 = vsub.f32 1.5, %v244_v50 }
 0x1bd   :  { %v3151_v52 = vpop.eup %3150  ;;  %v3621_v11 = vsub.f32 %v3600_v37, %v211_v9 }
 0x1be   :  { %v246_v53 = vmul.f32 %v3149_v46, %v245_v51  ;;  %v252_v54 = vmul.f32 %v3151_v52, %v238_v47  ;;  %vm258_vm6 = vweird.f32 %v3151_v52 }
 0x1bf   :  { %vm259_vm8 = vmor %vm257_vm7, %vm258_vm6  ;;  %v219_v12 = vmul.f32 %v3621_v11, %v3621_v11 }
 0x1c0   :  { %v253_v55 = vmul.f32 %v3151_v52, %v252_v54  ;;  %v250_v56 = vsel %vm249_vm5, %v3149_v46, %v246_v53 }
 0x1c1   :  { %v281_v59 = vmul.f32 %v250_v56, %v213_v27  ;;  %v227_v14 = vsel %vm189_vm1, %v219_v12, 0.0 }
 0x1c2   :  { %v254_v57 = vmul.f32 0.5, %v253_v55  ;;  %228 = vadd.xlane.f32.xlu1 %v227_v14 }
 0x1c3   :  { %v288_v0 = vmul.f32 %v3609_v60, %v281_v59 }
 0x1c4   :  { %v255_v58 = vsub.f32 1.5, %v254_v57 }
 0x1c5   :  { %v295_v3 = vadd.f32 %v3613_v1, %v288_v0 }
 0x1c6   :  { %v256_v61 = vmul.f32 %v3151_v52, %v255_v58 }
 0x1c8   :  { %v260_v62 = vsel %vm259_vm8, %v3151_v52, %v256_v61 }
 0x1c9   :  { %v282_v63 = vmul.f32 %v260_v62, %v214_v32  ;;  %v199_v32 = vsel %vm189_vm1, %v3639_v31, 0.0 }
 0x1cb   :  { %v289_v2 = vmul.f32 %v3609_v60, %v282_v63 }
 0x1cd   :  { %v296_v5 = vadd.f32 %v3613_v1, %v289_v2 }
 0x1cf   :  { %v299_v6 = vpack.c.bf16 %v296_v5, %v295_v3 }
 0x1d1   :  { %2838 = vmatmul.msk.bf16.vlgmr.msra.gmra.mxu1 %vm189_vm1, %v299_v6 }
 0x235   :  { %v229_v20 = vpop.xlane.xlu1 %228 }
 0x236   :  { %v235_v47 = vmul.f32 %v229_v20, %v3591_v24 }
 0x238   :  { %v239_v48 = vadd.f32 1e-05, %v235_v47 }
 0x23a   :  { %vm267_vm10 = vweird.f32 %v239_v48 }
 0x24e   :  { %v328_v15 = vpop.f32.mrf.mxu1 }
 0x256   :  { %v330_v16 = vpop.f32.mrf.mxu1 }
 0x257   :  { %v3626_v17 = vpack.c.bf16 %v330_v16, %v328_v15 }
 0x259   :  { %340 = vrot.lane.b32.xlu2 %v3626_v17, %s3391_s0  ;;  %388 = vrot.lane.b32.xlu1 %v3626_v17, %s3392_s5 }
 0x2b3   :  { %v341_v18 = vpop.permute.xlu2 %340 }
 0x2b4   :  { %v347_v19 = vsel %vm342_vm9, %v341_v18, 0 }
 0x2b5   :  { %356 = vmatpush.bf16.xpose.msrb.mxu2 %v347_v19 }
 0x2bc   :  { %2840 = vmatmul.msk.bf16.vlgmr.msrb.gmra.mxu2 %vm342_vm9, %v3626_v17 }
 0x2cb   :  { %v389_v21 = vpop.permute.xlu1 %388 }
 0x2cc   :  { %401 = vmatpush.bf16.msra.mxu3 %v389_v21 }
 0x33f   :  { %v358_v23 = vpop.f32.mrf.mxu2 }
 0x340   :  { %v363_v25 = vmul.f32 0.35355338, %v358_v23 }
 0x342   :  { %v365_v26 = vsel %vm148_vm0, %v363_v25, -inf }
 0x343   :  { %366 = vmax.xlane.f32.xlu2 %v365_v26 }
 0x347   :  { %v360_v27 = vpop.f32.mrf.mxu2 }
 0x348   :  { %v364_v28 = vmul.f32 0.35355338, %v360_v27 }
 0x34a   :  { %v368_v30 = vsel %vm148_vm0, %v364_v28, -inf }
 0x34b   :  { %369 = vmax.xlane.f32.xlu0 %v368_v30  ;;  %v184_v30 = vld [vmem:[%s3449_s3] sm:$0xf] }
 0x353   :  { %200 = vadd.xlane.f32.xlu0 %v199_v32 }
 0x35b   :  { %409 = vrot.lane.b32.xlu2 %v3626_v17, %s3393_s9 }
 0x3b6   :  { %v367_v33 = vpop.xlane.xlu2 %366 }
 0x3b7   :  { %v371_v34 = vsub.f32 %v363_v25, %v367_v33 }
 0x3b9   :  { %v373_v35 = vmul.f32 1.442695, %v371_v34 }
 0x3bb   :  { %3152 = vpow2.f32 %v373_v35 }
 0x3be   :  { %v370_v36 = vpop.xlane.xlu0 %369 }
 0x3bf   :  { %v372_v39 = vsub.f32 %v364_v28, %v370_v36  ;;  %v410_v28 = vpop.permute.xlu2 %409 }
 0x3c1   :  { %v3153_v4 = vpop.eup %3152  ;;  %v375_v41 = vmul.f32 1.442695, %v372_v39 }
 0x3c2   :  { %v377_v38 = vsel %vm148_vm0, %v3153_v4, 0.0 }
 0x3c3   :  { %378 = vadd.xlane.f32.xlu1 %v377_v38  ;;  %3154 = vpow2.f32 %v375_v41 }
 0x3c4   :  { %3156 = vrsqrt.f32 %v239_v48 }
 0x3c6   :  { %v201_v10 = vpop.xlane.xlu0 %200 }
 0x3c7   :  { %v212_v40 = vmul.f32 %v3591_v24, %v201_v10 }
 0x3c9   :  { %v216_v42 = vsub.f32 %v3639_v31, %v212_v40  ;;  %v3155_v45 = vpop.eup %3154 }
 0x3ca   :  { %v380_v46 = vsel %vm148_vm0, %v3155_v45, 0.0  ;;  %v3157_v49 = vpop.eup %3156 }
 0x3cb   :  { %v220_v43 = vmul.f32 %v216_v42, %v216_v42  ;;  %v262_v50 = vmul.f32 %v3157_v49, %v239_v48  ;;  %vm268_vm11 = vweird.f32 %v3157_v49 }
 0x3cc   :  { %vm269_vm12 = vmor %vm267_vm10, %vm268_vm11  ;;  %vm1292_vm10 = vcmask 523264   ;;  %vm1382_vm11 = vcmask 392192  }
 0x3cd   :  { %v230_v44 = vsel %vm189_vm1, %v220_v43, 0.0  ;;  %v263_v51 = vmul.f32 %v3157_v49, %v262_v50 }
 0x3ce   :  { %231 = vadd.xlane.f32.xlu0 %v230_v44 }
 0x3cf   :  { %v264_v55 = vmul.f32 0.5, %v263_v51 }
 0x3d1   :  { %v265_v57 = vsub.f32 1.5, %v264_v55 }
 0x3d3   :  { %v266_v61 = vmul.f32 %v3157_v49, %v265_v57 }
 0x3d5   :  { %v270_v6 = vsel %vm269_vm12, %v3157_v49, %v266_v61 }
 0x3d6   :  { %381 = vadd.xlane.f32.xlu0 %v380_v46  ;;  %v283_v16 = vmul.f32 %v270_v6, %v3621_v11 }
 0x3d8   :  { %v290_v21 = vmul.f32 %v3609_v60, %v283_v16 }
 0x3da   :  { %v297_v25 = vadd.f32 %v3613_v1, %v290_v21 }
 0x3dc   :  { %522 = vrot.lane.b32.xlu1 %v3626_v17, %s3394_s13 }
 0x3ea   :  { %411 = vrot.lane.b32.xlu0 %v3626_v17, %s3395_s17 }
 0x3f2   :  { %520 = vrot.lane.b32.xlu0 %v3626_v17, %s3396_s21 }
 0x436   :  { %v379_v56 = vpop.xlane.xlu1 %378 }
 0x441   :  { %v232_v52 = vpop.xlane.xlu0 %231 }
 0x442   :  { %v236_v53 = vmul.f32 %v232_v52, %v3591_v24 }
 0x444   :  { %v240_v54 = vadd.f32 1e-05, %v236_v53 }
 0x446   :  { %3158 = vrsqrt.f32 %v240_v54  ;;  %vm277_vm14 = vweird.f32 %v240_v54 }
 0x447   :  { %3160 = vrcp.f32 %v379_v56 }
 0x449   :  { %v382_v58 = vpop.xlane.xlu0 %381 }
 0x44a   :  { %3162 = vrcp.f32 %v382_v58 }
 0x44c   :  { %v3159_v59 = vpop.eup %3158 }
 0x44d   :  { %v272_v62 = vmul.f32 %v3159_v59, %v240_v54  ;;  %v3161_v63 = vpop.eup %3160  ;;  %vm278_vm13 = vweird.f32 %v3159_v59 }
 0x44e   :  { %v523_v0 = vpop.permute.xlu1 %522  ;;  %v385_v9 = vmul.f32 %v3161_v63, %v3153_v4  ;;  %vm279_vm15 = vmor %vm277_vm14, %vm278_vm13 }
 0x44f   :  { %v273_v2 = vmul.f32 %v3159_v59, %v272_v62  ;;  %v528_v3 = vsel %vm342_vm9, %v523_v0, 0 }
 0x450   :  { %v3163_v5 = vpop.eup %3162  ;;  %537 = vmatpush.bf16.xpose.msrb.mxu1 %v528_v3 }
 0x451   :  { %v274_v7 = vmul.f32 0.5, %v273_v2  ;;  %v386_v12 = vmul.f32 %v3163_v5, %v3155_v45 }
 0x453   :  { %v275_v14 = vsub.f32 1.5, %v274_v7  ;;  %v387_v15 = vpack.c.bf16 %v386_v12, %v385_v9 }
 0x455   :  { %v276_v18 = vmul.f32 %v3159_v59, %v275_v14  ;;  %2841 = vmatmul.msk.bf16.vlgmr.msra.gmra.mxu3 %vm148_vm0, %v387_v15 }
 0x457   :  { %v280_v19 = vsel %vm279_vm15, %v3159_v59, %v276_v18 }
 0x458   :  { %v284_v20 = vmul.f32 %v280_v19, %v216_v42 }
 0x45a   :  { %v291_v22 = vmul.f32 %v3609_v60, %v284_v20  ;;  %v3671_v60 = vsel %vm482_vm2, %v184_v30, 0 }
 0x45c   :  { %v412_v23 = vpop.permute.xlu0 %411  ;;  %v298_v26 = vadd.f32 %v3613_v1, %v291_v22 }
 0x45d   :  { %v417_v27 = vsel %vm342_vm9, %v412_v23, 0 }
 0x45e   :  { %426 = vmatpush.bf16.xpose.msrb.mxu3 %v417_v27  ;;  %v300_v11 = vpack.c.bf16 %v298_v26, %v297_v25 }
 0x460   :  { %2839 = vmatmul.msk.bf16.gmra.mxu1 %vm189_vm1, %v300_v11 }
 0x464   :  { %v521_v29 = vpop.permute.xlu0 %520 }
 0x465   :  { %2842 = vmatmul.msk.bf16.vlgmr.msrb.gmra.mxu3 %vm342_vm9, %v410_v28 }
 0x466   :  { %513 = vmatpush.bf16.msra.mxu3 %v3671_v60 }
 0x470   :  { %2846 = vmatmul.msk.bf16.vlgmr.msrb.gmra.mxu1 %vm342_vm9, %v521_v29 }
 0x4d8   :  { %v403_v1 = vpop.f32.mrf.mxu3 }
 0x4dd   :  { %v333_v32 = vpop.f32.mrf.mxu1 }
 0x4e0   :  { %v405_v33 = vpop.f32.mrf.mxu3 }
 0x4e1   :  { %v408_v34 = vpack.c.bf16 %v405_v33, %v403_v1 }
 0x4e3   :  { %2845 = vmatmul.msk.bf16.vlgmr.msra.gmra.mxu3 %vm342_vm9, %v408_v34  ;;  %v186_v34 = vld [vmem:[%s3449_s3 + $0x8] sm:$0xf] }
 0x4e5   :  { %v335_v35 = vpop.f32.mrf.mxu1 }
 0x4e6   :  { %v3691_v7 = vpack.c.bf16 %v335_v35, %v333_v32  ;;  %v185_v32 = vld [vmem:[%s3449_s3 + $0x4] sm:$0xf]  ;;  %v594_v35 = vsel %vm482_vm2, %v186_v34, 0 }
 0x4e7   :  { %v484_v33 = vsel %vm482_vm2, %v185_v32, 0 }
 0x4e8   :  { %v428_v36 = vpop.f32.mrf.mxu3  ;;  %493 = vmatpush.bf16.msrb.mxu0 %v484_v33 }
 0x4e9   :  { %v433_v4 = vmul.f32 0.35355338, %v428_v36 }
 0x4eb   :  { %v435_v38 = vsel %vm148_vm0, %v433_v4, -inf }
 0x4ec   :  { %436 = vmax.xlane.f32.xlu1 %v435_v38  ;;  %603 = vmatpush.bf16.msra.mxu0 %v594_v35 }
 0x4ed   :  { %v539_v39 = vpop.f32.mrf.mxu1 }
 0x4ee   :  { %v544_v10 = vmul.f32 0.35355338, %v539_v39 }
 0x4f0   :  { %v430_v40 = vpop.f32.mrf.mxu3  ;;  %v546_v41 = vsel %vm148_vm0, %v544_v10, -inf }
 0x4f1   :  { %v434_v42 = vmul.f32 0.35355338, %v430_v40  ;;  %547 = vmax.xlane.f32.xlu0 %v546_v41 }
 0x4f3   :  { %v438_v43 = vsel %vm148_vm0, %v434_v42, -inf }
 0x4f4   :  { %439 = vmax.xlane.f32.xlu2 %v438_v43 }
 0x4f5   :  { %v541_v44 = vpop.f32.mrf.mxu1 }
 0x4f6   :  { %v545_v45 = vmul.f32 0.35355338, %v541_v44 }
 0x4f8   :  { %v549_v46 = vsel %vm148_vm0, %v545_v45, -inf }
 0x4fc   :  { %550 = vmax.xlane.f32.xlu2 %v549_v46 }
 0x514   :  { %458 = vrot.lane.b32.xlu2 %v3626_v17, %s3397_s25 }
 0x51c   :  { %612 = vrot.lane.b32.xlu2 %v3626_v17, %s3398_s29 }
 0x55f   :  { %v437_v47 = vpop.xlane.xlu1 %436 }
 0x560   :  { %v441_v48 = vsub.f32 %v433_v4, %v437_v47 }
 0x562   :  { %v443_v49 = vmul.f32 1.442695, %v441_v48 }
 0x564   :  { %3164 = vpow2.f32 %v443_v49  ;;  %v548_v50 = vpop.xlane.xlu0 %547 }
 0x565   :  { %v552_v51 = vsub.f32 %v544_v10, %v548_v50 }
 0x566   :  { %v515_v4 = vpop.f32.mrf.mxu3 }
 0x567   :  { %v554_v52 = vmul.f32 1.442695, %v552_v51  ;;  %v440_v53 = vpop.xlane.xlu2 %439 }
 0x568   :  { %v442_v54 = vsub.f32 %v434_v42, %v440_v53 }
 0x569   :  { %3166 = vpow2.f32 %v554_v52 }
 0x56a   :  { %v3165_v55 = vpop.eup %3164  ;;  %v445_v56 = vmul.f32 1.442695, %v442_v54 }
 0x56b   :  { %v447_v57 = vsel %vm148_vm0, %v3165_v55, 0.0 }
 0x56c   :  { %3168 = vpow2.f32 %v445_v56  ;;  %448 = vadd.xlane.f32.xlu1 %v447_v57 }
 0x56e   :  { %v3707_v40 = vpop.f32.mrf.mxu3 }
 0x56f   :  { %v551_v58 = vpop.xlane.xlu2 %550  ;;  %v3167_v59 = vpop.eup %3166 }
 0x570   :  { %v553_v61 = vsub.f32 %v545_v45, %v551_v58  ;;  %v558_v2 = vsel %vm148_vm0, %v3167_v59, 0.0 }
 0x572   :  { %v3169_v62 = vpop.eup %3168  ;;  %v556_v63 = vmul.f32 1.442695, %v553_v61 }
 0x573   :  { %v450_v0 = vsel %vm148_vm0, %v3169_v62, 0.0 }
 0x574   :  { %3170 = vpow2.f32 %v556_v63  ;;  %451 = vadd.xlane.f32.xlu0 %v450_v0  ;;  %559 = vadd.xlane.f32.xlu1 %v558_v2 }
 0x577   :  { %v459_v3 = vpop.permute.xlu2 %458 }
 0x578   :  { %471 = vmatpush.bf16.msra.mxu2 %v459_v3 }
 0x57a   :  { %v3171_v5 = vpop.eup %3170 }
 0x57b   :  { %v561_v6 = vsel %vm148_vm0, %v3171_v5, 0.0 }
 0x57c   :  { %562 = vadd.xlane.f32.xlu0 %v561_v6 }
 0x57f   :  { %v613_v29 = vpop.permute.xlu2 %612 }
 0x58d   :  { %569 = vrot.lane.b32.xlu1 %v3626_v17, %s3399_s15 }
 0x590   :  { %614 = vrot.lane.b32.xlu0 %v3626_v17, %s3400_s16 }
 0x598   :  { %706 = vrot.lane.b32.xlu0 %v3691_v7, %s3391_s0 }
 0x5a0   :  { %661 = vrot.lane.b32.xlu0 %v3626_v17, %s3401_s18 }
 0x5df   :  { %v449_v9 = vpop.xlane.xlu1 %448 }
 0x5e0   :  { %3172 = vrcp.f32 %v449_v9 }
 0x5e6   :  { %v3173_v14 = vpop.eup %3172 }
 0x5e7   :  { %v452_v12 = vpop.xlane.xlu0 %451  ;;  %v455_v16 = vmul.f32 %v3173_v14, %v3165_v55  ;;  %v560_v21 = vpop.xlane.xlu1 %559 }
 0x5e8   :  { %3174 = vrcp.f32 %v452_v12 }
 0x5ee   :  { %v3175_v15 = vpop.eup %3174 }
 0x5ef   :  { %v456_v18 = vmul.f32 %v3175_v15, %v3169_v62  ;;  %v563_v20 = vpop.xlane.xlu0 %562 }
 0x5f0   :  { %3176 = vrcp.f32 %v563_v20 }
 0x5f1   :  { %v457_v19 = vpack.c.bf16 %v456_v18, %v455_v16  ;;  %3178 = vrcp.f32 %v560_v21 }
 0x5f3   :  { %2843 = vmatmul.msk.bf16.vlgmr.msra.gmra.mxu2 %vm148_vm0, %v457_v19 }
 0x5f6   :  { %v3177_v22 = vpop.eup %3176 }
 0x5f7   :  { %v3179_v23 = vpop.eup %3178  ;;  %v567_v25 = vmul.f32 %v3177_v22, %v3171_v5 }
 0x5f8   :  { %v566_v17 = vmul.f32 %v3179_v23, %v3167_v59 }
 0x5fa   :  { %v568_v27 = vpack.c.bf16 %v567_v25, %v566_v17 }
 0x5ff   :  { %v570_v26 = vpop.permute.xlu1 %569 }
 0x600   :  { %582 = vmatpush.bf16.msrb.mxu2 %v570_v26 }
 0x602   :  { %v615_v11 = vpop.permute.xlu0 %614 }
 0x603   :  { %v620_v28 = vsel %vm342_vm9, %v615_v11, 0  ;;  %2847 = vmatmul.msk.bf16.vlgmr.msrb.gmra.mxu2 %vm148_vm0, %v568_v27 }
 0x604   :  { %629 = vmatpush.bf16.xpose.msrb.mxu3 %v620_v28 }
 0x60a   :  { %v707_v30 = vpop.permute.xlu0 %706 }
 0x60b   :  { %2849 = vmatmul.msk.bf16.vlgmr.msrb.gmra.mxu3 %vm342_vm9, %v613_v29  ;;  %v712_v10 = vsel %vm342_vm9, %v707_v30, 0 }
 0x612   :  { %v662_v1 = vpop.permute.xlu0 %661 }
 0x613   :  { %674 = vmatpush.bf16.msra.mxu1 %v662_v1 }
 0x676   :  { %v473_v36 = vpop.f32.mrf.mxu2 }
 0x67e   :  { %v475_v38 = vpop.f32.mrf.mxu2 }
 0x67f   :  { %v478_v39 = vpack.c.bf16 %v475_v38, %v473_v36 }
 0x681   :  { %2844 = vmatmul.msk.bf16.vlgmr.msrb.gmra.mxu0 %vm342_vm9, %v478_v39 }
 0x682   :  { %721 = vmatpush.bf16.xpose.msrb.mxu0 %v712_v10  ;;  %v187_v10 = vld [vmem:[%s3449_s3 + $0xc] sm:$0xf]  ;;  %s4311_s3 = sld [smem:[#allocation6_spill]] }
 0x686   :  { %v584_v41 = vpop.f32.mrf.mxu2 }
 0x68e   :  { %v586_v42 = vpop.f32.mrf.mxu2  ;;  %v631_v43 = vpop.f32.mrf.mxu3 }
 0x68f   :  { %v589_v44 = vpack.c.bf16 %v586_v42, %v584_v41  ;;  %v636_v45 = vmul.f32 0.35355338, %v631_v43  ;;  %v3748_v41 = vsel %vm482_vm2, %v187_v10, 0 }
 0x690   :  { %695 = vmatpush.bf16.msra.mxu2 %v3748_v41 }
 0x691   :  { %2848 = vmatmul.msk.bf16.vlgmr.msra.gmra.mxu0 %vm342_vm9, %v589_v44  ;;  %v638_v46 = vsel %vm148_vm0, %v636_v45, -inf }
 0x692   :  { %639 = vmax.xlane.f32.xlu2 %v638_v46  ;;  %854 = vmatpush.bf16.msra.mxu0 %v484_v33 }
 0x696   :  { %v633_v47 = vpop.f32.mrf.mxu3 }
 0x697   :  { %v637_v48 = vmul.f32 0.35355338, %v633_v47 }
 0x699   :  { %v641_v49 = vsel %vm148_vm0, %v637_v48, -inf }
 0x69a   :  { %642 = vmax.xlane.f32.xlu1 %v641_v49 }
 0x6a1   :  { %2852 = vmatmul.msk.bf16.vlgmr.msrb.gmra.mxu0 %vm342_vm9, %v3691_v7 }
 0x6a2   :  { %958 = vmatpush.bf16.msrb.mxu0 %v594_v35 }
 0x6fe   :  { %v495_v50 = vpop.f32.mrf.mxu0 }
 0x6ff   :  { %v516_v55 = vadd.f32 %v515_v4, %v495_v50 }
 0x705   :  { %v640_v51 = vpop.xlane.xlu2 %639 }
 0x706   :  { %v644_v52 = vsub.f32 %v636_v45, %v640_v51  ;;  %v3714_v53 = vpop.f32.mrf.mxu0 }
 0x708   :  { %v646_v54 = vmul.f32 1.442695, %v644_v52 }
 0x70a   :  { %3180 = vpow2.f32 %v646_v54 }
 0x70d   :  { %v643_v56 = vpop.xlane.xlu1 %642 }
 0x70e   :  { %v645_v57 = vsub.f32 %v637_v48, %v643_v56  ;;  %v605_v58 = vpop.f32.mrf.mxu0 }
 0x70f   :  { %v3716_v59 = vadd.f32 %v605_v58, %v516_v55 }
 0x710   :  { %v3181_v61 = vpop.eup %3180  ;;  %v648_v62 = vmul.f32 1.442695, %v645_v57 }
 0x711   :  { %v650_v63 = vsel %vm148_vm0, %v3181_v61, 0.0 }
 0x712   :  { %3182 = vpow2.f32 %v648_v62  ;;  %651 = vadd.xlane.f32.xlu1 %v650_v63 }
 0x716   :  { %v3719_v0 = vpop.f32.mrf.mxu0 }
 0x718   :  { %v3183_v2 = vpop.eup %3182 }
 0x719   :  { %v653_v3 = vsel %vm148_vm0, %v3183_v2, 0.0 }
 0x71a   :  { %654 = vadd.xlane.f32.xlu2 %v653_v3 }
 0x71e   :  { %v723_v5 = vpop.f32.mrf.mxu0 }
 0x71f   :  { %v728_v6 = vmul.f32 0.35355338, %v723_v5 }
 0x721   :  { %v730_v9 = vsel %vm148_vm0, %v728_v6, -inf }
 0x722   :  { %731 = vmax.xlane.f32.xlu0 %v730_v9 }
 0x726   :  { %v725_v12 = vpop.f32.mrf.mxu0 }
 0x727   :  { %v729_v14 = vmul.f32 0.35355338, %v725_v12 }
 0x729   :  { %v733_v15 = vsel %vm148_vm0, %v729_v14, -inf }
 0x72a   :  { %734 = vmax.xlane.f32.xlu2 %v733_v15  ;;  %v3761_v15 = vld [vmem:[%s3454_s8] ss:$0 sm:$0xff]  ;;  %s4312_s8 = sld [smem:[#allocation5_spill]] }
 0x72b   :  { %776 = vrot.lane.b32.xlu1 %v3691_v7, %s3395_s17 }
 0x736   :  { %880 = vrot.lane.b32.xlu0 %v3691_v7, %s3394_s13 }
 0x742   :  { %774 = vrot.lane.b32.xlu2 %v3691_v7, %s3393_s9 }
 0x74a   :  { %878 = vrot.lane.b32.xlu2 %v3691_v7, %s3396_s21 }
 0x752   :  { %753 = vrot.lane.b32.xlu2 %v3691_v7, %s3392_s5 }
 0x75a   :  { %969 = vrot.lane.b32.xlu2 %v3691_v7, %s3400_s16 }
 0x785   :  { %v652_v16 = vpop.xlane.xlu1 %651 }
 0x786   :  { %3184 = vrcp.f32 %v652_v16 }
 0x78c   :  { %v3185_v19 = vpop.eup %3184 }
 0x78d   :  { %v655_v18 = vpop.xlane.xlu2 %654  ;;  %v658_v21 = vmul.f32 %v3185_v19, %v3181_v61 }
 0x78e   :  { %3186 = vrcp.f32 %v655_v18 }
 0x794   :  { %v3187_v20 = vpop.eup %3186 }
 0x795   :  { %v659_v22 = vmul.f32 %v3187_v20, %v3183_v2  ;;  %v732_v23 = vpop.xlane.xlu0 %731 }
 0x796   :  { %v736_v25 = vsub.f32 %v728_v6, %v732_v23 }
 0x797   :  { %v660_v17 = vpack.c.bf16 %v659_v22, %v658_v21 }
 0x798   :  { %v738_v26 = vmul.f32 1.442695, %v736_v25 }
 0x799   :  { %2850 = vmatmul.msk.bf16.vlgmr.msra.gmra.mxu1 %vm148_vm0, %v660_v17  ;;  %v518_v17 = vadd.f32 %v3707_v40, %v3714_v53 }
 0x79a   :  { %3188 = vpow2.f32 %v738_v26 }
 0x79d   :  { %v735_v27 = vpop.xlane.xlu2 %734  ;;  %v777_v11 = vpop.permute.xlu1 %776 }
 0x79e   :  { %v737_v28 = vsub.f32 %v729_v14, %v735_v27  ;;  %v782_v29 = vsel %vm342_vm9, %v777_v11, 0 }
 0x79f   :  { %791 = vmatpush.bf16.xpose.msrb.mxu1 %v782_v29 }
 0x7a0   :  { %v3189_v30 = vpop.eup %3188  ;;  %v740_v1 = vmul.f32 1.442695, %v737_v28 }
 0x7a1   :  { %v742_v32 = vsel %vm148_vm0, %v3189_v30, 0.0 }
 0x7a2   :  { %3190 = vpow2.f32 %v740_v1  ;;  %743 = vadd.xlane.f32.xlu1 %v742_v32 }
 0x7a5   :  { %v775_v33 = vpop.permute.xlu2 %774 }
 0x7a8   :  { %v3191_v34 = vpop.eup %3190  ;;  %v881_v35 = vpop.permute.xlu0 %880 }
 0x7a9   :  { %v886_v36 = vsel %vm342_vm9, %v881_v35, 0  ;;  %2854 = vmatmul.msk.bf16.vlgmr.msrb.gmra.mxu1 %vm342_vm9, %v775_v33  ;;  %v745_v4 = vsel %vm148_vm0, %v3191_v34, 0.0 }
 0x7aa   :  { %746 = vadd.xlane.f32.xlu0 %v745_v4  ;;  %895 = vmatpush.bf16.xpose.msra.mxu1 %v886_v36 }
 0x7ad   :  { %v879_v38 = vpop.permute.xlu2 %878 }
 0x7b5   :  { %v754_v39 = vpop.permute.xlu2 %753 }
 0x7b6   :  { %766 = vmatpush.bf16.msra.mxu3 %v754_v39 }
 0x7b9   :  { %2858 = vmatmul.msk.bf16.vlgmr.msra.gmra.mxu1 %vm342_vm9, %v879_v38 }
 0x7ba   :  { %871 = vmatpush.bf16.msrb.mxu3 %v3671_v60 }
 0x7bd   :  { %v970_v50 = vpop.permute.xlu2 %969 }
 0x7be   :  { %967 = vrot.lane.b32.xlu0 %v3691_v7, %s3398_s29  ;;  %v975_v55 = vsel %vm342_vm9, %v970_v50, 0 }
 0x815   :  { %v744_v43 = vpop.xlane.xlu1 %743 }
 0x816   :  { %v676_v42 = vpop.f32.mrf.mxu1  ;;  %3192 = vrcp.f32 %v744_v43 }
 0x81c   :  { %v3193_v60 = vpop.eup %3192 }
 0x81d   :  { %v747_v44 = vpop.xlane.xlu0 %746  ;;  %v750_v48 = vmul.f32 %v3193_v60, %v3189_v30 }
 0x81e   :  { %3194 = vrcp.f32 %v747_v44  ;;  %v678_v45 = vpop.f32.mrf.mxu1 }
 0x81f   :  { %v681_v46 = vpack.c.bf16 %v678_v45, %v676_v42 }
 0x821   :  { %2851 = vmatmul.msk.bf16.vlgmr.msra.gmra.mxu2 %vm342_vm9, %v681_v46 }
 0x824   :  { %v3195_v47 = vpop.eup %3194 }
 0x825   :  { %v751_v49 = vmul.f32 %v3195_v47, %v3191_v34 }
 0x826   :  { %v793_v51 = vpop.f32.mrf.mxu1 }
 0x827   :  { %v752_v52 = vpack.c.bf16 %v751_v49, %v750_v48  ;;  %v798_v54 = vmul.f32 0.35355338, %v793_v51 }
 0x829   :  { %2853 = vmatmul.msk.bf16.vlgmr.msra.gmra.mxu3 %vm148_vm0, %v752_v52  ;;  %v800_v56 = vsel %vm148_vm0, %v798_v54, -inf }
 0x82a   :  { %984 = vmatpush.bf16.xpose.msra.mxu3 %v975_v55  ;;  %801 = vmax.xlane.f32.xlu2 %v800_v56 }
 0x82e   :  { %v795_v57 = vpop.f32.mrf.mxu1 }
 0x82f   :  { %v799_v58 = vmul.f32 0.35355338, %v795_v57 }
 0x830   :  { %v968_v44 = vpop.permute.xlu0 %967 }
 0x831   :  { %v803_v61 = vsel %vm148_vm0, %v799_v58, -inf }
 0x832   :  { %804 = vmax.xlane.f32.xlu1 %v803_v61 }
 0x836   :  { %v897_v62 = vpop.f32.mrf.mxu1 }
 0x837   :  { %v902_v63 = vmul.f32 0.35355338, %v897_v62 }
 0x839   :  { %v904_v2 = vsel %vm148_vm0, %v902_v63, -inf }
 0x83a   :  { %905 = vmax.xlane.f32.xlu1 %v904_v2 }
 0x83e   :  { %v899_v3 = vpop.f32.mrf.mxu1 }
 0x83f   :  { %v903_v5 = vmul.f32 0.35355338, %v899_v3 }
 0x841   :  { %v907_v6 = vsel %vm148_vm0, %v903_v5, -inf }
 0x842   :  { %823 = vrot.lane.b32.xlu2 %v3691_v7, %s3397_s25  ;;  %908 = vmax.xlane.f32.xlu1 %v907_v6 }
 0x89d   :  { %v802_v9 = vpop.xlane.xlu2 %801 }
 0x89e   :  { %v806_v12 = vsub.f32 %v798_v54, %v802_v9 }
 0x8a0   :  { %v808_v14 = vmul.f32 1.442695, %v806_v12 }
 0x8a2   :  { %3196 = vpow2.f32 %v808_v14 }
 0x8a4   :  { %v697_v16 = vpop.f32.mrf.mxu2 }
 0x8a5   :  { %v702_v18 = vadd.f32 %v697_v16, %v3716_v59  ;;  %v824_v19 = vpop.permute.xlu2 %823  ;;  %v805_v20 = vpop.xlane.xlu1 %804  ;;  %v611_v59 = vadd.f32 %v3719_v0, %v518_v17 }
 0x8a6   :  { %v807_v21 = vsub.f32 %v799_v58, %v805_v20  ;;  %836 = vmatpush.bf16.msrb.mxu2 %v824_v19 }
 0x8a7   :  { %v1059_v22 = vadd.f32 %v3761_v15, %v702_v18 }
 0x8a8   :  { %v3197_v23 = vpop.eup %3196  ;;  %v810_v25 = vmul.f32 1.442695, %v807_v21 }
 0x8a9   :  { %v3768_v26 = vadd.f32 %v1059_v22, %v3575_v8  ;;  %v812_v27 = vsel %vm148_vm0, %v3197_v23, 0.0 }
 0x8aa   :  { %3198 = vpow2.f32 %v810_v25  ;;  %813 = vadd.xlane.f32.xlu0 %v812_v27 }
 0x8ab   :  { %v1083_v11 = vsel %vm189_vm1, %v3768_v26, 0.0 }
 0x8ac   :  { %v699_v28 = vpop.f32.mrf.mxu2  ;;  %1084 = vadd.xlane.f32.xlu2 %v1083_v11  ;;  %v768_v29 = vpop.f32.mrf.mxu3 }
 0x8ad   :  { %v703_v30 = vadd.f32 %v699_v28, %v611_v59  ;;  %v906_v1 = vpop.xlane.xlu1 %905 }
 0x8ae   :  { %v910_v32 = vsub.f32 %v902_v63, %v906_v1 }
 0x8af   :  { %v1060_v40 = vadd.f32 %v3761_v15, %v703_v30  ;;  %v3050_v30 = vld [vmem:[%s3469_s24 + $0x8] sm:$0xff] }
 0x8b0   :  { %v3199_v53 = vpop.eup %3198  ;;  %v912_v8 = vmul.f32 1.442695, %v910_v32 }
 0x8b1   :  { %v815_v33 = vsel %vm148_vm0, %v3199_v53, 0.0  ;;  %v3777_v34 = vadd.f32 %v1060_v40, %v3584_v13 }
 0x8b2   :  { %3200 = vpow2.f32 %v912_v8  ;;  %816 = vadd.xlane.f32.xlu1 %v815_v33 }
 0x8b3   :  { %v1086_v0 = vsel %vm189_vm1, %v3777_v34, 0.0 }
 0x8b4   :  { %1087 = vadd.xlane.f32.xlu0 %v1086_v0  ;;  %v770_v35 = vpop.f32.mrf.mxu3 }
 0x8b5   :  { %v773_v36 = vpack.c.bf16 %v770_v35, %v768_v29  ;;  %v909_v4 = vpop.xlane.xlu1 %908  ;;  %v3049_v35 = vld [vmem:[%s3469_s24] sm:$0xff]  ;;  %s4315_s24 = sld [smem:[#allocation8_spill]] }
 0x8b6   :  { %v911_v38 = vsub.f32 %v903_v5, %v909_v4 }
 0x8b7   :  { %2857 = vmatmul.msk.bf16.vlgmr.msrb.gmra.mxu3 %vm342_vm9, %v773_v36 }
 0x8b8   :  { %v3201_v39 = vpop.eup %3200  ;;  %v914_v10 = vmul.f32 1.442695, %v911_v38 }
 0x8b9   :  { %v916_v42 = vsel %vm148_vm0, %v3201_v39, 0.0 }
 0x8ba   :  { %3202 = vpow2.f32 %v914_v10  ;;  %917 = vadd.xlane.f32.xlu1 %v916_v42 }
 0x8c0   :  { %v3203_v13 = vpop.eup %3202 }
 0x8c1   :  { %v919_v43 = vsel %vm148_vm0, %v3203_v13, 0.0 }
 0x8c2   :  { %920 = vadd.xlane.f32.xlu1 %v919_v43 }
 0x8c7   :  { %2861 = vmatmul.msk.bf16.vlgmr.msra.gmra.mxu3 %vm342_vm9, %v968_v44 }
 0x8db   :  { %927 = vrot.lane.b32.xlu1 %v3691_v7, %s3399_s15 }
 0x91d   :  { %v814_v45 = vpop.xlane.xlu0 %813 }
 0x91e   :  { %3204 = vrcp.f32 %v814_v45 }
 0x91f   :  { %v1085_v56 = vpop.xlane.xlu2 %1084 }
 0x920   :  { %v1095_v58 = vmul.f32 %v1085_v56, %v3591_v24 }
 0x922   :  { %v3794_v3 = vsub.f32 %v3768_v26, %v1095_v58 }
 0x924   :  { %v3205_v60 = vpop.eup %3204  ;;  %v1103_v18 = vmul.f32 %v3794_v3, %v3794_v3 }
 0x925   :  { %v817_v46 = vpop.xlane.xlu1 %816  ;;  %v820_v48 = vmul.f32 %v3205_v60, %v3197_v23 }
 0x926   :  { %3206 = vrcp.f32 %v817_v46  ;;  %v1107_v22 = vsel %vm189_vm1, %v1103_v18, 0.0 }
 0x927   :  { %v1088_v12 = vpop.xlane.xlu0 %1087 }
 0x928   :  { %v1096_v16 = vmul.f32 %v1088_v12, %v3591_v24 }
 0x92a   :  { %v3803_v21 = vsub.f32 %v3777_v34, %v1096_v16 }
 0x92c   :  { %v3207_v47 = vpop.eup %3206 }
 0x92d   :  { %v821_v49 = vmul.f32 %v3207_v47, %v3199_v53  ;;  %v918_v51 = vpop.xlane.xlu1 %917 }
 0x92f   :  { %v822_v50 = vpack.c.bf16 %v821_v49, %v820_v48 }
 0x931   :  { %2855 = vmatmul.msk.bf16.vlgmr.msrb.gmra.mxu2 %vm148_vm0, %v822_v50 }
 0x935   :  { %v921_v54 = vpop.xlane.xlu1 %920 }
 0x936   :  { %3208 = vrcp.f32 %v921_v54 }
 0x937   :  { %3210 = vrcp.f32 %v918_v51 }
 0x93a   :  { %v3788_v52 = vpop.f32.mrf.mxu3 }
 0x93c   :  { %v3209_v57 = vpop.eup %3208 }
 0x93d   :  { %v3211_v61 = vpop.eup %3210  ;;  %v925_v63 = vmul.f32 %v3209_v57, %v3203_v13 }
 0x93e   :  { %v924_v5 = vmul.f32 %v3211_v61, %v3201_v39  ;;  %v3819_v61 = vld [vmem:[%s3459_s14] ss:$0 sm:$0xff]  ;;  %s4313_s14 = sld [smem:[#allocation7_spill]] }
 0x940   :  { %v926_v14 = vpack.c.bf16 %v925_v63, %v924_v5  ;;  %v3825_v5 = vld [vmem:[%s3464_s19] ss:$0 sm:$0xff]  ;;  %s4314_s19 = sld [smem:[#allocation10_spill]] }
 0x942   :  { %v3790_v55 = vpop.f32.mrf.mxu3 }
 0x94a   :  { %v986_v62 = vpop.f32.mrf.mxu3 }
 0x94b   :  { %v991_v2 = vmul.f32 0.35355338, %v986_v62 }
 0x94d   :  { %v928_v6 = vpop.permute.xlu1 %927  ;;  %v993_v9 = vsel %vm148_vm0, %v991_v2, -inf }
 0x94e   :  { %994 = vmax.xlane.f32.xlu0 %v993_v9  ;;  %940 = vmatpush.bf16.msra.mxu2 %v928_v6 }
 0x951   :  { %2859 = vmatmul.msk.bf16.vlgmr.msra.gmra.mxu2 %vm148_vm0, %v926_v14 }
 0x952   :  { %1047 = vmatpush.bf16.msrb.mxu2 %v3748_v41  ;;  %v988_v19 = vpop.f32.mrf.mxu3  ;;  %v1104_v41 = vmul.f32 %v3803_v21, %v3803_v21 }
 0x953   :  { %v992_v20 = vmul.f32 0.35355338, %v988_v19 }
 0x954   :  { %v1110_v25 = vsel %vm189_vm1, %v1104_v41, 0.0 }
 0x955   :  { %v996_v23 = vsel %vm148_vm0, %v992_v20, -inf }
 0x956   :  { %1108 = vadd.xlane.f32.xlu0 %v1107_v22  ;;  %997 = vmax.xlane.f32.xlu1 %v996_v23 }
 0x95e   :  { %1111 = vadd.xlane.f32.xlu0 %v1110_v25 }
 0x9b4   :  { %v838_v17 = vpop.f32.mrf.mxu2 }
 0x9bc   :  { %v840_v27 = vpop.f32.mrf.mxu2 }
 0x9bd   :  { %v843_v59 = vpack.c.bf16 %v840_v27, %v838_v17 }
 0x9bf   :  { %2856 = vmatmul.msk.bf16.vlgmr.msra.gmra.mxu0 %vm342_vm9, %v843_v59 }
 0x9c0   :  { %1214 = vmatpush.bf16.msra.mxu0 %v3050_v30 }
 0x9c1   :  { %v995_v11 = vpop.xlane.xlu0 %994 }
 0x9c2   :  { %v999_v28 = vsub.f32 %v991_v2, %v995_v11 }
 0x9c4   :  { %v1001_v29 = vmul.f32 1.442695, %v999_v28  ;;  %1215 = vmatpush.bf16.msra.mxu0 %v3049_v35  ;;  %v3054_v28 = vld [vmem:[%s3479_s6 + $0x18] sm:$0xff] }
 0x9c5   :  { %1303 = vmatpush.bf16.msrb.mxu3 %v3054_v28 }
 0x9c6   :  { %3212 = vpow2.f32 %v1001_v29  ;;  %v3053_v29 = vld [vmem:[%s3479_s6 + $0x10] sm:$0xff] }
 0x9c9   :  { %v1109_v1 = vpop.xlane.xlu0 %1108  ;;  %v998_v32 = vpop.xlane.xlu1 %997  ;;  %1304 = vmatpush.bf16.msrb.mxu3 %v3053_v29 }
 0x9ca   :  { %v1119_v40 = vmul.f32 %v1109_v1, %v3591_v24  ;;  %v1000_v53 = vsub.f32 %v992_v20, %v998_v32  ;;  %v3052_v1 = vld [vmem:[%s3479_s6 + $0x8] sm:$0xff]  ;;  %v3841_v32 = vld [vmem:[%s3474_s30] ss:$0 sm:$0xff]  ;;  %s4316_s30 = sld [smem:[#allocation9_spill]] }
 0x9cc   :  { %v3213_v8 = vpop.eup %3212  ;;  %v1123_v33 = vadd.f32 1e-05, %v1119_v40  ;;  %v1003_v0 = vmul.f32 1.442695, %v1000_v53  ;;  %v3051_v40 = vld [vmem:[%s3479_s6] sm:$0xff]  ;;  %s4317_s6 = sld [smem:[#allocation11_spill]] }
 0x9cd   :  { %v1005_v36 = vsel %vm148_vm0, %v3213_v8, 0.0  ;;  %1305 = vmatpush.bf16.msrb.mxu3 %v3052_v1 }
 0x9ce   :  { %3214 = vrsqrt.f32 %v1123_v33  ;;  %1006 = vadd.xlane.f32.xlu2 %v1005_v36  ;;  %vm1133_vm4 = vweird.f32 %v1123_v33 }
 0x9cf   :  { %3216 = vpow2.f32 %v1003_v0 }
 0x9d1   :  { %v1112_v4 = vpop.xlane.xlu0 %1111  ;;  %1306 = vmatpush.bf16.msrb.mxu3 %v3051_v40 }
 0x9d2   :  { %v1120_v38 = vmul.f32 %v1112_v4, %v3591_v24 }
 0x9d4   :  { %v3215_v39 = vpop.eup %3214  ;;  %v1124_v10 = vadd.f32 1e-05, %v1120_v38  ;;  %v942_v42 = vpop.f32.mrf.mxu2 }
 0x9d5   :  { %v3217_v13 = vpop.eup %3216  ;;  %v1128_v43 = vmul.f32 %v3215_v39, %v1123_v33  ;;  %vm1134_vm3 = vweird.f32 %v3215_v39 }
 0x9d6   :  { %3218 = vrsqrt.f32 %v1124_v10  ;;  %v1008_v44 = vsel %vm148_vm0, %v3217_v13, 0.0  ;;  %vm1135_vm5 = vmor %vm1133_vm4, %vm1134_vm3  ;;  %vm1143_vm7 = vweird.f32 %v1124_v10 }
 0x9d7   :  { %v1129_v45 = vmul.f32 %v3215_v39, %v1128_v43  ;;  %1009 = vadd.xlane.f32.xlu0 %v1008_v44 }
 0x9d9   :  { %v1130_v46 = vmul.f32 0.5, %v1129_v45 }
 0x9db   :  { %v1131_v60 = vsub.f32 1.5, %v1130_v46 }
 0x9dc   :  { %v3219_v47 = vpop.eup %3218  ;;  %v944_v48 = vpop.f32.mrf.mxu2 }
 0x9dd   :  { %v1132_v49 = vmul.f32 %v3215_v39, %v1131_v60  ;;  %v1138_v50 = vmul.f32 %v3219_v47, %v1124_v10  ;;  %v947_v51 = vpack.c.bf16 %v944_v48, %v942_v42  ;;  %vm1144_vm6 = vweird.f32 %v3219_v47 }
 0x9de   :  { %vm1145_vm8 = vmor %vm1143_vm7, %vm1144_vm6 }
 0x9df   :  { %v1139_v54 = vmul.f32 %v3219_v47, %v1138_v50  ;;  %2860 = vmatmul.msk.bf16.vlgmr.msrb.gmra.mxu0 %vm342_vm9, %v947_v51  ;;  %v1136_v56 = vsel %vm1135_vm5, %v3215_v39, %v1132_v49 }
 0x9e0   :  { %v1167_v62 = vmul.f32 %v1136_v56, %v3794_v3 }
 0x9e1   :  { %v1140_v57 = vmul.f32 0.5, %v1139_v54 }
 0x9e2   :  { %v1174_v6 = vmul.f32 %v3819_v61, %v1167_v62  ;;  %v3055_v62 = vld [vmem:[%s4311_s3] sm:$0xff] }
 0x9e3   :  { %v1141_v58 = vsub.f32 1.5, %v1140_v57 }
 0x9e4   :  { %v1181_v14 = vadd.f32 %v3825_v5, %v1174_v6 }
 0x9e5   :  { %v1142_v63 = vmul.f32 %v3219_v47, %v1141_v58  ;;  %v3056_v58 = vld [vmem:[%s4311_s3 + $0x8] sm:$0xff] }
 0x9e6   :  { %1016 = vrot.lane.b32.xlu2 %v3691_v7, %s3401_s18 }
 0x9e7   :  { %v1146_v2 = vsel %vm1145_vm8, %v3219_v47, %v1142_v63 }
 0x9e8   :  { %v1168_v9 = vmul.f32 %v1146_v2, %v3803_v21  ;;  %v3851_v2 = vld [vmem:[%s4312_s8] ss:$0 sm:$0xff] }
 0x9ea   :  { %v1175_v12 = vmul.f32 %v3819_v61, %v1168_v9 }
 0x9ec   :  { %v1182_v16 = vadd.f32 %v3825_v5, %v1175_v12 }
 0x9ee   :  { %v1185_v3 = vpack.c.bf16 %v1182_v16, %v1181_v14 }
 0x9f0   :  { %2872 = vmatmul.msk.bf16.vlgmr.msra.gmra.mxu0 %vm189_vm1, %v1185_v3 }
 0xa3c   :  { %v856_v19 = vpop.f32.mrf.mxu0 }
 0xa3d   :  { %v874_v27 = vadd.f32 %v3788_v52, %v856_v19 }
 0xa41   :  { %v1007_v18 = vpop.xlane.xlu2 %1006 }
 0xa42   :  { %3220 = vrcp.f32 %v1007_v18 }
 0xa44   :  { %v3833_v25 = vpop.f32.mrf.mxu0 }
 0xa48   :  { %v3221_v21 = vpop.eup %3220 }
 0xa49   :  { %v1017_v7 = vpop.permute.xlu2 %1016  ;;  %v1013_v23 = vmul.f32 %v3221_v21, %v3213_v8 }
 0xa4a   :  { %v1010_v20 = vpop.xlane.xlu0 %1009  ;;  %1029 = vmatpush.bf16.msrb.mxu1 %v1017_v7 }
 0xa4b   :  { %3222 = vrcp.f32 %v1010_v20  ;;  %v876_v20 = vadd.f32 %v3790_v55, %v3833_v25  ;;  %v3873_v25 = vld [vmem:[%s4313_s14] ss:$0 sm:$0xff] }
 0xa4e   :  { %1356 = vmatpush.bf16.msra.mxu1 %v3056_v58 }
 0xa51   :  { %v3223_v22 = vpop.eup %3222 }
 0xa52   :  { %v1014_v41 = vmul.f32 %v3223_v22, %v3217_v13  ;;  %1357 = vmatpush.bf16.msra.mxu1 %v3055_v62 }
 0xa54   :  { %v1015_v17 = vpack.c.bf16 %v1014_v41, %v1013_v23 }
 0xa56   :  { %2862 = vmatmul.msk.bf16.vlgmr.msrb.gmra.mxu1 %vm148_vm0, %v1015_v17 }
 0xa5c   :  { %v960_v59 = vpop.f32.mrf.mxu0 }
 0xa5d   :  { %v965_v11 = vadd.f32 %v960_v59, %v874_v27 }
 0xa64   :  { %v962_v30 = vpop.f32.mrf.mxu0 }
 0xa65   :  { %v966_v22 = vadd.f32 %v962_v30, %v876_v20 }
 0xa6d   :  { %v1217_v53 = vpop.f32.mrf.mxu0 }
 0xa6e   :  { %v1218_v8 = vadd.f32 %v3841_v32, %v1217_v53 }
 0xa70   :  { %v1231_v33 = vmul.f32 %v1218_v8, %v1218_v8  ;;  %v1227_v60 = vmul.f32 0.5, %v1218_v8 }
 0xa72   :  { %v1235_v0 = vmul.f32 %v1231_v33, %v1218_v8 }
 0xa74   :  { %v1239_v35 = vmul.f32 0.044715, %v1235_v0 }
 0xa75   :  { %v1219_v52 = vpop.f32.mrf.mxu0 }
 0xa76   :  { %v1243_v36 = vadd.f32 %v1239_v35, %v1218_v8  ;;  %v1220_v4 = vadd.f32 %v3841_v32, %v1219_v52  ;;  %v3402_v52 = vmov 48.0  }
 0xa78   :  { %v1232_v38 = vmul.f32 %v1220_v4, %v1220_v4  ;;  %v1247_v39 = vmul.f32 0.7978846, %v1243_v36  ;;  %v1228_v47 = vmul.f32 0.5, %v1220_v4 }
 0xa7a   :  { %v1236_v10 = vmul.f32 %v1232_v38, %v1220_v4  ;;  %3224 = vtanh.f32 %v1247_v39 }
 0xa7c   :  { %v1240_v42 = vmul.f32 0.044715, %v1236_v10 }
 0xa7e   :  { %v1244_v13 = vadd.f32 %v1240_v42, %v1220_v4 }
 0xa80   :  { %v1248_v43 = vmul.f32 0.7978846, %v1244_v13  ;;  %v3225_v44 = vpop.eup %3224 }
 0xa81   :  { %v1255_v45 = vadd.f32 1.0, %v3225_v44 }
 0xa82   :  { %3226 = vtanh.f32 %v1248_v43 }
 0xa83   :  { %v1259_v49 = vmul.f32 %v1255_v45, %v1227_v60  ;;  %3228 = vrcp.f32 %v3402_v52 }
 0xa88   :  { %v3227_v46 = vpop.eup %3226 }
 0xa89   :  { %v1256_v48 = vadd.f32 1.0, %v3227_v46  ;;  %v3229_v36 = vpop.eup %3228 }
 0xa8a   :  { %v1396_v4 = vmul.f32 48.0, %v3229_v36  ;;  %vm1400_vm12 = vweird.f32 %v3229_v36 }
 0xa8b   :  { %v1260_v50 = vmul.f32 %v1256_v48, %v1228_v47 }
 0xa8c   :  { %v1397_v38 = vsub.f32 1.0, %v1396_v4 }
 0xa8d   :  { %v1263_v51 = vpack.c.bf16 %v1260_v50, %v1259_v49 }
 0xa8e   :  { %v1398_v39 = vmul.f32 %v3229_v36, %v1397_v38 }
 0xa8f   :  { %2890 = vmatmul.msk.bf16.vlgmr.msrb.gmra.mxu3 %vm1292_vm10, %v1263_v51 }
 0xa90   :  { %v1399_v10 = vadd.f32 %v3229_v36, %v1398_v39 }
 0xa92   :  { %v3891_v42 = vsel %vm1400_vm12, %v3229_v36, %v1399_v10 }
 0xad3   :  { %v1031_v54 = vpop.f32.mrf.mxu1 }
 0xadb   :  { %v1033_v56 = vpop.f32.mrf.mxu1 }
 0xadc   :  { %v1036_v57 = vpack.c.bf16 %v1033_v56, %v1031_v54 }
 0xade   :  { %2863 = vmatmul.msk.bf16.vlgmr.msrb.gmra.mxu2 %vm342_vm9, %v1036_v57 }
 0xb12   :  { %v1308_v63 = vpop.f32.mrf.mxu3 }
 0xb13   :  { %v1309_v6 = vadd.f32 %v3851_v2, %v1308_v63 }
 0xb15   :  { %v1318_v14 = vadd.f32 %v1309_v6, %v3768_v26 }
 0xb1a   :  { %v1310_v9 = vpop.f32.mrf.mxu3 }
 0xb1b   :  { %v1311_v12 = vadd.f32 %v3851_v2, %v1310_v9 }
 0xb1d   :  { %v1319_v16 = vadd.f32 %v1311_v12, %v3777_v34 }
 0xb1f   :  { %v1327_v3 = vpack.c.bf16 %v1319_v16, %v1318_v14 }
 0xb21   :  { %2900 = vmatmul.msk.bf16.vlgmr.msra.gmra.mxu1 %vm189_vm1, %v1327_v3 }
 0xb61   :  { %v1049_v18 = vpop.f32.mrf.mxu2 }
 0xb62   :  { %v1054_v7 = vadd.f32 %v1049_v18, %v965_v11 }
 0xb64   :  { %v1061_v19 = vadd.f32 %v3761_v15, %v1054_v7 }
 0xb66   :  { %v3862_v21 = vadd.f32 %v1061_v19, %v3600_v37 }
 0xb68   :  { %v1089_v26 = vsel %vm189_vm1, %v3862_v21, 0.0 }
 0xb69   :  { %1090 = vadd.xlane.f32.xlu0 %v1089_v26  ;;  %v1051_v34 = vpop.f32.mrf.mxu2 }
 0xb6a   :  { %v1055_v23 = vadd.f32 %v1051_v34, %v966_v22 }
 0xb6c   :  { %v1062_v41 = vadd.f32 %v3761_v15, %v1055_v23 }
 0xb6e   :  { %v3868_v17 = vadd.f32 %v1062_v41, %v3639_v31 }
 0xb70   :  { %v1092_v27 = vsel %vm189_vm1, %v3868_v17, 0.0 }
 0xb71   :  { %1093 = vadd.xlane.f32.xlu0 %v1092_v27 }
 0xb9e   :  { %v1359_v55 = vpop.f32.mrf.mxu1 }
 0xb9f   :  { %v3885_v53 = vadd.f32 %v3873_v25, %v1359_v55 }
 0xba1   :  { %v1383_v0 = vsel %vm1382_vm11, %v3885_v53, 0.0 }
 0xba6   :  { %v1361_v37 = vpop.f32.mrf.mxu1 }
 0xba7   :  { %v3876_v59 = vadd.f32 %v3873_v25, %v1361_v37 }
 0xba9   :  { %v1386_v11 = vsel %vm1382_vm11, %v3876_v59, 0.0 }
 0xbaa   :  { %1387 = vadd.xlane.f32.xlu2 %v1386_v11 }
 0xbdc   :  { %v1091_v15 = vpop.xlane.xlu0 %1090 }
 0xbdd   :  { %v1097_v31 = vmul.f32 %v1091_v15, %v3591_v24 }
 0xbdf   :  { %v1101_v28 = vsub.f32 %v3862_v21, %v1097_v31 }
 0xbe1   :  { %v1105_v29 = vmul.f32 %v1101_v28, %v1101_v28 }
 0xbe3   :  { %v1113_v30 = vsel %vm189_vm1, %v1105_v29, 0.0  ;;  %v3059_v29 = vld [vmem:[%s4314_s19 + $0x10] sm:$0xff] }
 0xbe4   :  { %1114 = vadd.xlane.f32.xlu1 %v1113_v30  ;;  %v1094_v1 = vpop.xlane.xlu0 %1093  ;;  %1523 = vmatpush.bf16.msra.mxu2 %v3059_v29  ;;  %v3058_v30 = vld [vmem:[%s4314_s19 + $0x8] sm:$0xff] }
 0xbe5   :  { %v1098_v40 = vmul.f32 %v1094_v1, %v3591_v24 }
 0xbe7   :  { %v1102_v8 = vsub.f32 %v3868_v17, %v1098_v40  ;;  %v3057_v40 = vld [vmem:[%s4314_s19] sm:$0xff] }
 0xbe8   :  { %1524 = vmatpush.bf16.msra.mxu2 %v3058_v30 }
 0xbe9   :  { %v1106_v33 = vmul.f32 %v1102_v8, %v1102_v8 }
 0xbeb   :  { %v1116_v35 = vsel %vm189_vm1, %v1106_v33, 0.0 }
 0xbec   :  { %1384 = vadd.xlane.f32.xlu1 %v1383_v0  ;;  %1117 = vadd.xlane.f32.xlu0 %v1116_v35 }
 0xbed   :  { %1525 = vmatpush.bf16.msra.mxu2 %v3057_v40 }
 0xc1d   :  { %v1388_v13 = vpop.xlane.xlu2 %1387 }
 0xc1e   :  { %v1403_v43 = vmul.f32 %v3891_v42, %v1388_v13 }
 0xc20   :  { %v3895_v44 = vsub.f32 %v3876_v59, %v1403_v43 }
 0xc22   :  { %v1411_v45 = vmul.f32 %v3895_v44, %v3895_v44 }
 0xc24   :  { %v1417_v46 = vsel %vm1382_vm11, %v1411_v45, 0.0  ;;  %v3920_v45 = vld [vmem:[%s4315_s24] ss:$0 sm:$0xff] }
 0xc25   :  { %1418 = vadd.xlane.f32.xlu1 %v1417_v46 }
 0xc57   :  { %v1115_v60 = vpop.xlane.xlu1 %1114 }
 0xc58   :  { %v1121_v47 = vmul.f32 %v1115_v60, %v3591_v24 }
 0xc5a   :  { %v1125_v48 = vadd.f32 1e-05, %v1121_v47 }
 0xc5c   :  { %3230 = vrsqrt.f32 %v1125_v48  ;;  %vm1153_vm14 = vweird.f32 %v1125_v48 }
 0xc5f   :  { %v1385_v49 = vpop.xlane.xlu1 %1384  ;;  %v1118_v50 = vpop.xlane.xlu0 %1117 }
 0xc60   :  { %v1402_v51 = vmul.f32 %v3891_v42, %v1385_v49  ;;  %v1122_v54 = vmul.f32 %v1118_v50, %v3591_v24 }
 0xc62   :  { %v3231_v56 = vpop.eup %3230  ;;  %v3904_v57 = vsub.f32 %v3885_v53, %v1402_v51  ;;  %v1126_v58 = vadd.f32 1e-05, %v1122_v54 }
 0xc63   :  { %v1148_v62 = vmul.f32 %v3231_v56, %v1125_v48  ;;  %vm1154_vm13 = vweird.f32 %v3231_v56  ;;  %v3924_v48 = vld [vmem:[%s4316_s30] ss:$0 sm:$0xff] }
 0xc64   :  { %3232 = vrsqrt.f32 %v1126_v58  ;;  %v1410_v63 = vmul.f32 %v3904_v57, %v3904_v57  ;;  %vm1155_vm15 = vmor %vm1153_vm14, %vm1154_vm13  ;;  %vm1163_vm4 = vweird.f32 %v1126_v58 }
 0xc65   :  { %v1149_v6 = vmul.f32 %v3231_v56, %v1148_v62 }
 0xc66   :  { %v1414_v9 = vsel %vm1382_vm11, %v1410_v63, 0.0 }
 0xc67   :  { %v1150_v12 = vmul.f32 0.5, %v1149_v6  ;;  %1415 = vadd.xlane.f32.xlu0 %v1414_v9 }
 0xc69   :  { %v1151_v14 = vsub.f32 1.5, %v1150_v12 }
 0xc6a   :  { %v3233_v16 = vpop.eup %3232 }
 0xc6b   :  { %v1152_v3 = vmul.f32 %v3231_v56, %v1151_v14  ;;  %v1158_v24 = vmul.f32 %v3233_v16, %v1126_v58  ;;  %vm1164_vm3 = vweird.f32 %v3233_v16 }
 0xc6c   :  { %vm1165_vm5 = vmor %vm1163_vm4, %vm1164_vm3 }
 0xc6d   :  { %v1159_v18 = vmul.f32 %v3233_v16, %v1158_v24  ;;  %v1156_v7 = vsel %vm1155_vm15, %v3231_v56, %v1152_v3 }
 0xc6e   :  { %v1169_v22 = vmul.f32 %v1156_v7, %v1101_v28 }
 0xc6f   :  { %v1160_v19 = vmul.f32 0.5, %v1159_v18 }
 0xc70   :  { %v1176_v41 = vmul.f32 %v3819_v61, %v1169_v22 }
 0xc71   :  { %v1161_v20 = vsub.f32 1.5, %v1160_v19 }
 0xc72   :  { %v1183_v55 = vadd.f32 %v3825_v5, %v1176_v41 }
 0xc73   :  { %v1162_v26 = vmul.f32 %v3233_v16, %v1161_v20 }
 0xc75   :  { %v1166_v34 = vsel %vm1165_vm5, %v3233_v16, %v1162_v26 }
 0xc76   :  { %v1170_v23 = vmul.f32 %v1166_v34, %v1102_v8 }
 0xc78   :  { %v1177_v27 = vmul.f32 %v3819_v61, %v1170_v23 }
 0xc7a   :  { %v1184_v37 = vadd.f32 %v3825_v5, %v1177_v27 }
 0xc7c   :  { %v1186_v11 = vpack.c.bf16 %v1184_v37, %v1183_v55 }
 0xc7e   :  { %2873 = vmatmul.msk.bf16.gmra.mxu0 %vm189_vm1, %v1186_v11 }
 0xc98   :  { %v1419_v15 = vpop.xlane.xlu1 %1418 }
 0xc99   :  { %v1427_v31 = vmul.f32 %v1419_v15, %v3891_v42 }
 0xc9b   :  { %v1431_v28 = vadd.f32 1e-05, %v1427_v31 }
 0xc9d   :  { %3234 = vrsqrt.f32 %v1431_v28  ;;  %vm1450_vm7 = vweird.f32 %v1431_v28 }
 0xca3   :  { %v3235_v1 = vpop.eup %3234 }
 0xca4   :  { %v1445_v8 = vmul.f32 %v3235_v1, %v1431_v28  ;;  %vm1451_vm6 = vweird.f32 %v3235_v1 }
 0xca5   :  { %vm1452_vm8 = vmor %vm1450_vm7, %vm1451_vm6 }
 0xca6   :  { %v1446_v61 = vmul.f32 %v3235_v1, %v1445_v8 }
 0xca8   :  { %v1447_v35 = vmul.f32 0.5, %v1446_v61 }
 0xcaa   :  { %v1448_v52 = vsub.f32 1.5, %v1447_v35 }
 0xcac   :  { %v1449_v4 = vmul.f32 %v3235_v1, %v1448_v52 }
 0xcae   :  { %v1453_v10 = vsel %vm1452_vm8, %v3235_v1, %v1449_v4 }
 0xcaf   :  { %v1475_v46 = vmul.f32 %v1453_v10, %v3895_v44 }
 0xcb1   :  { %v1482_v49 = vmul.f32 %v3920_v45, %v1475_v46 }
 0xcb3   :  { %v1489_v54 = vadd.f32 %v3924_v48, %v1482_v49 }
 0xcda   :  { %v1416_v33 = vpop.xlane.xlu0 %1415 }
 0xcdb   :  { %v1426_v5 = vmul.f32 %v1416_v33, %v3891_v42 }
 0xcdd   :  { %v1430_v0 = vadd.f32 1e-05, %v1426_v5 }
 0xcdf   :  { %3236 = vrsqrt.f32 %v1430_v0  ;;  %vm1440_vm13 = vweird.f32 %v1430_v0 }
 0xce5   :  { %v3237_v36 = vpop.eup %3236 }
 0xce6   :  { %v1435_v38 = vmul.f32 %v3237_v36, %v1430_v0  ;;  %vm1441_vm12 = vweird.f32 %v3237_v36 }
 0xce7   :  { %vm1442_vm14 = vmor %vm1440_vm13, %vm1441_vm12 }
 0xce8   :  { %v1436_v39 = vmul.f32 %v3237_v36, %v1435_v38 }
 0xcea   :  { %v1437_v13 = vmul.f32 0.5, %v1436_v39 }
 0xcec   :  { %v1438_v43 = vsub.f32 1.5, %v1437_v13 }
 0xcee   :  { %v1439_v60 = vmul.f32 %v3237_v36, %v1438_v43 }
 0xcf0   :  { %v1443_v47 = vsel %vm1442_vm14, %v3237_v36, %v1439_v60 }
 0xcf1   :  { %v1474_v50 = vmul.f32 %v1443_v47, %v3904_v57 }
 0xcf3   :  { %v1481_v51 = vmul.f32 %v3920_v45, %v1474_v50 }
 0xcf5   :  { %v1488_v56 = vadd.f32 %v3924_v48, %v1481_v51 }
 0xcf7   :  { %v1492_v58 = vpack.c.bf16 %v1489_v54, %v1488_v56 }
 0xcf9   :  { %2914 = vmatmul.msk.bf16.vlgmr.msra.gmra.mxu2 %vm1382_vm11, %v1492_v58 }
 0xcfb   :  { %v1222_v44 = vpop.f32.mrf.mxu0 }
 0xcfc   :  { %v1223_v62 = vadd.f32 %v3841_v32, %v1222_v44 }
 0xcfe   :  { %v1233_v63 = vmul.f32 %v1223_v62, %v1223_v62  ;;  %v1229_v34 = vmul.f32 0.5, %v1223_v62 }
 0xd00   :  { %v1237_v6 = vmul.f32 %v1233_v63, %v1223_v62 }
 0xd02   :  { %v1241_v9 = vmul.f32 0.044715, %v1237_v6 }
 0xd03   :  { %v1224_v12 = vpop.f32.mrf.mxu0 }
 0xd04   :  { %v1245_v14 = vadd.f32 %v1241_v9, %v1223_v62  ;;  %v1225_v16 = vadd.f32 %v3841_v32, %v1224_v12 }
 0xd06   :  { %v1234_v57 = vmul.f32 %v1225_v16, %v1225_v16  ;;  %v1249_v3 = vmul.f32 0.7978846, %v1245_v14  ;;  %v1230_v23 = vmul.f32 0.5, %v1225_v16 }
 0xd08   :  { %v1238_v24 = vmul.f32 %v1234_v57, %v1225_v16  ;;  %3238 = vtanh.f32 %v1249_v3 }
 0xd0a   :  { %v1242_v18 = vmul.f32 0.044715, %v1238_v24 }
 0xd0c   :  { %v1246_v7 = vadd.f32 %v1242_v18, %v1225_v16 }
 0xd0e   :  { %v1250_v19 = vmul.f32 0.7978846, %v1246_v7  ;;  %v3239_v20 = vpop.eup %3238 }
 0xd0f   :  { %v1257_v22 = vadd.f32 1.0, %v3239_v20 }
 0xd10   :  { %3240 = vtanh.f32 %v1250_v19 }
 0xd11   :  { %v1261_v27 = vmul.f32 %v1257_v22, %v1229_v34 }
 0xd16   :  { %v3241_v26 = vpop.eup %3240 }
 0xd17   :  { %v1258_v41 = vadd.f32 1.0, %v3241_v26 }
 0xd19   :  { %v1262_v55 = vmul.f32 %v1258_v41, %v1230_v23 }
 0xd1b   :  { %v1264_v37 = vpack.c.bf16 %v1262_v55, %v1261_v27 }
 0xd1d   :  { %2891 = vmatmul.msk.bf16.gmra.mxu3 %vm1292_vm10, %v1264_v37 }
 0xd7c   :  { %v1527_v32 = vpop.f32.mrf.mxu2 }
 0xd84   :  { %v1529_v11 = vpop.f32.mrf.mxu2 }
 0xd85   :  { %v3935_v15 = vpack.c.bf16 %v1529_v11, %v1527_v32 }
 0xd87   :  { %1607 = vrot.lane.b32.xlu1 %v3935_v15, %s3393_s9  ;;  %1609 = vrot.lane.b32.xlu0 %v3935_v15, %s3395_s17 }
 0xd8f   :  { %1539 = vrot.lane.b32.xlu1 %v3935_v15, %s3391_s0  ;;  %1719 = vrot.lane.b32.xlu0 %v3935_v15, %s3394_s13 }
 0xd97   :  { %1717 = vrot.lane.b32.xlu0 %v3935_v15, %s3396_s21 }
 0xda0   :  { %v1313_v31 = vpop.f32.mrf.mxu3 }
 0xda1   :  { %v1314_v28 = vadd.f32 %v3851_v2, %v1313_v31 }
 0xda3   :  { %v1320_v1 = vadd.f32 %v1314_v28, %v3862_v21 }
 0xda8   :  { %v1315_v29 = vpop.f32.mrf.mxu3 }
 0xda9   :  { %v1316_v30 = vadd.f32 %v3851_v2, %v1315_v29 }
 0xdab   :  { %v1321_v40 = vadd.f32 %v1316_v30, %v3868_v17 }
 0xdad   :  { %v1328_v8 = vpack.c.bf16 %v1321_v40, %v1320_v1 }
 0xdaf   :  { %2901 = vmatmul.msk.bf16.gmra.mxu1 %vm189_vm1, %v1328_v8 }
 0xdf9   :  { %v1608_v61 = vpop.permute.xlu1 %1607  ;;  %v1610_v33 = vpop.permute.xlu0 %1609 }
 0xdfa   :  { %v1615_v5 = vsel %vm342_vm9, %v1610_v33, 0 }
 0xdfb   :  { %1624 = vmatpush.bf16.xpose.msrb.mxu1 %v1615_v5 }
 0xe01   :  { %v1540_v0 = vpop.permute.xlu1 %1539  ;;  %v1720_v35 = vpop.permute.xlu0 %1719 }
 0xe02   :  { %v1545_v52 = vsel %vm342_vm9, %v1540_v0, 0  ;;  %v1725_v36 = vsel %vm342_vm9, %v1720_v35, 0  ;;  %2918 = vmatmul.msk.bf16.vlgmr.msrb.gmra.mxu1 %vm342_vm9, %v1608_v61 }
 0xe03   :  { %1554 = vmatpush.bf16.xpose.msrb.mxu0 %v1545_v52  ;;  %1734 = vmatpush.bf16.xpose.msra.mxu1 %v1725_v36 }
 0xe09   :  { %v1718_v2 = vpop.permute.xlu0 %1717 }
 0xe0a   :  { %2916 = vmatmul.msk.bf16.vlgmr.msrb.gmra.mxu0 %vm342_vm9, %v3935_v15 }
 0xe12   :  { %2922 = vmatmul.msk.bf16.vlgmr.msra.gmra.mxu1 %vm342_vm9, %v1718_v2 }
 0xe2c   :  { %v1364_v21 = vpop.f32.mrf.mxu1 }
 0xe2d   :  { %v3960_v17 = vadd.f32 %v3873_v25, %v1364_v21 }
 0xe2f   :  { %v1389_v4 = vsel %vm1382_vm11, %v3960_v17, 0.0 }
 0xe30   :  { %1390 = vadd.xlane.f32.xlu2 %v1389_v4 }
 0xe34   :  { %v1366_v38 = vpop.f32.mrf.mxu1 }
 0xe35   :  { %v3965_v39 = vadd.f32 %v3873_v25, %v1366_v38 }
 0xe37   :  { %v1392_v10 = vsel %vm1382_vm11, %v3965_v39, 0.0 }
 0xe38   :  { %1393 = vadd.xlane.f32.xlu0 %v1392_v10 }
 0xe7f   :  { %v1626_v13 = vpop.f32.mrf.mxu1 }
 0xe80   :  { %v1631_v43 = vmul.f32 0.35355338, %v1626_v13 }
 0xe82   :  { %v1633_v46 = vsel %vm148_vm0, %v1631_v43, -inf }
 0xe83   :  { %1634 = vmax.xlane.f32.xlu1 %v1633_v46 }
 0xe87   :  { %v1628_v60 = vpop.f32.mrf.mxu1  ;;  %v1556_v40 = vpop.f32.mrf.mxu0 }
 0xe88   :  { %v1632_v47 = vmul.f32 0.35355338, %v1628_v60  ;;  %v4005_v61 = vmul.f32 0.35355338, %v1556_v40 }
 0xe8a   :  { %v1636_v49 = vsel %vm148_vm0, %v1632_v47, -inf  ;;  %v1563_v35 = vsel %vm148_vm0, %v4005_v61, -inf }
 0xe8b   :  { %1637 = vmax.xlane.f32.xlu2 %v1636_v49 }
 0xe8f   :  { %v1736_v50 = vpop.f32.mrf.mxu1  ;;  %v1558_v52 = vpop.f32.mrf.mxu0 }
 0xe90   :  { %v1741_v51 = vmul.f32 0.35355338, %v1736_v50  ;;  %v4010_v36 = vmul.f32 0.35355338, %v1558_v52  ;;  %v1379_v52 = vld [vmem:[%s4317_s6 + $0x8] sm:$0xf] }
 0xe92   :  { %v1743_v54 = vsel %vm148_vm0, %v1741_v51, -inf  ;;  %v1566_v13 = vsel %vm148_vm0, %v4010_v36, -inf }
 0xe93   :  { %1744 = vmax.xlane.f32.xlu2 %v1743_v54 }
 0xe97   :  { %v1738_v25 = vpop.f32.mrf.mxu1 }
 0xe98   :  { %v1742_v56 = vmul.f32 0.35355338, %v1738_v25 }
 0xe9a   :  { %v1746_v58 = vsel %vm148_vm0, %v1742_v56, -inf }
 0xe9b   :  { %1747 = vmax.xlane.f32.xlu2 %v1746_v58 }
 0xe9c   :  { %1656 = vrot.lane.b32.xlu1 %v3935_v15, %s3397_s25 }
 0xea3   :  { %v1391_v44 = vpop.xlane.xlu2 %1390 }
 0xea4   :  { %v1404_v62 = vmul.f32 %v3891_v42, %v1391_v44 }
 0xea6   :  { %v3977_v63 = vsub.f32 %v3960_v17, %v1404_v62 }
 0xea8   :  { %v1412_v6 = vmul.f32 %v3977_v63, %v3977_v63 }
 0xeaa   :  { %v1420_v9 = vsel %vm1382_vm11, %v1412_v6, 0.0 }
 0xeab   :  { %1421 = vadd.xlane.f32.xlu2 %v1420_v9  ;;  %v1394_v12 = vpop.xlane.xlu0 %1393 }
 0xeac   :  { %v1405_v14 = vmul.f32 %v3891_v42, %v1394_v12 }
 0xeae   :  { %v3984_v16 = vsub.f32 %v3965_v39, %v1405_v14 }
 0xeb0   :  { %v1413_v57 = vmul.f32 %v3984_v16, %v3984_v16 }
 0xeb2   :  { %v1423_v3 = vsel %vm1382_vm11, %v1413_v57, 0.0 }
 0xeb3   :  { %1424 = vadd.xlane.f32.xlu2 %v1423_v3 }
 0xef6   :  { %v1635_v24 = vpop.xlane.xlu1 %1634 }
 0xef7   :  { %v1639_v18 = vsub.f32 %v1631_v43, %v1635_v24 }
 0xef9   :  { %v1641_v7 = vmul.f32 1.442695, %v1639_v18 }
 0xefb   :  { %3242 = vpow2.f32 %v1641_v7 }
 0xefe   :  { %v1638_v19 = vpop.xlane.xlu2 %1637 }
 0xeff   :  { %v1640_v20 = vsub.f32 %v1632_v47, %v1638_v19 }
 0xf01   :  { %v3989_v22 = vpop.eup %3242  ;;  %v1643_v26 = vmul.f32 1.442695, %v1640_v20 }
 0xf02   :  { %v1645_v34 = vsel %vm148_vm0, %v3989_v22, 0.0 }
 0xf03   :  { %3244 = vpow2.f32 %v1643_v26  ;;  %1646 = vadd.xlane.f32.xlu0 %v1645_v34 }
 0xf06   :  { %v1745_v23 = vpop.xlane.xlu2 %1744 }
 0xf07   :  { %v1749_v41 = vsub.f32 %v1741_v51, %v1745_v23 }
 0xf09   :  { %v3993_v27 = vpop.eup %3244  ;;  %v1751_v55 = vmul.f32 1.442695, %v1749_v41 }
 0xf0a   :  { %v1648_v37 = vsel %vm148_vm0, %v3993_v27, 0.0 }
 0xf0b   :  { %3246 = vpow2.f32 %v1751_v55  ;;  %1649 = vadd.xlane.f32.xlu2 %v1648_v37 }
 0xf0e   :  { %v1657_v32 = vpop.permute.xlu1 %1656  ;;  %v1748_v11 = vpop.xlane.xlu2 %1747 }
 0xf0f   :  { %v1750_v31 = vsub.f32 %v1742_v56, %v1748_v11  ;;  %1669 = vmatpush.bf16.msrb.mxu2 %v1657_v32 }
 0xf11   :  { %v3997_v28 = vpop.eup %3246  ;;  %v1753_v29 = vmul.f32 1.442695, %v1750_v31 }
 0xf12   :  { %v1755_v30 = vsel %vm148_vm0, %v3997_v28, 0.0 }
 0xf13   :  { %3248 = vpow2.f32 %v1753_v29  ;;  %1756 = vadd.xlane.f32.xlu0 %v1755_v30 }
 0xf19   :  { %v4001_v1 = vpop.eup %3248 }
 0xf1a   :  { %v1758_v8 = vsel %vm148_vm0, %v4001_v1, 0.0 }
 0xf1b   :  { %1759 = vadd.xlane.f32.xlu2 %v1758_v8 }
 0xf1e   :  { %v1422_v33 = vpop.xlane.xlu2 %1421 }
 0xf1f   :  { %v1428_v5 = vmul.f32 %v1422_v33, %v3891_v42 }
 0xf21   :  { %v1432_v0 = vadd.f32 1e-05, %v1428_v5 }
 0xf23   :  { %3250 = vrsqrt.f32 %v1432_v0  ;;  %1564 = vmax.xlane.f32.xlu2 %v1563_v35  ;;  %vm1460_vm15 = vweird.f32 %v1432_v0 }
 0xf26   :  { %v1425_v2 = vpop.xlane.xlu2 %1424 }
 0xf27   :  { %v1429_v21 = vmul.f32 %v1425_v2, %v3891_v42  ;;  %1766 = vrot.lane.b32.xlu0 %v3935_v15, %s3399_s15  ;;  %v1377_v2 = vld [vmem:[%s4317_s6] sm:$0xf] }
 0xf29   :  { %v3251_v4 = vpop.eup %3250  ;;  %v1433_v38 = vadd.f32 1e-05, %v1429_v21  ;;  %v4050_v21 = vsel %vm482_vm2, %v1377_v2, 0 }
 0xf2a   :  { %v1455_v10 = vmul.f32 %v3251_v4, %v1432_v0  ;;  %vm1461_vm1 = vweird.f32 %v3251_v4  ;;  %v1378_v0 = vld [vmem:[%s4317_s6 + $0x4] sm:$0xf] }
 0xf2b   :  { %3252 = vrsqrt.f32 %v1433_v38  ;;  %1567 = vmax.xlane.f32.xlu2 %v1566_v13  ;;  %vm1462_vm3 = vmor %vm1460_vm15, %vm1461_vm1  ;;  %vm1470_vm5 = vweird.f32 %v1433_v38  ;;  %v1681_v35 = vsel %vm482_vm2, %v1378_v0, 0 }
 0xf2c   :  { %v1456_v43 = vmul.f32 %v3251_v4, %v1455_v10  ;;  %1690 = vmatpush.bf16.msra.mxu0 %v1681_v35 }
 0xf2e   :  { %v1457_v46 = vmul.f32 0.5, %v1456_v43 }
 0xf2f   :  { %1586 = vrot.lane.b32.xlu0 %v3935_v15, %s3392_s5 }
 0xf30   :  { %v1458_v60 = vsub.f32 1.5, %v1457_v46 }
 0xf31   :  { %v3253_v47 = vpop.eup %3252 }
 0xf32   :  { %v1459_v49 = vmul.f32 %v3251_v4, %v1458_v60  ;;  %v1465_v50 = vmul.f32 %v3253_v47, %v1433_v38  ;;  %vm1471_vm4 = vweird.f32 %v3253_v47 }
 0xf33   :  { %vm1472_vm6 = vmor %vm1470_vm5, %vm1471_vm4 }
 0xf34   :  { %v1466_v51 = vmul.f32 %v3253_v47, %v1465_v50  ;;  %v1463_v54 = vsel %vm1462_vm3, %v3251_v4, %v1459_v49 }
 0xf35   :  { %v1476_v58 = vmul.f32 %v1463_v54, %v3977_v63 }
 0xf36   :  { %v1467_v25 = vmul.f32 0.5, %v1466_v51 }
 0xf37   :  { %1811 = vrot.lane.b32.xlu0 %v3935_v15, %s3400_s16  ;;  %v1483_v9 = vmul.f32 %v3920_v45, %v1476_v58 }
 0xf38   :  { %v1468_v56 = vsub.f32 1.5, %v1467_v25 }
 0xf39   :  { %v1490_v14 = vadd.f32 %v3924_v48, %v1483_v9 }
 0xf3a   :  { %v1469_v44 = vmul.f32 %v3253_v47, %v1468_v56 }
 0xf3c   :  { %v1473_v62 = vsel %vm1472_vm6, %v3253_v47, %v1469_v44 }
 0xf3d   :  { %v1477_v6 = vmul.f32 %v1473_v62, %v3984_v16 }
 0xf3f   :  { %1809 = vrot.lane.b32.xlu0 %v3935_v15, %s3398_s29  ;;  %v1484_v12 = vmul.f32 %v3920_v45, %v1477_v6 }
 0xf41   :  { %v1491_v57 = vadd.f32 %v3924_v48, %v1484_v12 }
 0xf43   :  { %v1493_v3 = vpack.c.bf16 %v1491_v57, %v1490_v14 }
 0xf45   :  { %2915 = vmatmul.msk.bf16.gmra.mxu2 %vm1382_vm11, %v1493_v3 }
 0xf76   :  { %v1647_v63 = vpop.xlane.xlu0 %1646 }
 0xf77   :  { %3254 = vrcp.f32 %v1647_v63 }
 0xf7d   :  { %v3255_v18 = vpop.eup %3254 }
 0xf7e   :  { %v1650_v24 = vpop.xlane.xlu2 %1649  ;;  %v1653_v7 = vmul.f32 %v3255_v18, %v3989_v22 }
 0xf7f   :  { %3256 = vrcp.f32 %v1650_v24 }
 0xf85   :  { %v3257_v16 = vpop.eup %3256 }
 0xf86   :  { %v1654_v19 = vmul.f32 %v3257_v16, %v3993_v27  ;;  %v1757_v45 = vpop.xlane.xlu0 %1756 }
 0xf88   :  { %v1655_v20 = vpack.c.bf16 %v1654_v19, %v1653_v7 }
 0xf8a   :  { %2919 = vmatmul.msk.bf16.vlgmr.msrb.gmra.mxu2 %vm148_vm0, %v1655_v20 }
 0xf8e   :  { %v1760_v26 = vpop.xlane.xlu2 %1759 }
 0xf8f   :  { %3258 = vrcp.f32 %v1760_v26 }
 0xf90   :  { %3260 = vrcp.f32 %v1757_v45 }
 0xf95   :  { %v3259_v48 = vpop.eup %3258 }
 0xf96   :  { %v3261_v34 = vpop.eup %3260  ;;  %v1565_v23 = vpop.xlane.xlu2 %1564  ;;  %v1764_v41 = vmul.f32 %v3259_v48, %v4001_v1 }
 0xf97   :  { %v1569_v55 = vsub.f32 %v4005_v61, %v1565_v23  ;;  %v1763_v37 = vmul.f32 %v3261_v34, %v3997_v28 }
 0xf99   :  { %v1571_v32 = vmul.f32 1.442695, %v1569_v55  ;;  %v1767_v22 = vpop.permute.xlu0 %1766  ;;  %v1765_v27 = vpack.c.bf16 %v1764_v41, %v1763_v37 }
 0xf9a   :  { %1779 = vmatpush.bf16.msra.mxu2 %v1767_v22 }
 0xf9b   :  { %3262 = vpow2.f32 %v1571_v32 }
 0xf9d   :  { %2923 = vmatmul.msk.bf16.vlgmr.msra.gmra.mxu2 %vm148_vm0, %v1765_v27 }
 0xf9e   :  { %v1568_v11 = vpop.xlane.xlu2 %1567 }
 0xf9f   :  { %v1570_v31 = vsub.f32 %v4010_v36, %v1568_v11  ;;  %v1791_v36 = vsel %vm482_vm2, %v1379_v52, 0 }
 0xfa0   :  { %1800 = vmatpush.bf16.msrb.mxu0 %v1791_v36 }
 0xfa1   :  { %v3263_v29 = vpop.eup %3262  ;;  %v1573_v30 = vmul.f32 1.442695, %v1570_v31  ;;  %v1587_v40 = vpop.permute.xlu0 %1586 }
 0xfa2   :  { %1599 = vmatpush.bf16.msra.mxu3 %v1587_v40  ;;  %v1575_v1 = vsel %vm148_vm0, %v3263_v29, 0.0 }
 0xfa3   :  { %3264 = vpow2.f32 %v1573_v30  ;;  %1576 = vadd.xlane.f32.xlu1 %v1575_v1 }
 0xfa6   :  { %1710 = vmatpush.bf16.msrb.mxu3 %v4050_v21 }
 0xfa9   :  { %v3265_v28 = vpop.eup %3264  ;;  %v1812_v51 = vpop.permute.xlu0 %1811 }
 0xfaa   :  { %v1578_v8 = vsel %vm148_vm0, %v3265_v28, 0.0  ;;  %v1817_v58 = vsel %vm342_vm9, %v1812_v51, 0 }
 0xfab   :  { %1579 = vadd.xlane.f32.xlu2 %v1578_v8 }
 0xfb1   :  { %v1810_v45 = vpop.permute.xlu0 %1809 }
 0xfc8   :  { %v1532_v61 = vpop.f32.mrf.mxu2 }
 0xfd0   :  { %v1534_v33 = vpop.f32.mrf.mxu2 }
 0xfd1   :  { %v4040_v5 = vpack.c.bf16 %v1534_v33, %v1532_v61 }
 0xfd3   :  { %1903 = vrot.lane.b32.xlu2 %v4040_v5, %s3391_s0 }
0x100d   :  { %v1671_v4 = vpop.f32.mrf.mxu2 }
0x1015   :  { %v1673_v38 = vpop.f32.mrf.mxu2 }
0x1016   :  { %v1676_v10 = vpack.c.bf16 %v1673_v38, %v1671_v4  ;;  %v1577_v13 = vpop.xlane.xlu1 %1576 }
0x1017   :  { %3266 = vrcp.f32 %v1577_v13 }
0x1018   :  { %2920 = vmatmul.msk.bf16.vlgmr.msra.gmra.mxu0 %vm342_vm9, %v1676_v10 }
0x101d   :  { %v3267_v60 = vpop.eup %3266 }
0x101e   :  { %v1580_v43 = vpop.xlane.xlu2 %1579  ;;  %v1583_v49 = vmul.f32 %v3267_v60, %v3263_v29 }
0x101f   :  { %3268 = vrcp.f32 %v1580_v43 }
0x1020   :  { %v1781_v46 = vpop.f32.mrf.mxu2 }
0x1025   :  { %v3269_v47 = vpop.eup %3268 }
0x1026   :  { %v1584_v50 = vmul.f32 %v3269_v47, %v3265_v28 }
0x1028   :  { %v1585_v54 = vpack.c.bf16 %v1584_v50, %v1583_v49  ;;  %v1783_v25 = vpop.f32.mrf.mxu2 }
0x1029   :  { %v1786_v56 = vpack.c.bf16 %v1783_v25, %v1781_v46 }
0x102a   :  { %2917 = vmatmul.msk.bf16.vlgmr.msra.gmra.mxu3 %vm148_vm0, %v1585_v54 }
0x102b   :  { %1826 = vmatpush.bf16.xpose.msra.mxu3 %v1817_v58  ;;  %2924 = vmatmul.msk.bf16.vlgmr.msrb.gmra.mxu0 %vm342_vm9, %v1786_v56 }
0x102d   :  { %v1904_v44 = vpop.permute.xlu2 %1903 }
0x102e   :  { %v1909_v62 = vsel %vm342_vm9, %v1904_v44, 0 }
0x102f   :  { %1918 = vmatpush.bf16.xpose.msra.mxu0 %v1909_v62 }
0x1037   :  { %2051 = vmatpush.bf16.msrb.mxu0 %v1681_v35 }
0x103b   :  { %2928 = vmatmul.msk.bf16.vlgmr.msra.gmra.mxu0 %vm342_vm9, %v4040_v5 }
0x103c   :  { %2155 = vmatpush.bf16.msra.mxu0 %v1791_v36 }
0x1095   :  { %v4060_v6 = vpop.f32.mrf.mxu0 }
0x109d   :  { %v4062_v9 = vpop.f32.mrf.mxu0 }
0x10a8   :  { %v4064_v12 = vpop.f32.mrf.mxu0 }
0x10ad   :  { %v1601_v14 = vpop.f32.mrf.mxu3 }
0x10b0   :  { %v4066_v57 = vpop.f32.mrf.mxu0 }
0x10b5   :  { %v1603_v3 = vpop.f32.mrf.mxu3 }
0x10b6   :  { %v1606_v63 = vpack.c.bf16 %v1603_v3, %v1601_v14 }
0x10b8   :  { %2921 = vmatmul.msk.bf16.vlgmr.msrb.gmra.mxu3 %vm342_vm9, %v1606_v63  ;;  %v1920_v24 = vpop.f32.mrf.mxu0 }
0x10b9   :  { %v1925_v18 = vmul.f32 0.35355338, %v1920_v24 }
0x10bb   :  { %v1927_v16 = vsel %vm148_vm0, %v1925_v18, -inf }
0x10bc   :  { %1928 = vmax.xlane.f32.xlu0 %v1927_v16 }
0x10c0   :  { %v1922_v7 = vpop.f32.mrf.mxu0 }
0x10c1   :  { %v1926_v19 = vmul.f32 0.35355338, %v1922_v7 }
0x10c3   :  { %v1930_v20 = vsel %vm148_vm0, %v1926_v19, -inf }
0x10c4   :  { %1931 = vmax.xlane.f32.xlu2 %v1930_v20 }
0x10c8   :  { %2925 = vmatmul.msk.bf16.vlgmr.msra.gmra.mxu3 %vm342_vm9, %v1810_v45 }
0x112f   :  { %v1929_v26 = vpop.xlane.xlu0 %1928 }
0x1130   :  { %v1933_v48 = vsub.f32 %v1925_v18, %v1929_v26 }
0x1132   :  { %v1935_v34 = vmul.f32 1.442695, %v1933_v48 }
0x1134   :  { %3270 = vpow2.f32 %v1935_v34  ;;  %v1380_v34 = vld [vmem:[%s4317_s6 + $0xc] sm:$0xf] }
0x1137   :  { %v1932_v23 = vpop.xlane.xlu2 %1931 }
0x1138   :  { %v1934_v41 = vsub.f32 %v1926_v19, %v1932_v23  ;;  %v4110_v23 = vsel %vm482_vm2, %v1380_v34, 0 }
0x1139   :  { %1892 = vmatpush.bf16.msrb.mxu2 %v4110_v23 }
0x113a   :  { %v3271_v55 = vpop.eup %3270  ;;  %v1937_v37 = vmul.f32 1.442695, %v1934_v41 }
0x113b   :  { %v4072_v32 = vpop.f32.mrf.mxu3  ;;  %v1939_v22 = vsel %vm148_vm0, %v3271_v55, 0.0 }
0x113c   :  { %3272 = vpow2.f32 %v1937_v37  ;;  %1940 = vadd.xlane.f32.xlu1 %v1939_v22 }
0x1142   :  { %v3273_v27 = vpop.eup %3272 }
0x1143   :  { %v4075_v11 = vpop.f32.mrf.mxu3  ;;  %v1942_v31 = vsel %vm148_vm0, %v3273_v27, 0.0 }
0x1144   :  { %1943 = vadd.xlane.f32.xlu1 %v1942_v31 }
0x114b   :  { %v1828_v29 = vpop.f32.mrf.mxu3 }
0x114c   :  { %v1833_v30 = vmul.f32 0.35355338, %v1828_v29 }
0x114e   :  { %v1835_v40 = vsel %vm148_vm0, %v1833_v30, -inf }
0x114f   :  { %1836 = vmax.xlane.f32.xlu0 %v1835_v40 }
0x1153   :  { %v1830_v1 = vpop.f32.mrf.mxu3 }
0x1154   :  { %v1834_v28 = vmul.f32 0.35355338, %v1830_v1 }
0x1156   :  { %v1838_v8 = vsel %vm148_vm0, %v1834_v28, -inf }
0x1157   :  { %1839 = vmax.xlane.f32.xlu2 %v1838_v8 }
0x115d   :  { %1950 = vrot.lane.b32.xlu1 %v4040_v5, %s3392_s5 }
0x116f   :  { %1858 = vrot.lane.b32.xlu2 %v3935_v15, %s3401_s18 }
0x1177   :  { %1971 = vrot.lane.b32.xlu2 %v4040_v5, %s3393_s9 }
0x117f   :  { %2077 = vrot.lane.b32.xlu2 %v4040_v5, %s3394_s13 }
0x11af   :  { %v1941_v61 = vpop.xlane.xlu1 %1940 }
0x11b7   :  { %v1944_v33 = vpop.xlane.xlu1 %1943 }
0x11b8   :  { %3274 = vrcp.f32 %v1944_v33 }
0x11b9   :  { %3276 = vrcp.f32 %v1941_v61 }
0x11be   :  { %v3275_v36 = vpop.eup %3274 }
0x11bf   :  { %v3277_v38 = vpop.eup %3276  ;;  %v1948_v15 = vmul.f32 %v3275_v36, %v3273_v27 }
0x11c0   :  { %v1947_v46 = vmul.f32 %v3277_v38, %v3271_v55 }
0x11c2   :  { %v1837_v0 = vpop.xlane.xlu0 %1836  ;;  %v1949_v47 = vpack.c.bf16 %v1948_v15, %v1947_v46 }
0x11c3   :  { %v1841_v35 = vsub.f32 %v1833_v30, %v1837_v0 }
0x11c5   :  { %v1843_v52 = vmul.f32 1.442695, %v1841_v35 }
0x11c7   :  { %3278 = vpow2.f32 %v1843_v52 }
0x11ca   :  { %v1840_v2 = vpop.xlane.xlu2 %1839 }
0x11cb   :  { %v1842_v4 = vsub.f32 %v1834_v28, %v1840_v2 }
0x11cd   :  { %v3279_v10 = vpop.eup %3278  ;;  %v1845_v13 = vmul.f32 1.442695, %v1842_v4 }
0x11ce   :  { %v1847_v43 = vsel %vm148_vm0, %v3279_v10, 0.0 }
0x11cf   :  { %3280 = vpow2.f32 %v1845_v13  ;;  %v1951_v60 = vpop.permute.xlu1 %1950  ;;  %1848 = vadd.xlane.f32.xlu1 %v1847_v43 }
0x11d0   :  { %1963 = vmatpush.bf16.msrb.mxu3 %v1951_v60 }
0x11d2   :  { %v1859_v49 = vpop.permute.xlu2 %1858 }
0x11d3   :  { %1871 = vmatpush.bf16.msrb.mxu1 %v1859_v49  ;;  %2929 = vmatmul.msk.bf16.vlgmr.msrb.gmra.mxu3 %vm148_vm0, %v1949_v47 }
0x11d4   :  { %2068 = vmatpush.bf16.msra.mxu3 %v4050_v21 }
0x11d5   :  { %v3281_v50 = vpop.eup %3280 }
0x11d6   :  { %v1850_v51 = vsel %vm148_vm0, %v3281_v50, 0.0 }
0x11d7   :  { %1851 = vadd.xlane.f32.xlu0 %v1850_v51 }
0x11da   :  { %v1972_v58 = vpop.permute.xlu2 %1971 }
0x11e2   :  { %v2078_v63 = vpop.permute.xlu2 %2077 }
0x11e3   :  { %v2083_v7 = vsel %vm342_vm9, %v2078_v63, 0 }
0x11e8   :  { %2075 = vrot.lane.b32.xlu1 %v4040_v5, %s3396_s21 }
0x11eb   :  { %1973 = vrot.lane.b32.xlu0 %v4040_v5, %s3395_s17 }
0x11f3   :  { %2166 = vrot.lane.b32.xlu0 %v4040_v5, %s3400_s16 }
0x11fb   :  { %2164 = vrot.lane.b32.xlu0 %v4040_v5, %s3398_s29 }
0x1242   :  { %v1849_v21 = vpop.xlane.xlu1 %1848 }
0x1243   :  { %3282 = vrcp.f32 %v1849_v21 }
0x1249   :  { %v3283_v25 = vpop.eup %3282 }
0x124a   :  { %v1852_v54 = vpop.xlane.xlu0 %1851  ;;  %v1855_v44 = vmul.f32 %v3283_v25, %v3279_v10 }
0x124b   :  { %3284 = vrcp.f32 %v1852_v54 }
0x1251   :  { %v3285_v56 = vpop.eup %3284 }
0x1252   :  { %v1856_v62 = vmul.f32 %v3285_v56, %v3281_v50 }
0x1254   :  { %v1857_v14 = vpack.c.bf16 %v1856_v62, %v1855_v44 }
0x1256   :  { %2926 = vmatmul.msk.bf16.vlgmr.msrb.gmra.mxu1 %vm148_vm0, %v1857_v14  ;;  %v1965_v3 = vpop.f32.mrf.mxu3 }
0x125a   :  { %v2076_v48 = vpop.permute.xlu1 %2075 }
0x125d   :  { %v1974_v24 = vpop.permute.xlu0 %1973 }
0x125e   :  { %v1979_v18 = vsel %vm342_vm9, %v1974_v24, 0  ;;  %v1967_v16 = vpop.f32.mrf.mxu3 }
0x125f   :  { %v1970_v19 = vpack.c.bf16 %v1967_v16, %v1965_v3  ;;  %1988 = vmatpush.bf16.xpose.msra.mxu1 %v1979_v18 }
0x1261   :  { %2933 = vmatmul.msk.bf16.vlgmr.msra.gmra.mxu3 %vm342_vm9, %v1970_v19 }
0x1265   :  { %v2167_v20 = vpop.permute.xlu0 %2166 }
0x1266   :  { %v2172_v45 = vsel %vm342_vm9, %v2167_v20, 0  ;;  %2930 = vmatmul.msk.bf16.vlgmr.msra.gmra.mxu1 %vm342_vm9, %v1972_v58 }
0x1267   :  { %2092 = vmatpush.bf16.xpose.msrb.mxu1 %v2083_v7  ;;  %2181 = vmatpush.bf16.xpose.msrb.mxu3 %v2172_v45  ;;  %v1713_v45 = vadd.f32 %v4072_v32, %v4060_v6 }
0x126d   :  { %v2165_v26 = vpop.permute.xlu0 %2164 }
0x1271   :  { %2937 = vmatmul.msk.bf16.vlgmr.msrb.gmra.mxu3 %vm342_vm9, %v2165_v26 }
0x1276   :  { %2934 = vmatmul.msk.bf16.vlgmr.msrb.gmra.mxu1 %vm342_vm9, %v2076_v48 }
0x12d3   :  { %v1873_v41 = vpop.f32.mrf.mxu1 }
0x12db   :  { %v1875_v55 = vpop.f32.mrf.mxu1 }
0x12dc   :  { %v1878_v37 = vpack.c.bf16 %v1875_v55, %v1873_v41 }
0x12de   :  { %2927 = vmatmul.msk.bf16.vlgmr.msrb.gmra.mxu2 %vm342_vm9, %v1878_v37  ;;  %v1807_v37 = vadd.f32 %v4064_v12, %v1713_v45  ;;  %v1715_v12 = vadd.f32 %v4075_v11, %v4062_v9 }
0x12e3   :  { %v1990_v22 = vpop.f32.mrf.mxu1 }
0x12e4   :  { %v1995_v27 = vmul.f32 0.35355338, %v1990_v22  ;;  %v4114_v31 = vpop.f32.mrf.mxu3 }
0x12e6   :  { %v1997_v29 = vsel %vm148_vm0, %v1995_v27, -inf }
0x12e7   :  { %1998 = vmax.xlane.f32.xlu2 %v1997_v29 }
0x12eb   :  { %v1992_v30 = vpop.f32.mrf.mxu1 }
0x12ec   :  { %v1996_v40 = vmul.f32 0.35355338, %v1992_v30  ;;  %v4117_v1 = vpop.f32.mrf.mxu3 }
0x12ee   :  { %v2000_v28 = vsel %vm148_vm0, %v1996_v40, -inf }
0x12ef   :  { %2001 = vmax.xlane.f32.xlu0 %v2000_v28 }
0x12f3   :  { %v2094_v8 = vpop.f32.mrf.mxu1 }
0x12f4   :  { %v2099_v61 = vmul.f32 0.35355338, %v2094_v8  ;;  %v2183_v33 = vpop.f32.mrf.mxu3  ;;  %v1808_v8 = vadd.f32 %v4066_v57, %v1715_v12 }
0x12f5   :  { %v2188_v0 = vmul.f32 0.35355338, %v2183_v33 }
0x12f6   :  { %v2101_v35 = vsel %vm148_vm0, %v2099_v61, -inf }
0x12f7   :  { %2102 = vmax.xlane.f32.xlu1 %v2101_v35  ;;  %v2190_v52 = vsel %vm148_vm0, %v2188_v0, -inf }
0x12f8   :  { %2191 = vmax.xlane.f32.xlu0 %v2190_v52 }
0x12fb   :  { %v2096_v36 = vpop.f32.mrf.mxu1 }
0x12fc   :  { %v2100_v2 = vmul.f32 0.35355338, %v2096_v36  ;;  %v2185_v38 = vpop.f32.mrf.mxu3 }
0x12fd   :  { %v2189_v10 = vmul.f32 0.35355338, %v2185_v38 }
0x12fe   :  { %v2104_v4 = vsel %vm148_vm0, %v2100_v2, -inf }
0x12ff   :  { %2105 = vmax.xlane.f32.xlu2 %v2104_v4  ;;  %v2193_v15 = vsel %vm148_vm0, %v2189_v10, -inf }
0x1307   :  { %2194 = vmax.xlane.f32.xlu2 %v2193_v15 }
0x135a   :  { %v1999_v13 = vpop.xlane.xlu2 %1998 }
0x135b   :  { %v2003_v43 = vsub.f32 %v1995_v27, %v1999_v13  ;;  %v4141_v27 = vld [vmem:[%s4318_s22] ss:$0 sm:$0xff] }
0x135d   :  { %v2005_v46 = vmul.f32 1.442695, %v2003_v43 }
0x135f   :  { %3286 = vpow2.f32 %v2005_v46 }
0x1361   :  { %v1894_v55 = vpop.f32.mrf.mxu2 }
0x1362   :  { %v2002_v60 = vpop.xlane.xlu0 %2001  ;;  %v1899_v22 = vadd.f32 %v1894_v55, %v1807_v37 }
0x1363   :  { %v2004_v47 = vsub.f32 %v1996_v40, %v2002_v60 }
0x1364   :  { %v2256_v32 = vadd.f32 %v4141_v27, %v1899_v22 }
0x1365   :  { %v4124_v49 = vpop.eup %3286  ;;  %v2007_v50 = vmul.f32 1.442695, %v2004_v47 }
0x1366   :  { %v2009_v51 = vsel %vm148_vm0, %v4124_v49, 0.0  ;;  %v4148_v30 = vadd.f32 %v2256_v32, %v3885_v53 }
0x1367   :  { %3288 = vpow2.f32 %v2007_v50  ;;  %2010 = vadd.xlane.f32.xlu0 %v2009_v51 }
0x1368   :  { %v2298_v40 = vsel %vm1382_vm11, %v4148_v30, 0.0 }
0x1369   :  { %v1896_v28 = vpop.f32.mrf.mxu2 }
0x136a   :  { %v2103_v21 = vpop.xlane.xlu1 %2102 }
0x136b   :  { %v2107_v54 = vsub.f32 %v2099_v61, %v2103_v21  ;;  %v2192_v25 = vpop.xlane.xlu0 %2191  ;;  %v1900_v61 = vadd.f32 %v1896_v28, %v1808_v8 }
0x136c   :  { %v2196_v44 = vsub.f32 %v2188_v0, %v2192_v25 }
0x136d   :  { %v3289_v56 = vpop.eup %3288  ;;  %v2109_v58 = vmul.f32 1.442695, %v2107_v54  ;;  %v2257_v33 = vadd.f32 %v4141_v27, %v1900_v61 }
0x136e   :  { %v2012_v62 = vsel %vm148_vm0, %v3289_v56, 0.0  ;;  %v2198_v14 = vmul.f32 1.442695, %v2196_v44 }
0x136f   :  { %3290 = vpow2.f32 %v2109_v58  ;;  %2013 = vadd.xlane.f32.xlu2 %v2012_v62  ;;  %v4159_v0 = vadd.f32 %v2257_v33, %v3876_v59 }
0x1370   :  { %3292 = vpow2.f32 %v2198_v14 }
0x1371   :  { %v2301_v53 = vsel %vm1382_vm11, %v4159_v0, 0.0 }
0x1372   :  { %v2106_v3 = vpop.xlane.xlu2 %2105 }
0x1373   :  { %v2108_v63 = vsub.f32 %v2100_v2, %v2106_v3 }
0x1375   :  { %v3291_v24 = vpop.eup %3290  ;;  %v2111_v18 = vmul.f32 1.442695, %v2108_v63 }
0x1376   :  { %v2113_v16 = vsel %vm148_vm0, %v3291_v24, 0.0  ;;  %v4130_v19 = vpop.eup %3292 }
0x1377   :  { %3294 = vpow2.f32 %v2111_v18  ;;  %2114 = vadd.xlane.f32.xlu1 %v2113_v16  ;;  %v2202_v41 = vsel %vm148_vm0, %v4130_v19, 0.0 }
0x137a   :  { %v2195_v7 = vpop.xlane.xlu2 %2194 }
0x137b   :  { %v2197_v20 = vsub.f32 %v2189_v10, %v2195_v7  ;;  %2020 = vrot.lane.b32.xlu0 %v4040_v5, %s3397_s25 }
0x137d   :  { %v3295_v26 = vpop.eup %3294  ;;  %v2200_v48 = vmul.f32 1.442695, %v2197_v20 }
0x137e   :  { %v2116_v34 = vsel %vm148_vm0, %v3295_v26, 0.0 }
0x137f   :  { %3296 = vpow2.f32 %v2200_v48  ;;  %2117 = vadd.xlane.f32.xlu2 %v2116_v34  ;;  %2203 = vadd.xlane.f32.xlu1 %v2202_v41 }
0x1383   :  { %2124 = vrot.lane.b32.xlu0 %v4040_v5, %s3399_s15 }
0x1385   :  { %v3297_v6 = vpop.eup %3296 }
0x1386   :  { %v2205_v29 = vsel %vm148_vm0, %v3297_v6, 0.0 }
0x1387   :  { %2206 = vadd.xlane.f32.xlu2 %v2205_v29 }
0x138f   :  { %2299 = vadd.xlane.f32.xlu2 %v2298_v40 }
0x1398   :  { %2213 = vrot.lane.b32.xlu1 %v4040_v5, %s3401_s18 }
0x13ad   :  { %2302 = vadd.xlane.f32.xlu0 %v2301_v53 }
0x13da   :  { %v2011_v35 = vpop.xlane.xlu0 %2010 }
0x13e2   :  { %v2014_v52 = vpop.xlane.xlu2 %2013 }
0x13e3   :  { %3298 = vrcp.f32 %v2014_v52 }
0x13e4   :  { %3300 = vrcp.f32 %v2011_v35 }
0x13e9   :  { %v3299_v5 = vpop.eup %3298 }
0x13ea   :  { %v3301_v36 = vpop.eup %3300  ;;  %v2018_v9 = vmul.f32 %v3299_v5, %v3289_v56  ;;  %v2115_v4 = vpop.xlane.xlu1 %2114 }
0x13eb   :  { %v2017_v11 = vmul.f32 %v3301_v36, %v4124_v49 }
0x13ed   :  { %v2021_v57 = vpop.permute.xlu0 %2020  ;;  %v2019_v2 = vpack.c.bf16 %v2018_v9, %v2017_v11  ;;  %v2958_v11 = vld [vmem:[%s4319_s23 + $0x20] sm:$0xf] }
0x13ee   :  { %2033 = vmatpush.bf16.msra.mxu2 %v2021_v57  ;;  %v3065_v57 = vld [vmem:[%s4319_s23 + $0x24] sm:$0xf0] }
0x13f1   :  { %2931 = vmatmul.msk.bf16.vlgmr.msra.gmra.mxu2 %vm148_vm0, %v2019_v2  ;;  %v3064_v2 = vld [vmem:[%s4319_s23 + $0x24] sm:$0xf] }
0x13f2   :  { %v2118_v59 = vpop.xlane.xlu2 %2117  ;;  %v2204_v60 = vpop.xlane.xlu1 %2203 }
0x13f3   :  { %3302 = vrcp.f32 %v2118_v59  ;;  %v2959_v59 = vor.u32 %v3065_v57, %v2958_v11 }
0x13f4   :  { %3304 = vrcp.f32 %v2115_v4 }
0x13f5   :  { %v2125_v38 = vpop.permute.xlu0 %2124 }
0x13f6   :  { %2137 = vmatpush.bf16.msrb.mxu2 %v2125_v38  ;;  %v2960_v38 = vld [vmem:[%s4319_s23 + $0x28] sm:$0xf0] }
0x13f9   :  { %v3303_v10 = vpop.eup %3302 }
0x13fa   :  { %2244 = vmatpush.bf16.msra.mxu2 %v4110_v23  ;;  %v3305_v15 = vpop.eup %3304  ;;  %v2122_v13 = vmul.f32 %v3303_v10, %v3295_v26  ;;  %v2207_v43 = vpop.xlane.xlu2 %2206  ;;  %v2963_v10 = vor.u32 %v3064_v2, %v2960_v38 }
0x13fb   :  { %v2121_v46 = vmul.f32 %v3305_v15, %v3291_v24  ;;  %3306 = vrcp.f32 %v2207_v43  ;;  %v3063_v43 = vld [vmem:[%s4319_s23 + $0x14] sm:$0xf0] }
0x13fc   :  { %3308 = vrcp.f32 %v2204_v60  ;;  %2467 = vmatpush.bf16.msra.mxu3 %v2963_v10  ;;  %v3073_v10 = vld [vmem:[%s4322_s1 + $0x38] sm:$0xff] }
0x13fd   :  { %v2123_v47 = vpack.c.bf16 %v2122_v13, %v2121_v46  ;;  %v2950_v13 = vld [vmem:[%s4319_s23 + $0x10] sm:$0xf]  ;;  %v3062_v46 = vld [vmem:[%s4319_s23 + $0x14] sm:$0xf] }
0x1401   :  { %2935 = vmatmul.msk.bf16.vlgmr.msrb.gmra.mxu2 %vm148_vm0, %v2123_v47  ;;  %v3307_v49 = vpop.eup %3306  ;;  %v2951_v47 = vor.u32 %v3063_v43, %v2950_v13 }
0x1402   :  { %v3309_v50 = vpop.eup %3308  ;;  %v2211_v51 = vmul.f32 %v3307_v49, %v3297_v6  ;;  %v2300_v28 = vpop.xlane.xlu2 %2299  ;;  %v2952_v49 = vld [vmem:[%s4319_s23 + $0x18] sm:$0xf0] }
0x1403   :  { %v2210_v21 = vmul.f32 %v3309_v50, %v4130_v19  ;;  %v2310_v61 = vmul.f32 %v2300_v28, %v3891_v42 }
0x1405   :  { %v2212_v25 = vpack.c.bf16 %v2211_v51, %v2210_v21  ;;  %v2955_v51 = vor.u32 %v3062_v46, %v2952_v49 }
0x1407   :  { %2468 = vmatpush.bf16.msra.mxu3 %v2955_v51 }
0x140a   :  { %v2214_v54 = vpop.permute.xlu1 %2213 }
0x140b   :  { %2226 = vmatpush.bf16.msra.mxu1 %v2214_v54 }
0x140e   :  { %2938 = vmatmul.msk.bf16.vlgmr.msra.gmra.mxu1 %vm148_vm0, %v2212_v25  ;;  %v2942_v25 = vld [vmem:[%s4319_s23] sm:$0xf] }
0x140f   :  { %2638 = vmatpush.bf16.msrb.mxu1 %v3073_v10 }
0x1420   :  { %v2303_v23 = vpop.xlane.xlu0 %2302 }
0x1421   :  { %v2311_v56 = vmul.f32 %v2303_v23, %v3891_v42  ;;  %v3061_v23 = vld [vmem:[%s4319_s23 + $0x4] sm:$0xf0] }
0x1423   :  { %v4171_v58 = vsub.f32 %v4159_v0, %v2311_v56  ;;  %v3060_v56 = vld [vmem:[%s4319_s23 + $0x4] sm:$0xf] }
0x1425   :  { %v2319_v44 = vmul.f32 %v4171_v58, %v4171_v58 }
0x1427   :  { %v2325_v62 = vsel %vm1382_vm11, %v2319_v44, 0.0 }
0x1428   :  { %2326 = vadd.xlane.f32.xlu1 %v2325_v62  ;;  %v2943_v62 = vor.u32 %v3061_v23, %v2942_v25  ;;  %v3070_v23 = vld [vmem:[%s4322_s1 + $0x20] sm:$0xff] }
0x1474   :  { %v2035_v14 = vpop.f32.mrf.mxu2 }
0x147c   :  { %v2037_v3 = vpop.f32.mrf.mxu2 }
0x147d   :  { %v2040_v63 = vpack.c.bf16 %v2037_v3, %v2035_v14  ;;  %v2944_v14 = vld [vmem:[%s4319_s23 + $0x8] sm:$0xf0] }
0x147f   :  { %2932 = vmatmul.msk.bf16.vlgmr.msrb.gmra.mxu0 %vm342_vm9, %v2040_v63  ;;  %v2947_v63 = vor.u32 %v3060_v56, %v2944_v14 }
0x1480   :  { %2448 = vmatpush.bf16.msrb.mxu0 %v2959_v59 }
0x1481   :  { %2469 = vmatpush.bf16.msra.mxu3 %v2947_v63  ;;  %v3068_v63 = vld [vmem:[%s4322_s1 + $0x10] sm:$0xff] }
0x1484   :  { %v2139_v24 = vpop.f32.mrf.mxu2  ;;  %2449 = vmatpush.bf16.msrb.mxu0 %v2951_v47 }
0x1488   :  { %2450 = vmatpush.bf16.msrb.mxu0 %v2943_v62 }
0x148b   :  { %v2228_v18 = vpop.f32.mrf.mxu1 }
0x148c   :  { %v2141_v16 = vpop.f32.mrf.mxu2 }
0x148d   :  { %v2144_v7 = vpack.c.bf16 %v2141_v16, %v2139_v24 }
0x148f   :  { %2936 = vmatmul.msk.bf16.vlgmr.msra.gmra.mxu0 %vm342_vm9, %v2144_v7 }
0x1493   :  { %v2230_v19 = vpop.f32.mrf.mxu1 }
0x1494   :  { %v2233_v20 = vpack.c.bf16 %v2230_v19, %v2228_v18 }
0x1496   :  { %2939 = vmatmul.msk.bf16.vlgmr.msra.gmra.mxu2 %vm342_vm9, %v2233_v20 }
0x149b   :  { %v2327_v5 = vpop.xlane.xlu1 %2326 }
0x14fc   :  { %v2053_v45 = vpop.f32.mrf.mxu0 }
0x14fd   :  { %v2071_v34 = vadd.f32 %v4114_v31, %v2053_v45 }
0x1504   :  { %v2055_v26 = vpop.f32.mrf.mxu0 }
0x1505   :  { %v2073_v32 = vadd.f32 %v4117_v1, %v2055_v26 }
0x150c   :  { %v2157_v48 = vpop.f32.mrf.mxu0 }
0x150d   :  { %v2162_v41 = vadd.f32 %v2157_v48, %v2071_v34 }
0x1514   :  { %v2159_v6 = vpop.f32.mrf.mxu0 }
0x1515   :  { %v2163_v40 = vadd.f32 %v2159_v6, %v2073_v32  ;;  %v3143_v32 = vld [vmem:[%s4320_s26] ss:$0 sm:$0xff] }
0x1519   :  { %v2246_v55 = vpop.f32.mrf.mxu2 }
0x151a   :  { %v2251_v37 = vadd.f32 %v2246_v55, %v2162_v41 }
0x151c   :  { %v2258_v22 = vadd.f32 %v4141_v27, %v2251_v37 }
0x151e   :  { %v4183_v29 = vadd.f32 %v2258_v22, %v3960_v17  ;;  %v4193_v17 = vsub.f32 %v4148_v30, %v2310_v61 }
0x1520   :  { %v2304_v12 = vsel %vm1382_vm11, %v4183_v29, 0.0  ;;  %v2318_v35 = vmul.f32 %v4193_v17, %v4193_v17 }
0x1521   :  { %v2248_v8 = vpop.f32.mrf.mxu2  ;;  %2305 = vadd.xlane.f32.xlu2 %v2304_v12 }
0x1522   :  { %v2252_v31 = vadd.f32 %v2248_v8, %v2163_v40  ;;  %v2322_v52 = vsel %vm1382_vm11, %v2318_v35, 0.0  ;;  %v3144_v8 = vld [vmem:[%s4321_s28] ss:$0 sm:$0xff] }
0x1524   :  { %v2259_v33 = vadd.f32 %v4141_v27, %v2252_v31  ;;  %v2335_v27 = vmul.f32 %v2327_v5, %v3891_v42 }
0x1526   :  { %v4190_v1 = vadd.f32 %v2259_v33, %v3965_v39  ;;  %v2339_v39 = vadd.f32 1e-05, %v2335_v27 }
0x1528   :  { %v2307_v53 = vsel %vm1382_vm11, %v4190_v1, 0.0  ;;  %3310 = vrsqrt.f32 %v2339_v39  ;;  %vm2358_vm9 = vweird.f32 %v2339_v39 }
0x1529   :  { %2308 = vadd.xlane.f32.xlu2 %v2307_v53 }
0x152e   :  { %v3311_v21 = vpop.eup %3310 }
0x152f   :  { %v2353_v3 = vmul.f32 %v3311_v21, %v2339_v39  ;;  %vm2359_vm0 = vweird.f32 %v3311_v21 }
0x1530   :  { %vm2360_vm2 = vmor %vm2358_vm9, %vm2359_vm0 }
0x1531   :  { %2323 = vadd.xlane.f32.xlu2 %v2322_v52  ;;  %v2354_v16 = vmul.f32 %v3311_v21, %v2353_v3 }
0x1533   :  { %v2355_v45 = vmul.f32 0.5, %v2354_v16  ;;  %v3076_v16 = vld [vmem:[%s4322_s1 + $0x50] sm:$0xff] }
0x1535   :  { %v2356_v26 = vsub.f32 1.5, %v2355_v45  ;;  %v3075_v45 = vld [vmem:[%s4322_s1 + $0x48] sm:$0xff] }
0x1537   :  { %v2357_v34 = vmul.f32 %v3311_v21, %v2356_v26 }
0x1539   :  { %v2361_v37 = vsel %vm2360_vm2, %v3311_v21, %v2357_v34 }
0x153a   :  { %v2383_v40 = vmul.f32 %v2361_v37, %v4171_v58 }
0x153c   :  { %v2390_v31 = vmul.f32 %v3143_v32, %v2383_v40 }
0x153e   :  { %v2397_v53 = vadd.f32 %v3144_v8, %v2390_v31 }
0x1594   :  { %v2306_v36 = vpop.xlane.xlu2 %2305 }
0x1595   :  { %v2312_v9 = vmul.f32 %v2306_v36, %v3891_v42 }
0x1597   :  { %v4206_v4 = vsub.f32 %v4183_v29, %v2312_v9 }
0x1599   :  { %v2320_v15 = vmul.f32 %v4206_v4, %v4206_v4 }
0x159b   :  { %v2328_v60 = vsel %vm1382_vm11, %v2320_v15, 0.0 }
0x159c   :  { %2329 = vadd.xlane.f32.xlu2 %v2328_v60  ;;  %v2309_v50 = vpop.xlane.xlu2 %2308 }
0x159d   :  { %v2313_v54 = vmul.f32 %v2309_v50, %v3891_v42  ;;  %v3071_v50 = vld [vmem:[%s4322_s1 + $0x28] sm:$0xff] }
0x159f   :  { %v4221_v44 = vsub.f32 %v4190_v1, %v2313_v54 }
0x15a1   :  { %v2321_v24 = vmul.f32 %v4221_v44, %v4221_v44 }
0x15a3   :  { %v2331_v18 = vsel %vm1382_vm11, %v2321_v24, 0.0  ;;  %v2272_v24 = vld [vmem:[%s4323_s2] sm:$0x3] }
0x15a4   :  { %2332 = vadd.xlane.f32.xlu2 %v2331_v18  ;;  %v2324_v7 = vpop.xlane.xlu2 %2323  ;;  %v3067_v18 = vld [vmem:[%s4322_s1 + $0x8] sm:$0xff]  ;;  %v4255_v34 = vperm.slane %v2272_v24, 1 }
0x15a5   :  { %v2334_v19 = vmul.f32 %v2324_v7, %v3891_v42  ;;  %v4250_v7 = vperm.slane %v2272_v24, 0 }
0x15a7   :  { %v2338_v20 = vadd.f32 1e-05, %v2334_v19  ;;  %v3066_v19 = vld [vmem:[%s4322_s1] sm:$0xff] }
0x15a9   :  { %3312 = vrsqrt.f32 %v2338_v20  ;;  %vm2348_vm8 = vweird.f32 %v2338_v20 }
0x15af   :  { %v3313_v48 = vpop.eup %3312 }
0x15b0   :  { %v2343_v41 = vmul.f32 %v3313_v48, %v2338_v20  ;;  %vm2349_vm7 = vweird.f32 %v3313_v48 }
0x15b1   :  { %vm2350_vm12 = vmor %vm2348_vm8, %vm2349_vm7 }
0x15b2   :  { %v2344_v55 = vmul.f32 %v3313_v48, %v2343_v41  ;;  %v3074_v41 = vld [vmem:[%s4322_s1 + $0x40] sm:$0xff] }
0x15b4   :  { %v2345_v22 = vmul.f32 0.5, %v2344_v55 }
0x15b6   :  { %v2346_v6 = vsub.f32 1.5, %v2345_v22 }
0x15b8   :  { %v2347_v12 = vmul.f32 %v3313_v48, %v2346_v6 }
0x15ba   :  { %v2351_v28 = vsel %vm2350_vm12, %v3313_v48, %v2347_v12 }
0x15bb   :  { %v2382_v61 = vmul.f32 %v2351_v28, %v4193_v17 }
0x15bd   :  { %v2389_v33 = vmul.f32 %v3143_v32, %v2382_v61 }
0x15bf   :  { %v2396_v35 = vadd.f32 %v3144_v8, %v2389_v33 }
0x15c1   :  { %v2400_v52 = vpack.c.bf16 %v2397_v53, %v2396_v35 }
0x15c3   :  { %2964 = vmatmul.msk.bf16.vlgmr.msrb.gmra.mxu0 %vm1382_vm11, %v2400_v52  ;;  %2966 = vmatmul.msk.bf16.vlgmr.msra.gmra.mxu3 %vm1382_vm11, %v2400_v52 }
0x160f   :  { %v2330_v5 = vpop.xlane.xlu2 %2329 }
0x1610   :  { %v2336_v58 = vmul.f32 %v2330_v5, %v3891_v42 }
0x1612   :  { %v2340_v27 = vadd.f32 1e-05, %v2336_v58 }
0x1614   :  { %3314 = vrsqrt.f32 %v2340_v27  ;;  %vm2368_vm14 = vweird.f32 %v2340_v27 }
0x1617   :  { %v2333_v39 = vpop.xlane.xlu2 %2332 }
0x1618   :  { %v2337_v36 = vmul.f32 %v2333_v39, %v3891_v42  ;;  %v3072_v42 = vld [vmem:[%s4322_s1 + $0x30] sm:$0xff] }
0x1619   :  { %2639 = vmatpush.bf16.msrb.mxu1 %v3072_v42 }
0x161a   :  { %v3315_v9 = vpop.eup %3314  ;;  %v2341_v17 = vadd.f32 1e-05, %v2337_v36 }
0x161b   :  { %v2363_v11 = vmul.f32 %v3315_v9, %v2340_v27  ;;  %vm2369_vm13 = vweird.f32 %v3315_v9 }
0x161c   :  { %3316 = vrsqrt.f32 %v2341_v17  ;;  %vm2370_vm1 = vmor %vm2368_vm14, %vm2369_vm13  ;;  %vm2378_vm3 = vweird.f32 %v2341_v17 }
0x161d   :  { %v2364_v57 = vmul.f32 %v3315_v9, %v2363_v11  ;;  %2640 = vmatpush.bf16.msrb.mxu1 %v3071_v50 }
0x161f   :  { %v2365_v2 = vmul.f32 0.5, %v2364_v57 }
0x1621   :  { %v2366_v59 = vsub.f32 1.5, %v2365_v2  ;;  %2641 = vmatpush.bf16.msrb.mxu1 %v3070_v23 }
0x1622   :  { %v3317_v38 = vpop.eup %3316 }
0x1623   :  { %v2367_v15 = vmul.f32 %v3315_v9, %v2366_v59  ;;  %v2373_v13 = vmul.f32 %v3317_v38, %v2341_v17  ;;  %vm2379_vm15 = vweird.f32 %v3317_v38 }
0x1624   :  { %vm2380_vm4 = vmor %vm2378_vm3, %vm2379_vm15 }
0x1625   :  { %v2374_v43 = vmul.f32 %v3317_v38, %v2373_v13  ;;  %v2371_v46 = vsel %vm2370_vm1, %v3315_v9, %v2367_v15 }
0x1626   :  { %v2384_v49 = vmul.f32 %v2371_v46, %v4206_v4  ;;  %v3069_v4 = vld [vmem:[%s4322_s1 + $0x18] sm:$0xff] }
0x1627   :  { %v2375_v60 = vmul.f32 0.5, %v2374_v43  ;;  %2642 = vmatpush.bf16.msrb.mxu1 %v3069_v4 }
0x1628   :  { %v2391_v25 = vmul.f32 %v3143_v32, %v2384_v49 }
0x1629   :  { %v2376_v47 = vsub.f32 1.5, %v2375_v60 }
0x162a   :  { %v2398_v62 = vadd.f32 %v3144_v8, %v2391_v25 }
0x162b   :  { %v2377_v51 = vmul.f32 %v3317_v38, %v2376_v47  ;;  %2643 = vmatpush.bf16.msrb.mxu1 %v3068_v63 }
0x162d   :  { %v2381_v21 = vsel %vm2380_vm4, %v3317_v38, %v2377_v51 }
0x162e   :  { %v2385_v54 = vmul.f32 %v2381_v21, %v4221_v44  ;;  %v3077_v44 = vld [vmem:[%s4322_s1 + $0x58] sm:$0xff] }
0x162f   :  { %2661 = vmatpush.bf16.msrb.mxu2 %v3077_v44  ;;  %2644 = vmatpush.bf16.msrb.mxu1 %v3067_v18 }
0x1630   :  { %v2392_v56 = vmul.f32 %v3143_v32, %v2385_v54 }
0x1632   :  { %v2399_v14 = vadd.f32 %v3144_v8, %v2392_v56 }
0x1633   :  { %2662 = vmatpush.bf16.msrb.mxu2 %v3076_v16  ;;  %2645 = vmatpush.bf16.msrb.mxu1 %v3066_v19 }
0x1634   :  { %v2401_v3 = vpack.c.bf16 %v2399_v14, %v2398_v62 }
0x1636   :  { %2965 = vmatmul.msk.bf16.gmra.mxu0 %vm1382_vm11, %v2401_v3  ;;  %2967 = vmatmul.msk.bf16.gmra.mxu3 %vm1382_vm11, %v2401_v3 }
0x1637   :  { %2663 = vmatpush.bf16.msrb.mxu2 %v3075_v45 }
0x163b   :  { %2664 = vmatpush.bf16.msrb.mxu2 %v3074_v41 }
0x1640   :  { %v2452_v20 = vpop.f32.mrf.mxu0 }
0x1641   :  { %v2453_v26 = vadd.f32 %v2452_v20, %v4250_v7 }
0x1643   :  { %v2489_v48 = vmul.f32 %v2453_v26, %v2453_v26  ;;  %v2481_v15 = vmul.f32 0.5, %v2453_v26 }
0x1645   :  { %v2497_v55 = vmul.f32 %v2489_v48, %v2453_v26 }
0x1646   :  { %v2471_v37 = vpop.f32.mrf.mxu3 }
0x1647   :  { %v2505_v22 = vmul.f32 0.044715, %v2497_v55  ;;  %v2472_v6 = vadd.f32 %v2471_v37, %v4255_v34 }
0x1648   :  { %v2454_v32 = vpop.f32.mrf.mxu0 }
0x1649   :  { %v2513_v40 = vadd.f32 %v2505_v22, %v2453_v26  ;;  %v2490_v12 = vmul.f32 %v2472_v6, %v2472_v6  ;;  %v2455_v28 = vadd.f32 %v2454_v32, %v4250_v7  ;;  %v2482_v51 = vmul.f32 0.5, %v2472_v6 }
0x164b   :  { %v2498_v8 = vmul.f32 %v2490_v12, %v2472_v6  ;;  %v2491_v31 = vmul.f32 %v2455_v28, %v2455_v28  ;;  %v2521_v61 = vmul.f32 0.7978846, %v2513_v40  ;;  %v2483_v13 = vmul.f32 0.5, %v2455_v28 }
0x164d   :  { %v2506_v33 = vmul.f32 0.044715, %v2498_v8  ;;  %v2499_v53 = vmul.f32 %v2491_v31, %v2455_v28  ;;  %3318 = vtanh.f32 %v2521_v61 }
0x164e   :  { %v2473_v35 = vpop.f32.mrf.mxu3 }
0x164f   :  { %v2514_v52 = vadd.f32 %v2506_v33, %v2472_v6  ;;  %v2507_v5 = vmul.f32 0.044715, %v2499_v53  ;;  %v2474_v58 = vadd.f32 %v2473_v35, %v4255_v34 }
0x1651   :  { %v2515_v27 = vadd.f32 %v2507_v5, %v2455_v28  ;;  %v2492_v39 = vmul.f32 %v2474_v58, %v2474_v58  ;;  %v2522_v36 = vmul.f32 0.7978846, %v2514_v52  ;;  %v2484_v21 = vmul.f32 0.5, %v2474_v58  ;;  %v3036_v52 = vld [vmem:[%s3554_s27 + $0x20] sm:$0xf] }
0x1652   :  { %v3083_v5 = vld [vmem:[%s3554_s27 + $0x24] sm:$0xf0] }
0x1653   :  { %v2523_v9 = vmul.f32 0.7978846, %v2515_v27  ;;  %v2500_v17 = vmul.f32 %v2492_v39, %v2474_v58  ;;  %v3319_v57 = vpop.eup %3318  ;;  %v3082_v27 = vld [vmem:[%s3554_s27 + $0x24] sm:$0xf]  ;;  %v3038_v39 = vld [vmem:[%s3554_s27 + $0x28] sm:$0xf0] }
0x1654   :  { %v2537_v38 = vadd.f32 1.0, %v3319_v57 }
0x1655   :  { %3320 = vtanh.f32 %v2523_v9  ;;  %v2508_v11 = vmul.f32 0.044715, %v2500_v17 }
0x1656   :  { %3322 = vtanh.f32 %v2522_v36  ;;  %v2545_v46 = vmul.f32 %v2537_v38, %v2481_v15  ;;  %v3028_v38 = vld [vmem:[%s3554_s27 + $0x10] sm:$0xf]  ;;  %v3080_v15 = vld [vmem:[%s3554_s27 + $0x14] sm:$0xf] }
0x1657   :  { %v2516_v2 = vadd.f32 %v2508_v11, %v2474_v58  ;;  %v3037_v58 = vor.u32 %v3083_v5, %v3036_v52  ;;  %v3041_v11 = vor.u32 %v3082_v27, %v3038_v39 }
0x1659   :  { %v2524_v59 = vmul.f32 0.7978846, %v2516_v2  ;;  %2735 = vmatpush.bf16.msra.mxu0 %v3037_v58  ;;  %2754 = vmatpush.bf16.msrb.mxu3 %v3041_v11 }
0x165b   :  { %v3321_v10 = vpop.eup %3320  ;;  %3324 = vtanh.f32 %v2524_v59 }
0x165c   :  { %v2539_v43 = vadd.f32 1.0, %v3321_v10  ;;  %v3323_v42 = vpop.eup %3322  ;;  %v3081_v10 = vld [vmem:[%s3554_s27 + $0x14] sm:$0xf0] }
0x165d   :  { %v2538_v47 = vadd.f32 1.0, %v3323_v42 }
0x165e   :  { %v2547_v60 = vmul.f32 %v2539_v43, %v2483_v13  ;;  %v3029_v13 = vor.u32 %v3081_v10, %v3028_v38  ;;  %v3030_v43 = vld [vmem:[%s3554_s27 + $0x18] sm:$0xf0] }
0x165f   :  { %v2546_v25 = vmul.f32 %v2538_v47, %v2482_v51 }
0x1660   :  { %v2553_v49 = vpack.c.bf16 %v2547_v60, %v2545_v46  ;;  %v3033_v60 = vor.u32 %v3080_v15, %v3030_v43  ;;  %2736 = vmatpush.bf16.msra.mxu0 %v3029_v13 }
0x1661   :  { %v3325_v50 = vpop.eup %3324 }
0x1662   :  { %v2540_v54 = vadd.f32 1.0, %v3325_v50  ;;  %2646 = vmatmul.bf16.vlgmr.msrb.gmra.mxu1 %v2553_v49  ;;  %2755 = vmatpush.bf16.msrb.mxu3 %v3033_v60 }
0x1664   :  { %v2548_v23 = vmul.f32 %v2540_v54, %v2484_v21  ;;  %v3020_v21 = vld [vmem:[%s3554_s27] sm:$0xf]  ;;  %v3079_v54 = vld [vmem:[%s3554_s27 + $0x4] sm:$0xf0] }
0x1666   :  { %v2554_v56 = vpack.c.bf16 %v2548_v23, %v2546_v25  ;;  %v3021_v25 = vor.u32 %v3079_v54, %v3020_v21  ;;  %v3078_v23 = vld [vmem:[%s3554_s27 + $0x4] sm:$0xf] }
0x1668   :  { %3016 = vmatmul.msk.bf16.vlgmr.msrb.gmra.mxu2 %vm1292_vm10, %v2554_v56  ;;  %v3022_v56 = vld [vmem:[%s3554_s27 + $0x8] sm:$0xf0]  ;;  %2737 = vmatpush.bf16.msra.mxu0 %v3021_v25 }
0x16b3   :  { %v2457_v62 = vpop.f32.mrf.mxu0 }
0x16b4   :  { %v2458_v14 = vadd.f32 %v2457_v62, %v4250_v7 }
0x16b6   :  { %v2493_v4 = vmul.f32 %v2458_v14, %v2458_v14  ;;  %v2485_v36 = vmul.f32 0.5, %v2458_v14 }
0x16b8   :  { %v2501_v3 = vmul.f32 %v2493_v4, %v2458_v14  ;;  %v3025_v4 = vor.u32 %v3078_v23, %v3022_v56 }
0x16b9   :  { %v2476_v63 = vpop.f32.mrf.mxu3 }
0x16ba   :  { %v2509_v44 = vmul.f32 0.044715, %v2501_v3  ;;  %v2477_v24 = vadd.f32 %v2476_v63, %v4255_v34  ;;  %2756 = vmatpush.bf16.msrb.mxu3 %v3025_v4 }
0x16bb   :  { %v2459_v18 = vpop.f32.mrf.mxu0 }
0x16bc   :  { %v2517_v16 = vadd.f32 %v2509_v44, %v2458_v14  ;;  %v2494_v19 = vmul.f32 %v2477_v24, %v2477_v24  ;;  %v2460_v20 = vadd.f32 %v2459_v18, %v4250_v7  ;;  %v2486_v49 = vmul.f32 0.5, %v2477_v24 }
0x16be   :  { %v2502_v45 = vmul.f32 %v2494_v19, %v2477_v24  ;;  %v2495_v26 = vmul.f32 %v2460_v20, %v2460_v20  ;;  %v2525_v48 = vmul.f32 0.7978846, %v2517_v16  ;;  %v2487_v9 = vmul.f32 0.5, %v2460_v20 }
0x16c0   :  { %v2510_v41 = vmul.f32 0.044715, %v2502_v45  ;;  %v2503_v55 = vmul.f32 %v2495_v26, %v2460_v20  ;;  %3326 = vtanh.f32 %v2525_v48 }
0x16c1   :  { %v2478_v37 = vpop.f32.mrf.mxu3 }
0x16c2   :  { %v2518_v22 = vadd.f32 %v2510_v41, %v2477_v24  ;;  %v2511_v6 = vmul.f32 0.044715, %v2503_v55  ;;  %v2479_v32 = vadd.f32 %v2478_v37, %v4255_v34  ;;  %v3145_v24 = vld [vmem:[%s3549_s20] ss:$0 sm:$0xff]  ;;  %s3403_s20 = smov [#allocation2]  }
0x16c3   :  { %s2780_s27 = sshll.u32 %s3403_s20, 4  ;;  %s2781_s27 = int_to_ptr.vmem [resolvable:$true] %s2780_s27 }
0x16c4   :  { %v2519_v40 = vadd.f32 %v2511_v6, %v2460_v20  ;;  %v2496_v12 = vmul.f32 %v2479_v32, %v2479_v32  ;;  %v2526_v28 = vmul.f32 0.7978846, %v2518_v22  ;;  %v2488_v50 = vmul.f32 0.5, %v2479_v32 }
0x16c6   :  { %v2527_v8 = vmul.f32 0.7978846, %v2519_v40  ;;  %v2504_v7 = vmul.f32 %v2496_v12, %v2479_v32  ;;  %v3327_v61 = vpop.eup %3326 }
0x16c7   :  { %v2541_v35 = vadd.f32 1.0, %v3327_v61 }
0x16c8   :  { %3328 = vtanh.f32 %v2527_v8  ;;  %v2512_v31 = vmul.f32 0.044715, %v2504_v7 }
0x16c9   :  { %3330 = vtanh.f32 %v2526_v28  ;;  %v2549_v2 = vmul.f32 %v2541_v35, %v2485_v36 }
0x16ca   :  { %v2520_v33 = vadd.f32 %v2512_v31, %v2479_v32 }
0x16cc   :  { %v2528_v53 = vmul.f32 0.7978846, %v2520_v33 }
0x16ce   :  { %v3329_v34 = vpop.eup %3328  ;;  %3332 = vtanh.f32 %v2528_v53 }
0x16cf   :  { %v2543_v17 = vadd.f32 1.0, %v3329_v34  ;;  %v3331_v57 = vpop.eup %3330 }
0x16d0   :  { %v2542_v42 = vadd.f32 1.0, %v3331_v57 }
0x16d1   :  { %v2551_v59 = vmul.f32 %v2543_v17, %v2487_v9 }
0x16d2   :  { %v2550_v62 = vmul.f32 %v2542_v42, %v2486_v49 }
0x16d3   :  { %v2555_v46 = vpack.c.bf16 %v2551_v59, %v2549_v2 }
0x16d4   :  { %v3333_v47 = vpop.eup %3332 }
0x16d5   :  { %v2544_v51 = vadd.f32 1.0, %v3333_v47  ;;  %2651 = vmatmul.bf16.gmra.mxu1 %v2555_v46 }
0x16d7   :  { %v2552_v14 = vmul.f32 %v2544_v51, %v2488_v50 }
0x16d9   :  { %v2556_v3 = vpack.c.bf16 %v2552_v14, %v2550_v62 }
0x16db   :  { %3017 = vmatmul.msk.bf16.gmra.mxu2 %vm1292_vm10, %v2556_v3 }
0x16df   :  { %v2647_v63 = vpop.f32.mrf.mxu1 }
0x16e0   :  { %v2648_v16 = vadd.f32 %v3145_v24, %v2647_v63 }
0x16e7   :  { %v2649_v18 = vpop.f32.mrf.mxu1 }
0x16e8   :  { %v2650_v19 = vadd.f32 %v3145_v24, %v2649_v18 }
0x16eb   :  { %v2666_v44 = vpop.f32.mrf.mxu2 }
0x16ec   :  { %v2667_v20 = vadd.f32 %v2666_v44, %v2648_v16 }
0x16ee   :  { %v2676_v48 = vadd.f32 %v2667_v20, %v4148_v30 }
0x16f3   :  { %v2668_v45 = vpop.f32.mrf.mxu2 }
0x16f4   :  { %v2669_v26 = vadd.f32 %v2668_v45, %v2650_v19 }
0x16f6   :  { %v2677_v41 = vadd.f32 %v2669_v26, %v4159_v0  ;;  %v2686_v0 = vld [vmem:[%s3559_s4] sm:$0x3]  ;;  %s2782_s4 = sshll.u32 %s3564_s12, 4  ;;  %s2783_s4 = int_to_ptr.hbm [resolvable:$true] %s2782_s4 }
0x16f7   :  { %v2690_v61 = vperm.slane %v2686_v0, 0  ;;  %v2691_v35 = vperm.slane %v2686_v0, 1  ;;  %s3346_s7 = sshra.s32 %s2783_s4, 4  ;;  %s3347_s7 = int_to_ptr.hbm [resolvable:$true] %s3346_s7 }
0x16f8   :  { %v2687_v55 = vpack.c.bf16 %v2677_v41, %v2676_v48  ;;  %s3348_s10 = scalar_lea.hbm %s3347_s7, 64  ;;  %p3351_p1 = scmp.lt.s32.totalorder %s3347_s7, %s3564_s12 }
0x16f9   :  { %p3349_p0 = scmp.ne.s32.totalorder %s3347_s7, %s3348_s10  ;;  %p3352_p2 = scmp.lt.s32.totalorder %s3350_s11, %s3348_s10 }
0x16fa   :  { %3042 = vmatmul.msk.bf16.vlgmr.msra.gmra.mxu0 %vm1382_vm11, %v2687_v55  ;;  %3044 = vmatmul.msk.bf16.vlgmr.msrb.gmra.mxu3 %vm1382_vm11, %v2687_v55 }
0x16fb   :  { %p3353_p3 = por %p3352_p2, %p3351_p1 }
0x16fd   :  { %p3354_p4 = pnand %p3353_p3, %p3349_p0 }
0x1752   :  { %v2652_v37 = vpop.f32.mrf.mxu1 }
0x1753   :  { %v2653_v32 = vadd.f32 %v3145_v24, %v2652_v37 }
0x175a   :  { %v2654_v6 = vpop.f32.mrf.mxu1 }
0x175b   :  { %v2655_v40 = vadd.f32 %v3145_v24, %v2654_v6 }
0x175e   :  { %v2671_v22 = vpop.f32.mrf.mxu2 }
0x175f   :  { %v2672_v12 = vadd.f32 %v2671_v22, %v2653_v32 }
0x1761   :  { %v2678_v7 = vadd.f32 %v2672_v12, %v4183_v29 }
0x1766   :  { %v2673_v28 = vpop.f32.mrf.mxu2 }
0x1767   :  { %v2674_v8 = vadd.f32 %v2673_v28, %v2655_v40 }
0x1769   :  { %v2679_v30 = vadd.f32 %v2674_v8, %v4190_v1 }
0x176b   :  { %v2688_v31 = vpack.c.bf16 %v2679_v30, %v2678_v7 }
0x176d   :  { %3043 = vmatmul.msk.bf16.gmra.mxu0 %vm1382_vm11, %v2688_v31  ;;  %3045 = vmatmul.msk.bf16.gmra.mxu3 %vm1382_vm11, %v2688_v31 }
0x1777   :  { %v2739_v33 = vpop.f32.mrf.mxu0 }
0x1778   :  { %v2740_v53 = vadd.f32 %v2739_v33, %v2690_v61 }
0x177a   :  { %2768 = vst [vmem:[#allocation2] sm:$0xff] %v2740_v53 }
0x177d   :  { %v2758_v52 = vpop.f32.mrf.mxu3 }
0x177e   :  { %v2759_v5 = vadd.f32 %v2758_v52, %v2691_v35 }
0x177f   :  { %v2741_v34 = vpop.f32.mrf.mxu0 }
0x1780   :  { %2769 = vst [vmem:[#allocation2 + $0x8] sm:$0xff] %v2759_v5  ;;  %v2742_v58 = vadd.f32 %v2741_v34, %v2690_v61 }
0x1782   :  { %2770 = vst [vmem:[#allocation2 + $0x10] sm:$0xff] %v2742_v58 }
0x1785   :  { %v2760_v29 = vpop.f32.mrf.mxu3 }
0x1786   :  { %v2761_v1 = vadd.f32 %v2760_v29, %v2691_v35 }
0x1788   :  { %2771 = vst [vmem:[#allocation2 + $0x18] sm:$0xff] %v2761_v1 }
0x17ea   :  { %v2744_v27 = vpop.f32.mrf.mxu0 }
0x17eb   :  { %v2745_v39 = vadd.f32 %v2744_v27, %v2690_v61 }
0x17ed   :  { %2772 = vst [vmem:[#allocation2 + $0x20] sm:$0xff] %v2745_v39 }
0x17f0   :  { %v2763_v36 = vpop.f32.mrf.mxu3 }
0x17f1   :  { %v2764_v9 = vadd.f32 %v2763_v36, %v2691_v35 }
0x17f2   :  { %v2746_v17 = vpop.f32.mrf.mxu0 }
0x17f3   :  { %2773 = vst [vmem:[#allocation2 + $0x28] sm:$0xff] %v2764_v9  ;;  %v2747_v11 = vadd.f32 %v2746_v17, %v2690_v61 }
0x17f5   :  { %2774 = vst [vmem:[#allocation2 + $0x30] sm:$0xff] %v2747_v11 }
0x17f8   :  { %v2765_v57 = vpop.f32.mrf.mxu3 }
0x17f9   :  { %v2766_v2 = vadd.f32 %v2765_v57, %v2691_v35 }
0x17fb   :  { %2775 = vst [vmem:[#allocation2 + $0x38] sm:$0xff] %v2766_v2 }
0x17fc   :  { %3357 = shalt.err (!%p3354_p4)
}
0x17fd   :  { %s3404_s0 = smov 256   ;;  %s3405_s5 = smov 16  }
0x17fe   :  { %2788 = dma.vmem_to_hbm [thread:$0]  %s2781_s27, 1024, %s2783_s4, [#allocation3], %s3404_s0, %s3404_s0, %s3405_s5  }
0x17ff   :  { %3358 = dma.done.wait [#allocation3], 1024  }
0x1800   :  { %3359 = vsyncadd [#allocation3], 4294966272 }
0x1801   :  { %2793 = vsyncpa [#allocation3], 1 }

</bundles_post_ra>
